<compile_context>
chip_gen: v5e
topology: v5e:2x2
jax: 0.10.0
libtpu: 0.0.40
codegen_flags: <defaults>
</compile_context>

<pallas_src>
import jax
import jax.numpy as jnp
import numpy as np
from jax import lax
from jax.experimental import pallas as pl
from jax.experimental.pallas import tpu as pltpu

# ---------------- configuration (small, consistent with the module) ----------------
B = 2
H = W = 8
DIM = 32              # in_dim == out_dim (required by the residual in the torch code)
NUM_HEADS = 4
HEAD_DIM = DIM // NUM_HEADS
WS = 4                # window_size
SHIFT = 2             # shift_size (0 <= shift < window_size)
MLP_RATIO = 4.0
HID = int(DIM * MLP_RATIO)
N = WS * WS                       # tokens per window
NW = (H // WS) * (W // WS)        # windows per image
L = H * W
T = NW * N                        # tokens per image in window layout (= 64)
TT = B * T                        # fused slab rows (= 128)
SCALE = HEAD_DIM ** (-0.5)
LN_EPS = 1e-5
NEG = -1e9                        # cross-window additive mask for block-diagonal attention


# ---------------- helpers (plain JAX glue: pure permutations / param setup) --------
def window_partition(x, ws):
    b, h, w, c = x.shape
    x = x.reshape(b, h // ws, ws, w // ws, ws, c)
    return x.transpose(0, 1, 3, 2, 4, 5).reshape(-1, ws, ws, c)


def window_reverse(windows, ws, h, w):
    b = windows.shape[0] // (h * w // ws // ws)
    x = windows.reshape(b, h // ws, w // ws, ws, ws, -1)
    return x.transpose(0, 1, 3, 2, 4, 5).reshape(b, h, w, -1)


def make_attn_mask():
    """Exactly mirrors the PyTorch img_mask / attn_mask construction."""
    if SHIFT == 0:
        return np.zeros((NW, N, N), np.float32)
    img_mask = np.zeros((1, H, W, 1), np.float32)
    slices = (slice(0, -WS), slice(-WS, -SHIFT), slice(-SHIFT, None))
    cnt = 0
    for hs in slices:
        for ws_ in slices:
            img_mask[:, hs, ws_, :] = cnt
            cnt += 1
    mw = window_partition(jnp.asarray(img_mask), WS)
    mw = np.asarray(mw).reshape(-1, N)
    am = mw[:, None, :] - mw[:, :, None]            # (nW, N, N)
    am = np.where(am != 0, -100.0, 0.0).astype(np.float32)
    return am


def make_log_rel_index():
    ch = np.arange(WS)
    cw = np.arange(WS)
    coords = np.stack(np.meshgrid(ch, cw, indexing="ij"))          # (2, ws, ws)
    cf = coords.reshape(2, -1)
    rel = cf[:, :, None] - cf[:, None, :]                          # (2, N, N)
    rel = rel.transpose(1, 2, 0).astype(np.float32)                # (N, N, 2)
    return np.sign(rel) * np.log1p(np.abs(rel))


def init_params(key):
    ks = jax.random.split(key, 16)
    std = 0.05
    p = {}
    p["g1"] = 1.0 + 0.1 * jax.random.normal(ks[0], (1, DIM), jnp.float32)
    p["b1"] = std * jax.random.normal(ks[1], (1, DIM), jnp.float32)
    p["wqkv"] = std * jax.random.normal(ks[2], (DIM, 3 * DIM), jnp.float32)
    p["bqkv"] = std * jax.random.normal(ks[3], (1, 3 * DIM), jnp.float32)
    p["wp"] = std * jax.random.normal(ks[4], (DIM, DIM), jnp.float32)
    p["bp"] = std * jax.random.normal(ks[5], (1, DIM), jnp.float32)
    p["g2"] = 1.0 + 0.1 * jax.random.normal(ks[6], (1, DIM), jnp.float32)
    p["b2"] = std * jax.random.normal(ks[7], (1, DIM), jnp.float32)
    p["w1"] = std * jax.random.normal(ks[8], (DIM, HID), jnp.float32)
    p["bm1"] = std * jax.random.normal(ks[9], (1, HID), jnp.float32)
    p["w2"] = std * jax.random.normal(ks[10], (HID, DIM), jnp.float32)
    p["bm2"] = std * jax.random.normal(ks[11], (1, DIM), jnp.float32)
    # continuous relative position bias MLP (cpb): 2 -> 256 -> num_heads
    p["cpb_w1"] = std * jax.random.normal(ks[12], (2, 256), jnp.float32)
    p["cpb_b1"] = std * jax.random.normal(ks[13], (1, 256), jnp.float32)
    p["cpb_w2"] = std * jax.random.normal(ks[14], (256, NUM_HEADS), jnp.float32)
    p["cpb_b2"] = std * jax.random.normal(ks[15], (1, NUM_HEADS), jnp.float32)
    return p


def compute_rel_pos_bias(p, log_rel):
    # parameter-only precompute (constant table, independent of x): kept in plain JAX.
    h = jnp.maximum(log_rel.reshape(N * N, 2) @ p["cpb_w1"] + p["cpb_b1"], 0.0)
    bias = h @ p["cpb_w2"] + p["cpb_b2"]                  # (N*N, nH)
    return bias.reshape(N, N, NUM_HEADS).transpose(2, 0, 1)   # (nH, N, N)


def make_block_bias(rel_bias, mask):
    """(nH, B*T, B*T) additive bias for block-diagonal attention over the fused slab:
    diagonal N x N blocks = rel-pos bias + shift mask (per window position), off-diag = NEG."""
    big = jnp.full((NUM_HEADS, TT, TT), NEG, jnp.float32)
    for b in range(B):
        for w in range(NW):
            i = (b * NW + w) * N
            big = big.at[:, i:i + N, i:i + N].set(rel_bias + mask[w][None])
    return big


def fold_params(p):
    """Parameter-only offline folding (review item: eliminate K=8 contractions).

    Returns:
      vec  : (16, 128)  packed row-vector params + D_all
      wbig : (32, 384)  [ A_all | B_all | W1 ] lane-concatenated
      w2   : (128, 32)
    """
    Wq = p["wqkv"][:, 0:DIM]
    Wk = p["wqkv"][:, DIM:2 * DIM]
    Wv = p["wqkv"][:, 2 * DIM:3 * DIM]
    bq = p["bqkv"][:, 0:DIM]
    bv = p["bqkv"][:, 2 * DIM:3 * DIM]
    Wp = p["wp"]

    A_blocks, B_blocks, d_rows = [], [], []
    for h in range(NUM_HEADS):
        sl = slice(h * HEAD_DIM, (h + 1) * HEAD_DIM)
        Wq_h, Wk_h, Wv_h = Wq[:, sl], Wk[:, sl], Wv[:, sl]
        bq_h = bq[:, sl]                       # (1, HD)
        Wp_h = Wp[sl, :]                       # (HD, C)
        A_blocks.append(SCALE * (Wq_h @ Wk_h.T))     # (C, C)
        B_blocks.append(Wv_h @ Wp_h)                  # (C, C)
        d_rows.append(SCALE * (bq_h @ Wk_h.T))        # (1, C) per-column score correction
    A_all = jnp.concatenate(A_blocks, axis=1)         # (C, nH*C) = (32, 128)
    B_all = jnp.concatenate(B_blocks, axis=1)         # (32, 128)
    D_all = jnp.concatenate(d_rows, axis=0)           # (nH, C)  = (4, 32)
    # v-bias folded through the output projection (softmax rows sum to 1).
    bp_eff = p["bp"] + bv @ Wp                         # (1, C)

    vec = jnp.zeros((16, 128), jnp.float32)
    vec = vec.at[0, 0:DIM].set(p["g1"][0])
    vec = vec.at[1, 0:DIM].set(p["b1"][0])
    vec = vec.at[2, 0:DIM].set(p["g2"][0])
    vec = vec.at[3, 0:DIM].set(p["b2"][0])
    vec = vec.at[4, 0:DIM].set(bp_eff[0])
    vec = vec.at[5, 0:DIM].set(p["bm2"][0])
    vec = vec.at[6, 0:HID].set(p["bm1"][0])
    vec = vec.at[8:8 + NUM_HEADS, 0:DIM].set(D_all)

    wbig = jnp.concatenate([A_all, B_all, p["w1"]], axis=1)   # (32, 384)
    return vec, wbig, p["w2"]


# ---------------- in-kernel math ----------------
def _gelu_tanh(x):
    # tanh-approximate GELU: bulk of the work goes to the EUP (free slot at this size).
    c = np.sqrt(2.0 / np.pi).astype(np.float32)
    return 0.5 * x * (1.0 + jnp.tanh(c * (x + 0.044715 * x * x * x)))


def _layernorm(x, g, b):
    # single-pass statistics: var = E[x^2] - mu^2
    mu = jnp.mean(x, axis=-1, keepdims=True)
    m2 = jnp.mean(x * x, axis=-1, keepdims=True)
    var = m2 - mu * mu
    return (x - mu) * lax.rsqrt(var + LN_EPS) * g + b


# ---------------- the fused block kernel (single grid step, whole batch slab) ----------
def block_kernel(bias_ref, x_ref, vec_ref, wbig_ref, w2_ref, o_ref):
    x = x_ref[...]                                    # (TT, C) = (128, 32)
    vec = vec_ref[...]                                # (16, 128)
    g1 = vec[0:1, 0:DIM]
    b1 = vec[1:2, 0:DIM]
    g2 = vec[2:3, 0:DIM]
    b2 = vec[3:4, 0:DIM]
    bp = vec[4:5, 0:DIM]
    bm2 = vec[5:6, 0:DIM]
    bm1 = vec[6:7, :]                                 # (1, HID)
    dall = vec[8:8 + NUM_HEADS, 0:DIM]                # (nH, C)

    wbig = wbig_ref[...]                              # (32, 384): [A_all | B_all | W1]
    a_all = wbig[:, 0:NUM_HEADS * DIM]                # (32, 128)
    b_all = wbig[:, NUM_HEADS * DIM:2 * NUM_HEADS * DIM]
    w1 = wbig[:, 2 * NUM_HEADS * DIM:2 * NUM_HEADS * DIM + HID]

    shortcut = x

    # ---- LayerNorm1 ----
    xn = _layernorm(x, g1, b1)

    # ---- folded attention precursors (all K in {32}) ----
    qa = jnp.dot(xn, a_all, preferred_element_type=jnp.float32)     # (TT, nH*C)
    vb = jnp.dot(xn, b_all, preferred_element_type=jnp.float32)     # (TT, nH*C)
    dcol = lax.dot_general(dall, xn, (((1,), (1,)), ((), ())),
                           preferred_element_type=jnp.float32)      # (nH, TT)

    # ---- block-diagonal attention over the fused slab; per-head accumulation ----
    acc = None
    for h in range(NUM_HEADS):
        s = lax.dot_general(qa[:, h * DIM:(h + 1) * DIM], xn,
                            (((1,), (1,)), ((), ())),
                            preferred_element_type=jnp.float32)     # (TT, TT)
        s = s + dcol[h:h + 1, :] + bias_ref[h]
        s = s - jnp.max(s, axis=-1, keepdims=True)
        pexp = jnp.exp(s)
        pexp = pexp * pl.reciprocal(jnp.sum(pexp, axis=-1, keepdims=True), approx=True)
        contrib = jnp.dot(pexp, vb[:, h * DIM:(h + 1) * DIM],
                          preferred_element_type=jnp.float32)        # (TT, C)
        acc = contrib if acc is None else acc + contrib

    # ---- residual 1 (v-bias / proj-bias already folded into bp) ----
    x1 = shortcut + acc + bp

    # ---- LayerNorm2 + MLP(GELU) + residual 2 ----
    xn2 = _layernorm(x1, g2, b2)
    hmid = _gelu_tanh(jnp.dot(xn2, w1, preferred_element_type=jnp.float32) + bm1)
    y = jnp.dot(hmid, w2_ref[...], preferred_element_type=jnp.float32) + bm2

    o_ref[...] = x1 + y


def window_block_pallas(x, bias_block, vec, wbig, w2):
    """x: (B, L, C). bias_block: (nH, B*T, B*T). vec/wbig/w2: packed folded params."""
    b, l, c = x.shape
    x4 = x.reshape(b, H, W, c)
    if SHIFT > 0:
        x4 = jnp.roll(x4, (-SHIFT, -SHIFT), axis=(1, 2))
    xw = window_partition(x4, WS).reshape(b * T, c)         # (B*T, C) fused window slab

    full = lambda i: (0, 0)
    grid_spec = pltpu.PrefetchScalarGridSpec(
        num_scalar_prefetch=0,
        grid=(1,),                                          # single step: whole batch fused
        in_specs=[
            pl.BlockSpec((NUM_HEADS, TT, TT), lambda i: (0, 0, 0)),  # resident bias
            pl.BlockSpec((TT, DIM), full),                           # x slab
            pl.BlockSpec((16, 128), full),                           # packed row-vector params
            pl.BlockSpec((DIM, 2 * NUM_HEADS * DIM + HID), full),    # [A|B|W1]
            pl.BlockSpec((HID, DIM), full),                          # W2
        ],
        out_specs=pl.BlockSpec((TT, DIM), full),
    )

    yw = pl.pallas_call(
        block_kernel,
        out_shape=jax.ShapeDtypeStruct((TT, DIM), jnp.float32),
        grid_spec=grid_spec,
        compiler_params=pltpu.CompilerParams(dimension_semantics=("arbitrary",)),
    )(bias_block, xw, vec, wbig, w2)

    y4 = window_reverse(yw.reshape(-1, WS, WS, DIM), WS, H, W)
    if SHIFT > 0:
        y4 = jnp.roll(y4, (SHIFT, SHIFT), axis=(1, 2))
    return y4.reshape(b, l, DIM)


# ---------------- pure-JAX reference (mirrors the PyTorch forward) ----------------
def reference_forward(x, p, rel_bias, mask):
    b, l, c = x.shape
    shortcut = x
    xn = _layernorm(x, p["g1"], p["b1"])
    x4 = xn.reshape(b, H, W, c)
    if SHIFT > 0:
        x4 = jnp.roll(x4, (-SHIFT, -SHIFT), axis=(1, 2))
    xw = window_partition(x4, WS).reshape(-1, N, c)
    b_ = xw.shape[0]

    qkv = xw @ p["wqkv"] + p["bqkv"]
    qkv = qkv.reshape(b_, N, 3, NUM_HEADS, HEAD_DIM).transpose(2, 0, 3, 1, 4)
    q, k, v = qkv[0] * SCALE, qkv[1], qkv[2]
    attn = jnp.einsum("bhnd,bhmd->bhnm", q, k)
    attn = attn + rel_bias[None]
    attn = attn.reshape(b_ // NW, NW, NUM_HEADS, N, N) + mask[None, :, None]
    attn = attn.reshape(b_, NUM_HEADS, N, N)
    attn = jax.nn.softmax(attn, axis=-1)
    out = jnp.einsum("bhnm,bhmd->bhnd", attn, v).transpose(0, 2, 1, 3).reshape(b_, N, c)
    out = out @ p["wp"] + p["bp"]

    y4 = window_reverse(out.reshape(-1, WS, WS, c), WS, H, W)
    if SHIFT > 0:
        y4 = jnp.roll(y4, (SHIFT, SHIFT), axis=(1, 2))
    x1 = shortcut + y4.reshape(b, l, c)

    xn2 = _layernorm(x1, p["g2"], p["b2"])
    hmid = jax.nn.gelu(xn2 @ p["w1"] + p["bm1"], approximate=False)
    y = hmid @ p["w2"] + p["bm2"]
    return x1 + y


# ---------------- main ----------------
if __name__ == "__main__":
    key = jax.random.PRNGKey(0)
    kx, kprm = jax.random.split(key)
    x = jax.random.normal(kx, (B, L, DIM), jnp.float32)

    params = init_params(kprm)
    rel_bias = compute_rel_pos_bias(params, jnp.asarray(make_log_rel_index()))  # (nH,N,N)
    mask = jnp.asarray(make_attn_mask())                                        # (nW,N,N)
    bias_block = make_block_bias(rel_bias, mask)                                # (nH,TT,TT)
    vec, wbig, w2 = fold_params(params)                                         # packed params

    out = jax.jit(window_block_pallas)(x, bias_block, vec, wbig, w2)
    out = jax.block_until_ready(out)

    ref = reference_forward(x, params, rel_bias, mask)
    # tolerance covers the EUP approximate reciprocal in the softmax normalization and the
    # tanh-approximate GELU vs. the exact-erf reference; semantics are otherwise identical.
    np.testing.assert_allclose(np.asarray(out), np.asarray(ref), rtol=2e-3, atol=2e-3)

    print("KERNEL_OK")
</pallas_src>

<mosaic_0001>
module attributes {stable_mosaic.version = 11 : i64} {
  func.func @block_kernel(%arg0: i32, %arg1: memref<4x128x128xf32, #tpu.memory_space<vmem>>, %arg2: memref<128x32xf32, #tpu.memory_space<vmem>>, %arg3: memref<16x128xf32, #tpu.memory_space<vmem>>, %arg4: memref<32x384xf32, #tpu.memory_space<vmem>>, %arg5: memref<128x32xf32, #tpu.memory_space<vmem>>, %arg6: memref<128x32xf32, #tpu.memory_space<vmem>>) attributes {dimension_semantics = [#tpu.dimension_semantics<arbitrary>], iteration_bounds = array<i64: 1>, scalar_prefetch = 0 : i64, scratch_operands = 0 : i64, tpu.core_type = #tpu.core_type<tc>, window_params = [{pipeline_mode = #tpu.pipeline_mode<synchronous>, transform_indices = @transform_0, window_bounds = array<i64: 4, 128, 128>}, {pipeline_mode = #tpu.pipeline_mode<synchronous>, transform_indices = @transform_1, window_bounds = array<i64: 128, 32>}, {pipeline_mode = #tpu.pipeline_mode<synchronous>, transform_indices = @transform_2, window_bounds = array<i64: 16, 128>}, {pipeline_mode = #tpu.pipeline_mode<synchronous>, transform_indices = @transform_3, window_bounds = array<i64: 32, 384>}, {pipeline_mode = #tpu.pipeline_mode<synchronous>, transform_indices = @transform_4, window_bounds = array<i64: 128, 32>}, {pipeline_mode = #tpu.pipeline_mode<synchronous>, transform_indices = @transform_5, window_bounds = array<i64: 128, 32>}]} {
    %c0 = arith.constant 0 : index
    %c0_0 = arith.constant 0 : index
    %0 = vector.load %arg2[%c0, %c0_0] : memref<128x32xf32, #tpu.memory_space<vmem>>, vector<128x32xf32>
    %c0_1 = arith.constant 0 : index
    %c0_2 = arith.constant 0 : index
    %1 = vector.load %arg3[%c0_1, %c0_2] : memref<16x128xf32, #tpu.memory_space<vmem>>, vector<16x128xf32>
    %2 = vector.extract_strided_slice %1 {offsets = [0, 0], sizes = [1, 32], strides = [1, 1]} : vector<16x128xf32> to vector<1x32xf32>
    %3 = vector.extract_strided_slice %1 {offsets = [1, 0], sizes = [1, 32], strides = [1, 1]} : vector<16x128xf32> to vector<1x32xf32>
    %4 = vector.extract_strided_slice %1 {offsets = [2, 0], sizes = [1, 32], strides = [1, 1]} : vector<16x128xf32> to vector<1x32xf32>
    %5 = vector.extract_strided_slice %1 {offsets = [3, 0], sizes = [1, 32], strides = [1, 1]} : vector<16x128xf32> to vector<1x32xf32>
    %6 = vector.extract_strided_slice %1 {offsets = [4, 0], sizes = [1, 32], strides = [1, 1]} : vector<16x128xf32> to vector<1x32xf32>
    %7 = vector.extract_strided_slice %1 {offsets = [5, 0], sizes = [1, 32], strides = [1, 1]} : vector<16x128xf32> to vector<1x32xf32>
    %8 = vector.extract_strided_slice %1 {offsets = [6, 0], sizes = [1, 128], strides = [1, 1]} : vector<16x128xf32> to vector<1x128xf32>
    %9 = vector.extract_strided_slice %1 {offsets = [8, 0], sizes = [4, 32], strides = [1, 1]} : vector<16x128xf32> to vector<4x32xf32>
    %c0_3 = arith.constant 0 : index
    %c0_4 = arith.constant 0 : index
    %10 = vector.load %arg4[%c0_3, %c0_4] : memref<32x384xf32, #tpu.memory_space<vmem>>, vector<32x384xf32>
    %11 = vector.extract_strided_slice %10 {offsets = [0, 0], sizes = [32, 128], strides = [1, 1]} : vector<32x384xf32> to vector<32x128xf32>
    %12 = vector.extract_strided_slice %10 {offsets = [0, 128], sizes = [32, 128], strides = [1, 1]} : vector<32x384xf32> to vector<32x128xf32>
    %13 = vector.extract_strided_slice %10 {offsets = [0, 256], sizes = [32, 128], strides = [1, 1]} : vector<32x384xf32> to vector<32x128xf32>
    %cst = arith.constant dense<0.000000e+00> : vector<128xf32>
    %14 = vector.multi_reduction <add>, %0, %cst [1] : vector<128x32xf32> to vector<128xf32>
    %15 = vector.shape_cast %14 : vector<128xf32> to vector<128x1xf32>
    %cst_5 = arith.constant 3.200000e+01 : f32
    %16 = vector.broadcast %cst_5 : f32 to vector<128x1xf32>
    %17 = arith.divf %15, %16 : vector<128x1xf32>
    %18 = arith.mulf %0, %0 : vector<128x32xf32>
    %cst_6 = arith.constant dense<0.000000e+00> : vector<128xf32>
    %19 = vector.multi_reduction <add>, %18, %cst_6 [1] : vector<128x32xf32> to vector<128xf32>
    %20 = vector.shape_cast %19 : vector<128xf32> to vector<128x1xf32>
    %cst_7 = arith.constant 3.200000e+01 : f32
    %21 = vector.broadcast %cst_7 : f32 to vector<128x1xf32>
    %22 = arith.divf %20, %21 : vector<128x1xf32>
    %23 = arith.mulf %17, %17 : vector<128x1xf32>
    %24 = arith.subf %22, %23 : vector<128x1xf32>
    %25 = vector.broadcast %17 : vector<128x1xf32> to vector<128x32xf32>
    %26 = arith.subf %0, %25 : vector<128x32xf32>
    %cst_8 = arith.constant 9.99999974E-6 : f32
    %27 = vector.broadcast %cst_8 : f32 to vector<128x1xf32>
    %28 = arith.addf %24, %27 : vector<128x1xf32>
    %29 = math.rsqrt %28 : vector<128x1xf32>
    %30 = vector.broadcast %29 : vector<128x1xf32> to vector<128x32xf32>
    %31 = arith.mulf %26, %30 : vector<128x32xf32>
    %32 = vector.broadcast %2 : vector<1x32xf32> to vector<128x32xf32>
    %33 = arith.mulf %31, %32 : vector<128x32xf32>
    %34 = vector.broadcast %3 : vector<1x32xf32> to vector<128x32xf32>
    %35 = arith.addf %33, %34 : vector<128x32xf32>
    %cst_9 = arith.constant dense<0.000000e+00> : vector<128x128xf32>
    %36 = tpu.matmul %35, %11, %cst_9 {dimension_numbers = #tpu.dot_dimension_numbers<[1], [0], [0], [1], [0, 0, 1, 1], [], []>} : vector<128x32xf32>, vector<32x128xf32>, vector<128x128xf32> -> vector<128x128xf32>
    %cst_10 = arith.constant dense<0.000000e+00> : vector<128x128xf32>
    %37 = tpu.matmul %35, %12, %cst_10 {dimension_numbers = #tpu.dot_dimension_numbers<[1], [0], [0], [1], [0, 0, 1, 1], [], []>} : vector<128x32xf32>, vector<32x128xf32>, vector<128x128xf32> -> vector<128x128xf32>
    %cst_11 = arith.constant dense<0.000000e+00> : vector<4x128xf32>
    %38 = tpu.matmul %9, %35, %cst_11 {dimension_numbers = #tpu.dot_dimension_numbers<[1], [1], [0], [0], [0, 0, 1, 0], [], []>} : vector<4x32xf32>, vector<128x32xf32>, vector<4x128xf32> -> vector<4x128xf32>
    %39 = vector.extract_strided_slice %36 {offsets = [0, 0], sizes = [128, 32], strides = [1, 1]} : vector<128x128xf32> to vector<128x32xf32>
    %cst_12 = arith.constant dense<0.000000e+00> : vector<128x128xf32>
    %40 = tpu.matmul %39, %35, %cst_12 {dimension_numbers = #tpu.dot_dimension_numbers<[1], [1], [0], [0], [0, 0, 1, 0], [], []>} : vector<128x32xf32>, vector<128x32xf32>, vector<128x128xf32> -> vector<128x128xf32>
    %41 = vector.extract_strided_slice %38 {offsets = [0, 0], sizes = [1, 128], strides = [1, 1]} : vector<4x128xf32> to vector<1x128xf32>
    %42 = vector.broadcast %41 : vector<1x128xf32> to vector<128x128xf32>
    %43 = arith.addf %40, %42 : vector<128x128xf32>
    %c0_13 = arith.constant 0 : index
    %c0_14 = arith.constant 0 : index
    %c0_15 = arith.constant 0 : index
    %44 = vector.load %arg1[%c0_13, %c0_14, %c0_15] : memref<4x128x128xf32, #tpu.memory_space<vmem>>, vector<1x128x128xf32>
    %45 = vector.shape_cast %44 : vector<1x128x128xf32> to vector<128x128xf32>
    %46 = arith.addf %43, %45 : vector<128x128xf32>
    %cst_16 = arith.constant dense<0xFF800000> : vector<128xf32>
    %47 = vector.multi_reduction <maximumf>, %46, %cst_16 [1] : vector<128x128xf32> to vector<128xf32>
    %48 = vector.shape_cast %47 : vector<128xf32> to vector<128x1xf32>
    %49 = vector.broadcast %48 : vector<128x1xf32> to vector<128x128xf32>
    %50 = arith.subf %46, %49 : vector<128x128xf32>
    %51 = math.exp %50 : vector<128x128xf32>
    %cst_17 = arith.constant dense<0.000000e+00> : vector<128xf32>
    %52 = vector.multi_reduction <add>, %51, %cst_17 [1] : vector<128x128xf32> to vector<128xf32>
    %53 = vector.shape_cast %52 : vector<128xf32> to vector<128x1xf32>
    %54 = tpu.reciprocal %53 {approx = true} : vector<128x1xf32> -> vector<128x1xf32>
    %55 = vector.broadcast %54 : vector<128x1xf32> to vector<128x128xf32>
    %56 = arith.mulf %51, %55 : vector<128x128xf32>
    %57 = vector.extract_strided_slice %37 {offsets = [0, 0], sizes = [128, 32], strides = [1, 1]} : vector<128x128xf32> to vector<128x32xf32>
    %cst_18 = arith.constant dense<0.000000e+00> : vector<128x32xf32>
    %58 = tpu.matmul %56, %57, %cst_18 {dimension_numbers = #tpu.dot_dimension_numbers<[1], [0], [0], [1], [0, 0, 1, 1], [], []>} : vector<128x128xf32>, vector<128x32xf32>, vector<128x32xf32> -> vector<128x32xf32>
    %59 = vector.extract_strided_slice %36 {offsets = [0, 32], sizes = [128, 32], strides = [1, 1]} : vector<128x128xf32> to vector<128x32xf32>
    %cst_19 = arith.constant dense<0.000000e+00> : vector<128x128xf32>
    %60 = tpu.matmul %59, %35, %cst_19 {dimension_numbers = #tpu.dot_dimension_numbers<[1], [1], [0], [0], [0, 0, 1, 0], [], []>} : vector<128x32xf32>, vector<128x32xf32>, vector<128x128xf32> -> vector<128x128xf32>
    %61 = vector.extract_strided_slice %38 {offsets = [1, 0], sizes = [1, 128], strides = [1, 1]} : vector<4x128xf32> to vector<1x128xf32>
    %62 = vector.broadcast %61 : vector<1x128xf32> to vector<128x128xf32>
    %63 = arith.addf %60, %62 : vector<128x128xf32>
    %c1 = arith.constant 1 : index
    %c0_20 = arith.constant 0 : index
    %c0_21 = arith.constant 0 : index
    %64 = vector.load %arg1[%c1, %c0_20, %c0_21] : memref<4x128x128xf32, #tpu.memory_space<vmem>>, vector<1x128x128xf32>
    %65 = vector.shape_cast %64 : vector<1x128x128xf32> to vector<128x128xf32>
    %66 = arith.addf %63, %65 : vector<128x128xf32>
    %cst_22 = arith.constant dense<0xFF800000> : vector<128xf32>
    %67 = vector.multi_reduction <maximumf>, %66, %cst_22 [1] : vector<128x128xf32> to vector<128xf32>
    %68 = vector.shape_cast %67 : vector<128xf32> to vector<128x1xf32>
    %69 = vector.broadcast %68 : vector<128x1xf32> to vector<128x128xf32>
    %70 = arith.subf %66, %69 : vector<128x128xf32>
    %71 = math.exp %70 : vector<128x128xf32>
    %cst_23 = arith.constant dense<0.000000e+00> : vector<128xf32>
    %72 = vector.multi_reduction <add>, %71, %cst_23 [1] : vector<128x128xf32> to vector<128xf32>
    %73 = vector.shape_cast %72 : vector<128xf32> to vector<128x1xf32>
    %74 = tpu.reciprocal %73 {approx = true} : vector<128x1xf32> -> vector<128x1xf32>
    %75 = vector.broadcast %74 : vector<128x1xf32> to vector<128x128xf32>
    %76 = arith.mulf %71, %75 : vector<128x128xf32>
    %77 = vector.extract_strided_slice %37 {offsets = [0, 32], sizes = [128, 32], strides = [1, 1]} : vector<128x128xf32> to vector<128x32xf32>
    %cst_24 = arith.constant dense<0.000000e+00> : vector<128x32xf32>
    %78 = tpu.matmul %76, %77, %cst_24 {dimension_numbers = #tpu.dot_dimension_numbers<[1], [0], [0], [1], [0, 0, 1, 1], [], []>} : vector<128x128xf32>, vector<128x32xf32>, vector<128x32xf32> -> vector<128x32xf32>
    %79 = arith.addf %58, %78 : vector<128x32xf32>
    %80 = vector.extract_strided_slice %36 {offsets = [0, 64], sizes = [128, 32], strides = [1, 1]} : vector<128x128xf32> to vector<128x32xf32>
    %cst_25 = arith.constant dense<0.000000e+00> : vector<128x128xf32>
    %81 = tpu.matmul %80, %35, %cst_25 {dimension_numbers = #tpu.dot_dimension_numbers<[1], [1], [0], [0], [0, 0, 1, 0], [], []>} : vector<128x32xf32>, vector<128x32xf32>, vector<128x128xf32> -> vector<128x128xf32>
    %82 = vector.extract_strided_slice %38 {offsets = [2, 0], sizes = [1, 128], strides = [1, 1]} : vector<4x128xf32> to vector<1x128xf32>
    %83 = vector.broadcast %82 : vector<1x128xf32> to vector<128x128xf32>
    %84 = arith.addf %81, %83 : vector<128x128xf32>
    %c2 = arith.constant 2 : index
    %c0_26 = arith.constant 0 : index
    %c0_27 = arith.constant 0 : index
    %85 = vector.load %arg1[%c2, %c0_26, %c0_27] : memref<4x128x128xf32, #tpu.memory_space<vmem>>, vector<1x128x128xf32>
    %86 = vector.shape_cast %85 : vector<1x128x128xf32> to vector<128x128xf32>
    %87 = arith.addf %84, %86 : vector<128x128xf32>
    %cst_28 = arith.constant dense<0xFF800000> : vector<128xf32>
    %88 = vector.multi_reduction <maximumf>, %87, %cst_28 [1] : vector<128x128xf32> to vector<128xf32>
    %89 = vector.shape_cast %88 : vector<128xf32> to vector<128x1xf32>
    %90 = vector.broadcast %89 : vector<128x1xf32> to vector<128x128xf32>
    %91 = arith.subf %87, %90 : vector<128x128xf32>
    %92 = math.exp %91 : vector<128x128xf32>
    %cst_29 = arith.constant dense<0.000000e+00> : vector<128xf32>
    %93 = vector.multi_reduction <add>, %92, %cst_29 [1] : vector<128x128xf32> to vector<128xf32>
    %94 = vector.shape_cast %93 : vector<128xf32> to vector<128x1xf32>
    %95 = tpu.reciprocal %94 {approx = true} : vector<128x1xf32> -> vector<128x1xf32>
    %96 = vector.broadcast %95 : vector<128x1xf32> to vector<128x128xf32>
    %97 = arith.mulf %92, %96 : vector<128x128xf32>
    %98 = vector.extract_strided_slice %37 {offsets = [0, 64], sizes = [128, 32], strides = [1, 1]} : vector<128x128xf32> to vector<128x32xf32>
    %cst_30 = arith.constant dense<0.000000e+00> : vector<128x32xf32>
    %99 = tpu.matmul %97, %98, %cst_30 {dimension_numbers = #tpu.dot_dimension_numbers<[1], [0], [0], [1], [0, 0, 1, 1], [], []>} : vector<128x128xf32>, vector<128x32xf32>, vector<128x32xf32> -> vector<128x32xf32>
    %100 = arith.addf %79, %99 : vector<128x32xf32>
    %101 = vector.extract_strided_slice %36 {offsets = [0, 96], sizes = [128, 32], strides = [1, 1]} : vector<128x128xf32> to vector<128x32xf32>
    %cst_31 = arith.constant dense<0.000000e+00> : vector<128x128xf32>
    %102 = tpu.matmul %101, %35, %cst_31 {dimension_numbers = #tpu.dot_dimension_numbers<[1], [1], [0], [0], [0, 0, 1, 0], [], []>} : vector<128x32xf32>, vector<128x32xf32>, vector<128x128xf32> -> vector<128x128xf32>
    %103 = vector.extract_strided_slice %38 {offsets = [3, 0], sizes = [1, 128], strides = [1, 1]} : vector<4x128xf32> to vector<1x128xf32>
    %104 = vector.broadcast %103 : vector<1x128xf32> to vector<128x128xf32>
    %105 = arith.addf %102, %104 : vector<128x128xf32>
    %c3 = arith.constant 3 : index
    %c0_32 = arith.constant 0 : index
    %c0_33 = arith.constant 0 : index
    %106 = vector.load %arg1[%c3, %c0_32, %c0_33] : memref<4x128x128xf32, #tpu.memory_space<vmem>>, vector<1x128x128xf32>
    %107 = vector.shape_cast %106 : vector<1x128x128xf32> to vector<128x128xf32>
    %108 = arith.addf %105, %107 : vector<128x128xf32>
    %cst_34 = arith.constant dense<0xFF800000> : vector<128xf32>
    %109 = vector.multi_reduction <maximumf>, %108, %cst_34 [1] : vector<128x128xf32> to vector<128xf32>
    %110 = vector.shape_cast %109 : vector<128xf32> to vector<128x1xf32>
    %111 = vector.broadcast %110 : vector<128x1xf32> to vector<128x128xf32>
    %112 = arith.subf %108, %111 : vector<128x128xf32>
    %113 = math.exp %112 : vector<128x128xf32>
    %cst_35 = arith.constant dense<0.000000e+00> : vector<128xf32>
    %114 = vector.multi_reduction <add>, %113, %cst_35 [1] : vector<128x128xf32> to vector<128xf32>
    %115 = vector.shape_cast %114 : vector<128xf32> to vector<128x1xf32>
    %116 = tpu.reciprocal %115 {approx = true} : vector<128x1xf32> -> vector<128x1xf32>
    %117 = vector.broadcast %116 : vector<128x1xf32> to vector<128x128xf32>
    %118 = arith.mulf %113, %117 : vector<128x128xf32>
    %119 = vector.extract_strided_slice %37 {offsets = [0, 96], sizes = [128, 32], strides = [1, 1]} : vector<128x128xf32> to vector<128x32xf32>
    %cst_36 = arith.constant dense<0.000000e+00> : vector<128x32xf32>
    %120 = tpu.matmul %118, %119, %cst_36 {dimension_numbers = #tpu.dot_dimension_numbers<[1], [0], [0], [1], [0, 0, 1, 1], [], []>} : vector<128x128xf32>, vector<128x32xf32>, vector<128x32xf32> -> vector<128x32xf32>
    %121 = arith.addf %100, %120 : vector<128x32xf32>
    %122 = arith.addf %0, %121 : vector<128x32xf32>
    %123 = vector.broadcast %6 : vector<1x32xf32> to vector<128x32xf32>
    %124 = arith.addf %122, %123 : vector<128x32xf32>
    %cst_37 = arith.constant dense<0.000000e+00> : vector<128xf32>
    %125 = vector.multi_reduction <add>, %124, %cst_37 [1] : vector<128x32xf32> to vector<128xf32>
    %126 = vector.shape_cast %125 : vector<128xf32> to vector<128x1xf32>
    %cst_38 = arith.constant 3.200000e+01 : f32
    %127 = vector.broadcast %cst_38 : f32 to vector<128x1xf32>
    %128 = arith.divf %126, %127 : vector<128x1xf32>
    %129 = arith.mulf %124, %124 : vector<128x32xf32>
    %cst_39 = arith.constant dense<0.000000e+00> : vector<128xf32>
    %130 = vector.multi_reduction <add>, %129, %cst_39 [1] : vector<128x32xf32> to vector<128xf32>
    %131 = vector.shape_cast %130 : vector<128xf32> to vector<128x1xf32>
    %cst_40 = arith.constant 3.200000e+01 : f32
    %132 = vector.broadcast %cst_40 : f32 to vector<128x1xf32>
    %133 = arith.divf %131, %132 : vector<128x1xf32>
    %134 = arith.mulf %128, %128 : vector<128x1xf32>
    %135 = arith.subf %133, %134 : vector<128x1xf32>
    %136 = vector.broadcast %128 : vector<128x1xf32> to vector<128x32xf32>
    %137 = arith.subf %124, %136 : vector<128x32xf32>
    %cst_41 = arith.constant 9.99999974E-6 : f32
    %138 = vector.broadcast %cst_41 : f32 to vector<128x1xf32>
    %139 = arith.addf %135, %138 : vector<128x1xf32>
    %140 = math.rsqrt %139 : vector<128x1xf32>
    %141 = vector.broadcast %140 : vector<128x1xf32> to vector<128x32xf32>
    %142 = arith.mulf %137, %141 : vector<128x32xf32>
    %143 = vector.broadcast %4 : vector<1x32xf32> to vector<128x32xf32>
    %144 = arith.mulf %142, %143 : vector<128x32xf32>
    %145 = vector.broadcast %5 : vector<1x32xf32> to vector<128x32xf32>
    %146 = arith.addf %144, %145 : vector<128x32xf32>
    %cst_42 = arith.constant dense<0.000000e+00> : vector<128x128xf32>
    %147 = tpu.matmul %146, %13, %cst_42 {dimension_numbers = #tpu.dot_dimension_numbers<[1], [0], [0], [1], [0, 0, 1, 1], [], []>} : vector<128x32xf32>, vector<32x128xf32>, vector<128x128xf32> -> vector<128x128xf32>
    %148 = vector.broadcast %8 : vector<1x128xf32> to vector<128x128xf32>
    %149 = arith.addf %147, %148 : vector<128x128xf32>
    %cst_43 = arith.constant 5.000000e-01 : f32
    %150 = vector.broadcast %cst_43 : f32 to vector<128x128xf32>
    %151 = arith.mulf %150, %149 : vector<128x128xf32>
    %cst_44 = arith.constant 4.471500e-02 : f32
    %152 = vector.broadcast %cst_44 : f32 to vector<128x128xf32>
    %153 = arith.mulf %152, %149 : vector<128x128xf32>
    %154 = arith.mulf %153, %149 : vector<128x128xf32>
    %155 = arith.mulf %154, %149 : vector<128x128xf32>
    %156 = arith.addf %149, %155 : vector<128x128xf32>
    %cst_45 = arith.constant 0.797884583 : f32
    %157 = vector.broadcast %cst_45 : f32 to vector<128x128xf32>
    %158 = arith.mulf %157, %156 : vector<128x128xf32>
    %159 = math.tanh %158 : vector<128x128xf32>
    %cst_46 = arith.constant 1.000000e+00 : f32
    %160 = vector.broadcast %cst_46 : f32 to vector<128x128xf32>
    %161 = arith.addf %160, %159 : vector<128x128xf32>
    %162 = arith.mulf %151, %161 : vector<128x128xf32>
    %c0_47 = arith.constant 0 : index
    %c0_48 = arith.constant 0 : index
    %163 = vector.load %arg5[%c0_47, %c0_48] : memref<128x32xf32, #tpu.memory_space<vmem>>, vector<128x32xf32>
    %cst_49 = arith.constant dense<0.000000e+00> : vector<128x32xf32>
    %164 = tpu.matmul %162, %163, %cst_49 {dimension_numbers = #tpu.dot_dimension_numbers<[1], [0], [0], [1], [0, 0, 1, 1], [], []>} : vector<128x128xf32>, vector<128x32xf32>, vector<128x32xf32> -> vector<128x32xf32>
    %165 = vector.broadcast %7 : vector<1x32xf32> to vector<128x32xf32>
    %166 = arith.addf %164, %165 : vector<128x32xf32>
    %167 = arith.addf %124, %166 : vector<128x32xf32>
    %c0_50 = arith.constant 0 : index
    %c0_51 = arith.constant 0 : index
    %168 = vector.load %arg6[%c0_50, %c0_51] : memref<128x32xf32, #tpu.memory_space<vmem>>, vector<128x32xf32>
    tpu.vector_store %arg6[%c0_50, %c0_51], %167 {strides = array<i32>} : memref<128x32xf32, #tpu.memory_space<vmem>>, vector<128x32xf32>,
    return
  }
  func.func @transform_0(%arg0: i32) -> (i32, i32, i32) {
    %c0_i32 = arith.constant 0 : i32
    %c0_i32_0 = arith.constant 0 : i32
    %c0_i32_1 = arith.constant 0 : i32
    %c0_i32_2 = arith.constant 0 : i32
    return %c0_i32, %c0_i32_0, %c0_i32_1 : i32, i32, i32
  }
  func.func @transform_1(%arg0: i32) -> (i32, i32) {
    %c0_i32 = arith.constant 0 : i32
    %c0_i32_0 = arith.constant 0 : i32
    %c0_i32_1 = arith.constant 0 : i32
    return %c0_i32, %c0_i32_0 : i32, i32
  }
  func.func @transform_2(%arg0: i32) -> (i32, i32) {
    %c0_i32 = arith.constant 0 : i32
    %c0_i32_0 = arith.constant 0 : i32
    %c0_i32_1 = arith.constant 0 : i32
    return %c0_i32, %c0_i32_0 : i32, i32
  }
  func.func @transform_3(%arg0: i32) -> (i32, i32) {
    %c0_i32 = arith.constant 0 : i32
    %c0_i32_0 = arith.constant 0 : i32
    %c0_i32_1 = arith.constant 0 : i32
    return %c0_i32, %c0_i32_0 : i32, i32
  }
  func.func @transform_4(%arg0: i32) -> (i32, i32) {
    %c0_i32 = arith.constant 0 : i32
    %c0_i32_0 = arith.constant 0 : i32
    %c0_i32_1 = arith.constant 0 : i32
    return %c0_i32, %c0_i32_0 : i32, i32
  }
  func.func @transform_5(%arg0: i32) -> (i32, i32) {
    %c0_i32 = arith.constant 0 : i32
    %c0_i32_0 = arith.constant 0 : i32
    %c0_i32_1 = arith.constant 0 : i32
    return %c0_i32, %c0_i32_0 : i32, i32
  }
}

</mosaic_0001>

<bundles_post_ra>
// kernel: window_block_pallas.1
= control target key start
LH: loop header
LB: loop body
LE: loop exit
PB: predicated region body
PF: predicated region fallthrough
CT: control target
= control target key end

     0   :  { %vm50_vm0 = vcmask 261120   ;;  %s3921_s18 = smov 32   ;;  %s3922_s19 = smov 96   ;;  %s6635_s1 = inlined_call_operand.vmem [shape: f32[128,32], index: 1, kind: input, shape index: {}]   ;;  %s6636_s3 = inlined_call_operand.vmem [shape: f32[32,384], index: 3, kind: input, shape index: {}]   ;;  %s6637_s2 = inlined_call_operand.vmem [shape: f32[16,128], index: 2, kind: input, shape index: {}]   ;;  %s6638_s0 = inlined_call_operand.vmem [shape: f32[4,128,128], index: 0, kind: input, shape index: {}]   ;;  %s6639_s4 = inlined_call_operand.vmem [shape: f32[128,32], index: 4, kind: input, shape index: {}]   ;;  %s6640_s5 = inlined_call_operand.vmem [shape: f32[128,32], index: 5, kind: output, shape index: {}]  }
   0x1   :  { %v3957_v0 = vld [vmem:[%s6635_s1 + $0x10] sm:$0xff]  ;;  %v3962_v1 = vld [vmem:[%s6635_s1 + $0x8] sm:$0xff]  ;;  %v3967_v2 = vld [vmem:[%s6635_s1] sm:$0xff]  ;;  %s3923_s22 = smov 64  }
   0x2   :  { %v57_v3 = vsel %vm50_vm0, %v3957_v0, 0.0  ;;  %v54_v4 = vsel %vm50_vm0, %v3962_v1, 0.0  ;;  %v51_v5 = vsel %vm50_vm0, %v3967_v2, 0.0  ;;  %v124_v6 = vmul.f32 %v3957_v0, %v3957_v0  ;;  %v3987_v12 = vld [vmem:[%s6635_s1 + $0x18] sm:$0xff]  ;;  %v3994_v14 = vld [vmem:[%s6635_s1 + $0x20] sm:$0xff]  ;;  %v4004_v18 = vld [vmem:[%s6635_s1 + $0x28] sm:$0xff] }
   0x3   :  { %58 = vadd.xlane.f32.xlu2 %v57_v3  ;;  %55 = vadd.xlane.f32.xlu1 %v54_v4  ;;  %v123_v7 = vmul.f32 %v3962_v1, %v3962_v1  ;;  %v122_v8 = vmul.f32 %v3967_v2, %v3967_v2  ;;  %v125_v13 = vmul.f32 %v3987_v12, %v3987_v12  ;;  %v63_v16 = vsel %vm50_vm0, %v3994_v14, 0.0  ;;  %v4017_v24 = vld [vmem:[%s6635_s1 + $0x30] sm:$0xff]  ;;  %v4024_v26 = vld [vmem:[%s6635_s1 + $0x38] sm:$0xff]  ;;  %v4034_v30 = vld [vmem:[%s6635_s1 + $0x40] sm:$0xff] }
   0x4   :  { %52 = vadd.xlane.f32.xlu0 %v51_v5  ;;  %v144_v9 = vsel %vm50_vm0, %v124_v6, 0.0  ;;  %v60_v17 = vsel %vm50_vm0, %v3987_v12, 0.0  ;;  %v127_v19 = vmul.f32 %v4004_v18, %v4004_v18  ;;  %v126_v20 = vmul.f32 %v3994_v14, %v3994_v14  ;;  %v4047_v36 = vld [vmem:[%s6635_s1 + $0x48] sm:$0xff]  ;;  %v4054_v38 = vld [vmem:[%s6635_s1 + $0x50] sm:$0xff]  ;;  %v4064_v42 = vld [vmem:[%s6635_s1 + $0x58] sm:$0xff] }
   0x5   :  { %v141_v10 = vsel %vm50_vm0, %v123_v7, 0.0  ;;  %v138_v11 = vsel %vm50_vm0, %v122_v8, 0.0  ;;  %v147_v15 = vsel %vm50_vm0, %v125_v13, 0.0  ;;  %v66_v21 = vsel %vm50_vm0, %v4004_v18, 0.0  ;;  %v4077_v48 = vld [vmem:[%s6635_s1 + $0x60] sm:$0xff]  ;;  %v4084_v50 = vld [vmem:[%s6635_s1 + $0x78] sm:$0xff] }
   0x6   :  { %v153_v22 = vsel %vm50_vm0, %v127_v19, 0.0  ;;  %v150_v23 = vsel %vm50_vm0, %v126_v20, 0.0  ;;  %v128_v25 = vmul.f32 %v4017_v24, %v4017_v24  ;;  %v72_v28 = vsel %vm50_vm0, %v4024_v26, 0.0  ;;  %v4096_v55 = vld [vmem:[%s6635_s1 + $0x70] sm:$0xff]  ;;  %v4101_v56 = vld [vmem:[%s6635_s1 + $0x68] sm:$0xff] }
   0x7   :  { %v69_v29 = vsel %vm50_vm0, %v4017_v24, 0.0  ;;  %v130_v31 = vmul.f32 %v4034_v30, %v4034_v30  ;;  %v129_v32 = vmul.f32 %v4024_v26, %v4024_v26  ;;  %v75_v33 = vsel %vm50_vm0, %v4034_v30, 0.0  ;;  %v47_v13 = vld [vmem:[%s6636_s3 + $0x48] sm:$0xff]  ;;  %v44_v20 = vld [vmem:[%s6636_s3 + $0x30] sm:$0xff] }
   0x8   :  { %v156_v27 = vsel %vm50_vm0, %v128_v25, 0.0  ;;  %v131_v37 = vmul.f32 %v4047_v36, %v4047_v36  ;;  %v81_v40 = vsel %vm50_vm0, %v4054_v38, 0.0  ;;  %v78_v41 = vsel %vm50_vm0, %v4047_v36, 0.0  ;;  %536 = vmatpush.msra.mxu0 %v47_v13 }
   0x9   :  { %v162_v34 = vsel %vm50_vm0, %v130_v31, 0.0  ;;  %v159_v35 = vsel %vm50_vm0, %v129_v32, 0.0  ;;  %v133_v43 = vmul.f32 %v4064_v42, %v4064_v42  ;;  %v132_v44 = vmul.f32 %v4054_v38, %v4054_v38  ;;  %v39_v31 = vld [vmem:[%s6636_s3 + $0x8] sm:$0xff] }
   0xa   :  { %v165_v39 = vsel %vm50_vm0, %v131_v37, 0.0  ;;  %v84_v45 = vsel %vm50_vm0, %v4064_v42, 0.0  ;;  %v134_v49 = vmul.f32 %v4077_v48, %v4077_v48  ;;  %v96_v52 = vsel %vm50_vm0, %v4084_v50, 0.0  ;;  %537 = vmatpush.msra.mxu0 %v44_v20 }
   0xb   :  { %145 = vadd.xlane.f32.xlu2 %v144_v9  ;;  %142 = vadd.xlane.f32.xlu1 %v141_v10  ;;  %v171_v46 = vsel %vm50_vm0, %v133_v43, 0.0  ;;  %v168_v47 = vsel %vm50_vm0, %v132_v44, 0.0  ;;  %v87_v53 = vsel %vm50_vm0, %v4077_v48, 0.0  ;;  %v137_v54 = vmul.f32 %v4084_v50, %v4084_v50 }
   0xc   :  { %139 = vadd.xlane.f32.xlu0 %v138_v11  ;;  %v174_v51 = vsel %vm50_vm0, %v134_v49, 0.0  ;;  %v93_v58 = vsel %vm50_vm0, %v4096_v55, 0.0  ;;  %v90_v59 = vsel %vm50_vm0, %v4101_v56, 0.0  ;;  %v136_v60 = vmul.f32 %v4096_v55, %v4096_v55 }
   0xd   :  { %v183_v57 = vsel %vm50_vm0, %v137_v54, 0.0  ;;  %v135_v61 = vmul.f32 %v4101_v56, %v4101_v56  ;;  %v3920_v3 = vmov 32.0  }
   0xe   :  { %v180_v62 = vsel %vm50_vm0, %v136_v60, 0.0  ;;  %3548 = vrcp.f32 %v3920_v3 }
   0xf   :  { %v177_v63 = vsel %vm50_vm0, %v135_v61, 0.0 }
  0x13   :  { %148 = vadd.xlane.f32.xlu1 %v147_v15  ;;  %64 = vadd.xlane.f32.xlu2 %v63_v16  ;;  %v48_v15 = vld [vmem:[%s6636_s3 + $0x50] sm:$0xff] }
  0x14   :  { %61 = vadd.xlane.f32.xlu0 %v60_v17  ;;  %v3549_v4 = vpop.eup %3548  ;;  %601 = vmatpush.msra.mxu1 %v48_v15 }
  0x15   :  { %v100_v5 = vmul.f32 32.0, %v3549_v4  ;;  %vm104_vm1 = vweird.f32 %v3549_v4 }
  0x17   :  { %v101_v6 = vsub.f32 1.0, %v100_v5 }
  0x19   :  { %v102_v7 = vmul.f32 %v3549_v4, %v101_v6 }
  0x1b   :  { %67 = vadd.xlane.f32.xlu1 %v66_v21  ;;  %154 = vadd.xlane.f32.xlu2 %v153_v22  ;;  %v103_v8 = vadd.f32 %v3549_v4, %v102_v7  ;;  %v45_v21 = vld [vmem:[%s6636_s3 + $0x38] sm:$0xff] }
  0x1c   :  { %151 = vadd.xlane.f32.xlu0 %v150_v23  ;;  %602 = vmatpush.msra.mxu1 %v45_v21  ;;  %v41_v22 = vld [vmem:[%s6636_s3 + $0x18] sm:$0xff]  ;;  %v42_v23 = vld [vmem:[%s6636_s3 + $0x20] sm:$0xff] }
  0x1d   :  { %v4120_v16 = vsel %vm104_vm1, %v3549_v4, %v103_v8  ;;  %538 = vmatpush.msra.mxu0 %v41_v22 }
  0x1e   :  { %6645 = vst [vmem:[#allocation2_spill] sm:$0xff] %v4120_v16  ;;  %603 = vmatpush.msra.mxu1 %v42_v23 }
  0x20   :  { %604 = vmatpush.msra.mxu1 %v39_v31 }
  0x23   :  { %157 = vadd.xlane.f32.xlu1 %v156_v27  ;;  %73 = vadd.xlane.f32.xlu2 %v72_v28 }
  0x24   :  { %70 = vadd.xlane.f32.xlu0 %v69_v29  ;;  %v38_v29 = vld [vmem:[%s6636_s3] sm:$0xff] }
  0x25   :  { %539 = vmatpush.msra.mxu0 %v38_v29 }
  0x2b   :  { %76 = vadd.xlane.f32.xlu1 %v75_v33  ;;  %163 = vadd.xlane.f32.xlu2 %v162_v34 }
  0x2c   :  { %160 = vadd.xlane.f32.xlu0 %v159_v35 }
  0x33   :  { %166 = vadd.xlane.f32.xlu1 %v165_v39  ;;  %82 = vadd.xlane.f32.xlu2 %v81_v40 }
  0x34   :  { %79 = vadd.xlane.f32.xlu0 %v78_v41 }
  0x3b   :  { %85 = vadd.xlane.f32.xlu1 %v84_v45  ;;  %172 = vadd.xlane.f32.xlu2 %v171_v46 }
  0x3c   :  { %169 = vadd.xlane.f32.xlu0 %v168_v47 }
  0x43   :  { %175 = vadd.xlane.f32.xlu1 %v174_v51  ;;  %97 = vadd.xlane.f32.xlu2 %v96_v52 }
  0x44   :  { %88 = vadd.xlane.f32.xlu0 %v87_v53 }
  0x4b   :  { %184 = vadd.xlane.f32.xlu1 %v183_v57  ;;  %94 = vadd.xlane.f32.xlu2 %v93_v58 }
  0x4c   :  { %91 = vadd.xlane.f32.xlu0 %v90_v59 }
  0x53   :  { %181 = vadd.xlane.f32.xlu1 %v180_v62 }
  0x54   :  { %178 = vadd.xlane.f32.xlu0 %v177_v63 }
  0x76   :  { %v59_v9 = vpop.xlane.xlu2 %58  ;;  %v56_v10 = vpop.xlane.xlu1 %55 }
  0x77   :  { %v53_v11 = vpop.xlane.xlu0 %52  ;;  %v4123_v17 = vmul.f32 %v4120_v16, %v59_v9  ;;  %v4126_v19 = vmul.f32 %v4120_v16, %v56_v10 }
  0x78   :  { %v4141_v25 = vmul.f32 %v4120_v16, %v53_v11 }
  0x79   :  { %v204_v27 = vmul.f32 %v4123_v17, %v4123_v17  ;;  %v203_v28 = vmul.f32 %v4126_v19, %v4126_v19 }
  0x7a   :  { %v202_v39 = vmul.f32 %v4141_v25, %v4141_v25 }
  0x7e   :  { %v146_v32 = vpop.xlane.xlu2 %145  ;;  %v143_v33 = vpop.xlane.xlu1 %142 }
  0x7f   :  { %v188_v34 = vmul.f32 %v146_v32, %v4120_v16  ;;  %v187_v35 = vmul.f32 %v143_v33, %v4120_v16  ;;  %v140_v37 = vpop.xlane.xlu0 %139  ;;  %v36_v32 = vld [vmem:[%s6637_s2] sm:$0xff] }
  0x80   :  { %v186_v40 = vmul.f32 %v140_v37, %v4120_v16 }
  0x81   :  { %v220_v41 = vsub.f32 %v188_v34, %v204_v27  ;;  %v219_v43 = vsub.f32 %v187_v35, %v203_v28 }
  0x82   :  { %v218_v44 = vsub.f32 %v186_v40, %v202_v39 }
  0x83   :  { %v4158_v45 = vadd.f32 1e-05, %v220_v41  ;;  %v251_v46 = vadd.f32 1e-05, %v219_v43 }
  0x84   :  { %v250_v47 = vadd.f32 1e-05, %v218_v44  ;;  %v234_v44 = vsub.f32 %v3967_v2, %v4141_v25 }
  0x85   :  { %3550 = vrsqrt.f32 %v4158_v45  ;;  %vm282_vm6 = vweird.f32 %v251_v46  ;;  %vm292_vm7 = vweird.f32 %v4158_v45 }
  0x86   :  { %3552 = vrsqrt.f32 %v251_v46  ;;  %v149_v49 = vpop.xlane.xlu1 %148  ;;  %v65_v51 = vpop.xlane.xlu2 %64  ;;  %vm272_vm4 = vweird.f32 %v250_v47 }
  0x87   :  { %3554 = vrsqrt.f32 %v250_v47  ;;  %v62_v52 = vpop.xlane.xlu0 %61  ;;  %v189_v53 = vmul.f32 %v149_v49, %v4120_v16  ;;  %v4170_v59 = vmul.f32 %v4120_v16, %v65_v51  ;;  %v4202_v49 = vperm.slane %v36_v32, 0 }
  0x88   :  { %v4163_v54 = vmul.f32 %v4120_v16, %v62_v52 }
  0x89   :  { %v206_v9 = vmul.f32 %v4170_v59, %v4170_v59 }
  0x8a   :  { %v205_v57 = vmul.f32 %v4163_v54, %v4163_v54 }
  0x8b   :  { %v4167_v58 = vpop.eup %3550 }
  0x8c   :  { %v4172_v60 = vpop.eup %3552  ;;  %v287_v61 = vmul.f32 %v4167_v58, %v4158_v45  ;;  %v221_v62 = vsub.f32 %v189_v53, %v205_v57  ;;  %vm293_vm9 = vweird.f32 %v4167_v58 }
  0x8d   :  { %v3555_v63 = vpop.eup %3554  ;;  %v277_v3 = vmul.f32 %v4172_v60, %v251_v46  ;;  %vm283_vm3 = vweird.f32 %v4172_v60  ;;  %vm4231_vm10 = vmor %vm292_vm7, %vm293_vm9 }
  0x8e   :  { %v267_v4 = vmul.f32 %v3555_v63, %v250_v47  ;;  %v4177_v5 = vadd.f32 1e-05, %v221_v62  ;;  %v68_v6 = vpop.xlane.xlu1 %67  ;;  %v155_v7 = vpop.xlane.xlu2 %154  ;;  %v288_v15 = vmul.f32 %v4167_v58, %v287_v61  ;;  %vm273_vm2 = vweird.f32 %v3555_v63  ;;  %vm284_vm8 = vmor %vm282_vm6, %vm283_vm3 }
  0x8f   :  { %v278_v8 = vmul.f32 %v4172_v60, %v277_v3  ;;  %v4183_v10 = vmul.f32 %v4120_v16, %v68_v6  ;;  %v152_v11 = vpop.xlane.xlu0 %151  ;;  %v191_v13 = vmul.f32 %v155_v7, %v4120_v16  ;;  %vm274_vm5 = vmor %vm272_vm4, %vm273_vm2  ;;  %v4209_v47 = vperm.slane %v36_v32, 1 }
  0x90   :  { %v268_v20 = vmul.f32 %v3555_v63, %v267_v4  ;;  %3556 = vrsqrt.f32 %v4177_v5  ;;  %v190_v23 = vmul.f32 %v152_v11, %v4120_v16  ;;  %v289_v33 = vmul.f32 0.5, %v288_v15 }
  0x91   :  { %v279_v21 = vmul.f32 0.5, %v278_v8  ;;  %v207_v22 = vmul.f32 %v4183_v10, %v4183_v10  ;;  %vm302_vm11 = vweird.f32 %v4177_v5 }
  0x92   :  { %v269_v27 = vmul.f32 0.5, %v268_v20  ;;  %v222_v29 = vsub.f32 %v190_v23, %v206_v9  ;;  %v290_v57 = vsub.f32 1.5, %v289_v33 }
  0x93   :  { %v280_v28 = vsub.f32 1.5, %v279_v21  ;;  %v223_v31 = vsub.f32 %v191_v13, %v207_v22 }
  0x94   :  { %v270_v34 = vsub.f32 1.5, %v269_v27  ;;  %v4194_v35 = vadd.f32 1e-05, %v222_v29  ;;  %v291_v6 = vmul.f32 %v4167_v58, %v290_v57 }
  0x95   :  { %v281_v39 = vmul.f32 %v4172_v60, %v280_v28  ;;  %v4206_v52 = vadd.f32 1e-05, %v223_v31 }
  0x96   :  { %v4196_v37 = vpop.eup %3556  ;;  %v271_v40 = vmul.f32 %v3555_v63, %v270_v34  ;;  %v158_v41 = vpop.xlane.xlu1 %157  ;;  %3558 = vrsqrt.f32 %v4194_v35  ;;  %v295_v27 = vsel %vm4231_vm10, %v4167_v58, %v291_v6  ;;  %vm312_vm14 = vweird.f32 %v4194_v35 }
  0x97   :  { %v74_v43 = vpop.xlane.xlu2 %73  ;;  %v297_v51 = vmul.f32 %v4196_v37, %v4177_v5  ;;  %v71_v53 = vpop.xlane.xlu0 %70  ;;  %v285_v62 = vsel %vm284_vm8, %v4172_v60, %v281_v39  ;;  %v192_v3 = vmul.f32 %v158_v41, %v4120_v16  ;;  %3560 = vrsqrt.f32 %v4206_v52 }
  0x98   :  { %v275_v61 = vsel %vm274_vm5, %v3555_v63, %v271_v40  ;;  %v4219_v46 = vmul.f32 %v4120_v16, %v71_v53  ;;  %v235_v63 = vsub.f32 %v3962_v1, %v4126_v19  ;;  %v4226_v4 = vmul.f32 %v4120_v16, %v74_v43 }
  0x99   :  { %v426_v2 = vmul.f32 %v275_v61, %v234_v44  ;;  %v298_v25 = vmul.f32 %v4196_v37, %v297_v51  ;;  %v236_v40 = vsub.f32 %v3957_v0, %v4123_v17  ;;  %vm303_vm12 = vweird.f32 %v4196_v37 }
  0x9a   :  { %v208_v60 = vmul.f32 %v4219_v46, %v4219_v46  ;;  %v427_v8 = vmul.f32 %v285_v62, %v235_v63  ;;  %v209_v21 = vmul.f32 %v4226_v4, %v4226_v4  ;;  %vm4275_vm13 = vmor %vm302_vm11, %vm303_vm12  ;;  %v237_v62 = vsub.f32 %v3987_v12, %v4163_v54 }
  0x9b   :  { %v443_v45 = vmul.f32 %v4202_v49, %v426_v2  ;;  %v299_v1 = vmul.f32 0.5, %v298_v25  ;;  %v428_v43 = vmul.f32 %v295_v27, %v236_v40  ;;  %vm322_vm2 = vweird.f32 %v4206_v52 }
  0x9c   :  { %v4238_v19 = vpop.eup %3558  ;;  %v224_v11 = vsub.f32 %v192_v3, %v208_v60  ;;  %v444_v32 = vmul.f32 %v4202_v49, %v427_v8 }
  0x9d   :  { %v4236_v9 = vadd.f32 %v4209_v47, %v443_v45  ;;  %v307_v20 = vmul.f32 %v4238_v19, %v4194_v35  ;;  %v4257_v31 = vpop.eup %3560  ;;  %v300_v33 = vsub.f32 1.5, %v299_v1  ;;  %v445_v6 = vmul.f32 %v4202_v49, %v428_v43 }
  0x9e   :  { %v77_v13 = vpop.xlane.xlu1 %76  ;;  %v4254_v28 = vadd.f32 1e-05, %v224_v11  ;;  %v317_v44 = vmul.f32 %v4257_v31, %v4206_v52  ;;  %v4272_v51 = vadd.f32 %v4209_v47, %v444_v32  ;;  %vm313_vm15 = vweird.f32 %v4238_v19 }
  0x9f   :  { %v164_v15 = vpop.xlane.xlu2 %163  ;;  %3167 = vmatmul.msk.f32.vlgmr.msra.gmra.mxu0 %vm50_vm0, %v4236_v9  ;;  %3183 = vmatmul.msk.f32.vlgmr.msra.gmra.mxu1 %vm50_vm0, %v4236_v9  ;;  %v4249_v22 = vmul.f32 %v4120_v16, %v77_v13  ;;  %v161_v23 = vpop.xlane.xlu0 %160  ;;  %v308_v34 = vmul.f32 %v4238_v19, %v307_v20  ;;  %v301_v53 = vmul.f32 %v4196_v37, %v300_v33  ;;  %vm4312_vm1 = vmor %vm312_vm14, %vm313_vm15  ;;  %vm323_vm3 = vweird.f32 %v4257_v31 }
  0xa0   :  { %v193_v29 = vmul.f32 %v161_v23, %v4120_v16  ;;  %3562 = vrsqrt.f32 %v4254_v28  ;;  %v194_v41 = vmul.f32 %v164_v15, %v4120_v16  ;;  %v318_v3 = vmul.f32 %v4257_v31, %v317_v44  ;;  %vm4340_vm4 = vmor %vm322_vm2, %vm323_vm3 }
  0xa1   :  { %v210_v39 = vmul.f32 %v4249_v22, %v4249_v22  ;;  %v309_v57 = vmul.f32 0.5, %v308_v34  ;;  %v305_v60 = vsel %vm4275_vm13, %v4196_v37, %v301_v53  ;;  %v4306_v11 = vadd.f32 %v4209_v47, %v445_v6 }
  0xa2   :  { %v225_v58 = vsub.f32 %v193_v29, %v209_v21  ;;  %v429_v12 = vmul.f32 %v305_v60, %v237_v62  ;;  %v319_v54 = vmul.f32 0.5, %v318_v3  ;;  %v238_v29 = vsub.f32 %v3994_v14, %v4170_v59 }
  0xa3   :  { %v226_v0 = vsub.f32 %v194_v41, %v210_v39  ;;  %v310_v7 = vsub.f32 1.5, %v309_v57  ;;  %vm332_vm5 = vweird.f32 %v4254_v28 }
  0xa4   :  { %v4279_v2 = vadd.f32 1e-05, %v225_v58  ;;  %v446_v27 = vmul.f32 %v4202_v49, %v429_v12  ;;  %v320_v32 = vsub.f32 1.5, %v319_v54 }
  0xa5   :  { %v4288_v63 = vadd.f32 1e-05, %v226_v0  ;;  %v311_v37 = vmul.f32 %v4238_v19, %v310_v7 }
  0xa6   :  { %v167_v5 = vpop.xlane.xlu1 %166  ;;  %v4290_v45 = vpop.eup %3562  ;;  %3564 = vrsqrt.f32 %v4279_v2  ;;  %v4337_v14 = vadd.f32 %v4209_v47, %v446_v27  ;;  %v321_v43 = vmul.f32 %v4257_v31, %v320_v32  ;;  %vm342_vm8 = vweird.f32 %v4279_v2 }
  0xa7   :  { %v83_v61 = vpop.xlane.xlu2 %82  ;;  %3168 = vmatmul.msk.f32.gmra.mxu0 %vm50_vm0, %v4272_v51  ;;  %3184 = vmatmul.msk.f32.gmra.mxu1 %vm50_vm0, %v4272_v51  ;;  %v80_v25 = vpop.xlane.xlu0 %79  ;;  %v327_v1 = vmul.f32 %v4290_v45, %v4254_v28  ;;  %3566 = vrsqrt.f32 %v4288_v63  ;;  %v195_v13 = vmul.f32 %v167_v5, %v4120_v16  ;;  %v315_v39 = vsel %vm4312_vm1, %v4238_v19, %v311_v37 }
  0xa8   :  { %v4297_v8 = vmul.f32 %v4120_v16, %v80_v25  ;;  %v4334_v41 = vmul.f32 %v4120_v16, %v83_v61  ;;  %v430_v59 = vmul.f32 %v315_v39, %v238_v29  ;;  %v239_v61 = vsub.f32 %v4004_v18, %v4183_v10 }
  0xa9   :  { %v328_v33 = vmul.f32 %v4290_v45, %v327_v1  ;;  %v325_v60 = vsel %vm4340_vm4, %v4257_v31, %v321_v43  ;;  %vm333_vm6 = vweird.f32 %v4290_v45  ;;  %vm352_vm10 = vweird.f32 %v4288_v63 }
  0xaa   :  { %v211_v35 = vmul.f32 %v4297_v8, %v4297_v8  ;;  %v212_v25 = vmul.f32 %v4334_v41, %v4334_v41  ;;  %v447_v6 = vmul.f32 %v4202_v49, %v430_v59  ;;  %v431_v15 = vmul.f32 %v325_v60, %v239_v61  ;;  %vm4387_vm7 = vmor %vm332_vm5, %vm333_vm6 }
  0xab   :  { %v329_v44 = vmul.f32 0.5, %v328_v33  ;;  %v241_v28 = vsub.f32 %v4024_v26, %v4226_v4 }
  0xac   :  { %v4324_v34 = vpop.eup %3564  ;;  %v227_v40 = vsub.f32 %v195_v13, %v211_v35  ;;  %v4382_v35 = vadd.f32 %v4209_v47, %v447_v6  ;;  %v448_v53 = vmul.f32 %v4202_v49, %v431_v15 }
  0xad   :  { %v4329_v58 = vpop.eup %3566  ;;  %v337_v19 = vmul.f32 %v4324_v34, %v4279_v2  ;;  %v330_v7 = vsub.f32 1.5, %v329_v44  ;;  %vm343_vm9 = vweird.f32 %v4324_v34 }
  0xae   :  { %v86_v20 = vpop.xlane.xlu1 %85  ;;  %v347_v52 = vmul.f32 %v4329_v58, %v4288_v63  ;;  %v4348_v57 = vadd.f32 1e-05, %v227_v40  ;;  %vm353_vm11 = vweird.f32 %v4329_v58  ;;  %vm4433_vm12 = vmor %vm342_vm8, %vm343_vm9 }
  0xaf   :  { %v173_v21 = vpop.xlane.xlu2 %172  ;;  %3169 = vmatmul.msk.f32.gmra.mxu0 %vm50_vm0, %v4306_v11  ;;  %3185 = vmatmul.msk.f32.gmra.mxu1 %vm50_vm0, %v4306_v11  ;;  %v170_v23 = vpop.xlane.xlu0 %169  ;;  %v4351_v0 = vmul.f32 %v4120_v16, %v86_v20  ;;  %v338_v10 = vmul.f32 %v4324_v34, %v337_v19  ;;  %v240_v19 = vsub.f32 %v4017_v24, %v4219_v46  ;;  %vm4443_vm13 = vmor %vm352_vm10, %vm353_vm11 }
  0xb0   :  { %v196_v62 = vmul.f32 %v170_v23, %v4120_v16  ;;  %v197_v18 = vmul.f32 %v173_v21, %v4120_v16  ;;  %v348_v12 = vmul.f32 %v4329_v58, %v347_v52  ;;  %3568 = vrsqrt.f32 %v4348_v57 }
  0xb1   :  { %v213_v54 = vmul.f32 %v4351_v0, %v4351_v0  ;;  %v331_v21 = vmul.f32 %v4290_v45, %v330_v7  ;;  %v339_v23 = vmul.f32 0.5, %v338_v10  ;;  %vm362_vm14 = vweird.f32 %v4348_v57 }
  0xb2   :  { %v228_v31 = vsub.f32 %v196_v62, %v212_v25  ;;  %v349_v27 = vmul.f32 0.5, %v348_v12 }
  0xb3   :  { %v229_v29 = vsub.f32 %v197_v18, %v213_v54  ;;  %v340_v61 = vsub.f32 1.5, %v339_v23 }
  0xb4   :  { %v4393_v40 = vadd.f32 1e-05, %v228_v31  ;;  %v350_v25 = vsub.f32 1.5, %v349_v27 }
  0xb5   :  { %v4410_v62 = vadd.f32 1e-05, %v229_v29  ;;  %v341_v7 = vmul.f32 %v4324_v34, %v340_v61 }
  0xb6   :  { %v176_v17 = vpop.xlane.xlu1 %175  ;;  %v4391_v39 = vpop.eup %3568  ;;  %v351_v10 = vmul.f32 %v4329_v58, %v350_v25  ;;  %vm372_vm4 = vweird.f32 %v4393_v40 }
  0xb7   :  { %v98_v5 = vpop.xlane.xlu2 %97  ;;  %3170 = vmatmul.msk.f32.gmra.mxu0 %vm50_vm0, %v4337_v14  ;;  %3186 = vmatmul.msk.f32.gmra.mxu1 %vm50_vm0, %v4337_v14  ;;  %v89_v3 = vpop.xlane.xlu0 %88  ;;  %v198_v1 = vmul.f32 %v176_v17, %v4120_v16  ;;  %vm363_vm15 = vweird.f32 %v4391_v39 }
  0xb8   :  { %v4374_v37 = vmul.f32 %v4120_v16, %v89_v3  ;;  %v4379_v13 = vmul.f32 %v4120_v16, %v98_v5  ;;  %v335_v5 = vsel %vm4387_vm7, %v4290_v45, %v331_v21  ;;  %v357_v3 = vmul.f32 %v4391_v39, %v4348_v57  ;;  %vm4499_vm3 = vmor %vm362_vm14, %vm363_vm15 }
  0xb9   :  { %v4425_v45 = vadd.f32 %v4209_v47, %v448_v53  ;;  %v432_v60 = vmul.f32 %v335_v5, %v240_v19  ;;  %vm382_vm15 = vweird.f32 %v4410_v62 }
  0xba   :  { %v214_v20 = vmul.f32 %v4374_v37, %v4374_v37  ;;  %v217_v59 = vmul.f32 %v4379_v13, %v4379_v13  ;;  %v358_v12 = vmul.f32 %v4391_v39, %v357_v3 }
  0xbb   :  { %v449_v29 = vmul.f32 %v4202_v49, %v432_v60 }
  0xbc   :  { %v230_v32 = vsub.f32 %v198_v1, %v214_v20 }
  0xbe   :  { %v185_v33 = vpop.xlane.xlu1 %184  ;;  %v4404_v52 = vadd.f32 1e-05, %v230_v32  ;;  %v242_v32 = vsub.f32 %v4034_v30, %v4249_v22 }
  0xbf   :  { %3171 = vmatmul.msk.f32.gmra.mxu0 %vm50_vm0, %v4382_v35  ;;  %3187 = vmatmul.msk.f32.gmra.mxu1 %vm50_vm0, %v4382_v35  ;;  %v92_v43 = vpop.xlane.xlu0 %91  ;;  %v95_v44 = vpop.xlane.xlu2 %94  ;;  %v201_v17 = vmul.f32 %v185_v33, %v4120_v16  ;;  %v345_v33 = vsel %vm4433_vm12, %v4324_v34, %v341_v7  ;;  %v4480_v34 = vadd.f32 %v4209_v47, %v449_v29 }
  0xc0   :  { %3570 = vrsqrt.f32 %v4404_v52  ;;  %v4416_v6 = vmul.f32 %v4120_v16, %v92_v43  ;;  %v4419_v24 = vmul.f32 %v4120_v16, %v95_v44  ;;  %v359_v43 = vmul.f32 0.5, %v358_v12 }
  0xc1   :  { %3572 = vrsqrt.f32 %v4393_v40  ;;  %v233_v46 = vsub.f32 %v201_v17, %v217_v59  ;;  %v355_v59 = vsel %vm4443_vm13, %v4329_v58, %v351_v10  ;;  %v433_v58 = vmul.f32 %v345_v33, %v241_v28 }
  0xc2   :  { %3574 = vrsqrt.f32 %v4410_v62  ;;  %v215_v63 = vmul.f32 %v4416_v6, %v4416_v6  ;;  %v216_v54 = vmul.f32 %v4419_v24, %v4419_v24  ;;  %v434_v5 = vmul.f32 %v355_v59, %v242_v32 }
  0xc3   :  { %v4431_v18 = vadd.f32 1e-05, %v233_v46  ;;  %v360_v61 = vsub.f32 1.5, %v359_v43  ;;  %v450_v2 = vmul.f32 %v4202_v49, %v433_v58  ;;  %v249_v32 = vsub.f32 %v4084_v50, %v4379_v13 }
  0xc4   :  { %v451_v10 = vmul.f32 %v4202_v49, %v434_v5  ;;  %vm392_vm7 = vweird.f32 %v4404_v52 }
  0xc5   :  { %3576 = vrsqrt.f32 %v4431_v18  ;;  %v361_v12 = vmul.f32 %v4391_v39, %v360_v61  ;;  %vm422_vm1 = vweird.f32 %v4431_v18  ;;  %v4508_v28 = vadd.f32 %v4209_v47, %v450_v2 }
  0xc6   :  { %v182_v1 = vpop.xlane.xlu1 %181  ;;  %v4453_v21 = vpop.eup %3570  ;;  %v248_v2 = vsub.f32 %v4096_v55, %v4419_v24 }
  0xc7   :  { %3172 = vmatmul.msk.f32.gmra.mxu0 %vm50_vm0, %v4425_v45  ;;  %3188 = vmatmul.msk.f32.gmra.mxu1 %vm50_vm0, %v4425_v45  ;;  %v200_v15 = vmul.f32 %v182_v1, %v4120_v16  ;;  %v179_v20 = vpop.xlane.xlu0 %178  ;;  %v4456_v27 = vpop.eup %3572  ;;  %v387_v17 = vmul.f32 %v4453_v21, %v4404_v52  ;;  %vm393_vm8 = vweird.f32 %v4453_v21 }
  0xc8   :  { %v199_v23 = vmul.f32 %v179_v20, %v4120_v16  ;;  %v4469_v19 = vpop.eup %3574  ;;  %v367_v26 = vmul.f32 %v4456_v27, %v4393_v40  ;;  %vm373_vm6 = vweird.f32 %v4456_v27  ;;  %vm4546_vm14 = vmor %vm392_vm7, %vm393_vm8 }
  0xc9   :  { %v232_v44 = vsub.f32 %v200_v15, %v216_v54  ;;  %v377_v3 = vmul.f32 %v4469_v19, %v4410_v62  ;;  %v388_v46 = vmul.f32 %v4453_v21, %v387_v17  ;;  %v243_v15 = vsub.f32 %v4047_v36, %v4297_v8  ;;  %vm4538_vm11 = vmor %vm372_vm4, %vm373_vm6 }
  0xca   :  { %v231_v53 = vsub.f32 %v199_v23, %v215_v63  ;;  %v368_v60 = vmul.f32 %v4456_v27, %v367_v26  ;;  %v365_v8 = vsel %vm4499_vm3, %v4391_v39, %v361_v12 }
  0xcb   :  { %v4475_v30 = vadd.f32 1e-05, %v232_v44  ;;  %v3577_v22 = vpop.eup %3576  ;;  %v378_v57 = vmul.f32 %v4469_v19, %v377_v3  ;;  %v389_v1 = vmul.f32 0.5, %v388_v46  ;;  %v435_v5 = vmul.f32 %v365_v8, %v243_v15 }
  0xcc   :  { %v4477_v4 = vadd.f32 1e-05, %v231_v53  ;;  %v417_v25 = vmul.f32 %v3577_v22, %v4431_v18  ;;  %vm423_vm2 = vweird.f32 %v3577_v22  ;;  %v369_v20 = vmul.f32 0.5, %v368_v60 }
  0xcd   :  { %3578 = vrsqrt.f32 %v4475_v30  ;;  %v4511_v18 = vadd.f32 %v4209_v47, %v451_v10  ;;  %vm4515_vm5 = vmor %vm422_vm1, %vm423_vm2  ;;  %v379_v44 = vmul.f32 0.5, %v378_v57  ;;  %v390_v53 = vsub.f32 1.5, %v389_v1 }
  0xce   :  { %3580 = vrsqrt.f32 %v4477_v4  ;;  %v418_v7 = vmul.f32 %v3577_v22, %v417_v25  ;;  %v370_v13 = vsub.f32 1.5, %v369_v20  ;;  %vm412_vm9 = vweird.f32 %v4475_v30 }
  0xcf   :  { %3173 = vmatmul.msk.f32.gmra.mxu0 %vm50_vm0, %v4480_v34  ;;  %3189 = vmatmul.msk.f32.gmra.mxu1 %vm50_vm0, %v4480_v34  ;;  %vm402_vm12 = vweird.f32 %v4477_v4  ;;  %v391_v3 = vmul.f32 %v4453_v21, %v390_v53  ;;  %vm383_vm2 = vweird.f32 %v4469_v19  ;;  %v452_v24 = vmul.f32 %v4202_v49, %v435_v5 }
  0xd0   :  { %v419_v63 = vmul.f32 0.5, %v418_v7  ;;  %v371_v7 = vmul.f32 %v4456_v27, %v370_v13  ;;  %v246_v57 = vsub.f32 %v4077_v48, %v4374_v37  ;;  %vm384_vm4 = vmor %vm382_vm15, %vm383_vm2 }
  0xd2   :  { %v420_v23 = vsub.f32 1.5, %v419_v63  ;;  %v247_v63 = vsub.f32 %v4101_v56, %v4416_v6  ;;  %v395_v56 = vsel %vm4546_vm14, %v4453_v21, %v391_v3  ;;  %v245_v21 = vsub.f32 %v4064_v42, %v4351_v0 }
  0xd3   :  { %v3579_v31 = vpop.eup %3578 }
  0xd4   :  { %v3581_v29 = vpop.eup %3580  ;;  %v407_v36 = vmul.f32 %v3579_v31, %v4475_v30  ;;  %v421_v59 = vmul.f32 %v3577_v22, %v420_v23  ;;  %vm413_vm10 = vweird.f32 %v3579_v31  ;;  %v244_v30 = vsub.f32 %v4054_v38, %v4334_v41 }
  0xd5   :  { %v397_v43 = vmul.f32 %v3581_v29, %v4477_v4  ;;  %vm403_vm13 = vweird.f32 %v3581_v29  ;;  %vm4557_vm1 = vmor %vm412_vm9, %vm413_vm10  ;;  %v375_v38 = vsel %vm4538_vm11, %v4456_v27, %v371_v7  ;;  %v438_v27 = vmul.f32 %v395_v56, %v246_v57 }
  0xd6   :  { %v408_v50 = vmul.f32 %v3579_v31, %v407_v36  ;;  %v425_v39 = vsel %vm4515_vm5, %v3577_v22, %v421_v59  ;;  %v380_v22 = vsub.f32 1.5, %v379_v44  ;;  %vm4570_vm3 = vmor %vm402_vm12, %vm403_vm13  ;;  %v4608_v4 = vadd.f32 %v4209_v47, %v452_v24 }
  0xd7   :  { %3174 = vmatmul.msk.f32.gmra.mxu0 %vm50_vm0, %v4508_v28  ;;  %3190 = vmatmul.msk.f32.gmra.mxu1 %vm50_vm0, %v4508_v28  ;;  %v398_v17 = vmul.f32 %v3581_v29, %v397_v43  ;;  %v441_v26 = vmul.f32 %v425_v39, %v249_v32  ;;  %v455_v33 = vmul.f32 %v4202_v49, %v438_v27  ;;  %v37_v43 = vld [vmem:[%s6637_s2 + $0x8] sm:$0xff] }
  0xd8   :  { %v409_v58 = vmul.f32 0.5, %v408_v50  ;;  %v381_v15 = vmul.f32 %v4469_v19, %v380_v22 }
  0xd9   :  { %v399_v25 = vmul.f32 0.5, %v398_v17  ;;  %v458_v60 = vmul.f32 %v4202_v49, %v441_v26 }
  0xda   :  { %v410_v40 = vsub.f32 1.5, %v409_v58  ;;  %v385_v20 = vsel %vm384_vm4, %v4469_v19, %v381_v15  ;;  %v4632_v19 = vadd.f32 %v4209_v47, %v455_v33 }
  0xdb   :  { %v400_v52 = vsub.f32 1.5, %v399_v25  ;;  %v4563_v12 = vadd.f32 %v4209_v47, %v458_v60  ;;  %v437_v32 = vmul.f32 %v385_v20, %v245_v21 }
  0xdc   :  { %v411_v54 = vmul.f32 %v3579_v31, %v410_v40 }
  0xdd   :  { %v401_v1 = vmul.f32 %v3581_v29, %v400_v52  ;;  %3199 = vmatpush.xpose.msk.msrb.mxu0 %vm50_vm0, %v4563_v12  ;;  %3216 = vmatpush.xpose.msk.msra.mxu3 %vm50_vm0, %v4563_v12  ;;  %v454_v0 = vmul.f32 %v4202_v49, %v437_v32 }
  0xde   :  { %v415_v6 = vsel %vm4557_vm1, %v3579_v31, %v411_v54  ;;  %3248 = vmatpush.xpose.msk.msra.mxu2 %vm50_vm0, %v4563_v12  ;;  %v436_v31 = vmul.f32 %v375_v38, %v244_v30 }
  0xdf   :  { %3175 = vmatmul.msk.f32.gmra.mxu0 %vm50_vm0, %v4511_v18  ;;  %3191 = vmatmul.msk.f32.gmra.mxu1 %vm50_vm0, %v4511_v18  ;;  %v440_v48 = vmul.f32 %v415_v6, %v248_v2  ;;  %v405_v41 = vsel %vm4570_vm3, %v3581_v29, %v401_v1  ;;  %v4644_v59 = vadd.f32 %v4209_v47, %v454_v0 }
  0xe0   :  { %v439_v37 = vmul.f32 %v405_v41, %v247_v63  ;;  %v453_v42 = vmul.f32 %v4202_v49, %v436_v31 }
  0xe1   :  { %v457_v62 = vmul.f32 %v4202_v49, %v440_v48 }
  0xe2   :  { %v456_v23 = vmul.f32 %v4202_v49, %v439_v37  ;;  %v4639_v8 = vadd.f32 %v4209_v47, %v453_v42 }
  0xe3   :  { %v4613_v29 = vadd.f32 %v4209_v47, %v457_v62 }
  0xe4   :  { %v4617_v36 = vadd.f32 %v4209_v47, %v456_v23 }
  0xe5   :  { %3200 = vmatpush.xpose.msk.msrb.mxu0 %vm50_vm0, %v4613_v29  ;;  %3217 = vmatpush.xpose.msk.msra.mxu3 %vm50_vm0, %v4613_v29 }
  0xe6   :  { %3249 = vmatpush.xpose.msk.msra.mxu2 %vm50_vm0, %v4613_v29 }
  0xe7   :  { %3176 = vmatmul.msk.f32.gmra.mxu0 %vm50_vm0, %v4608_v4  ;;  %3192 = vmatmul.msk.f32.gmra.mxu1 %vm50_vm0, %v4608_v4 }
  0xe9   :  { %3201 = vmatpush.xpose.msk.msrb.mxu0 %vm50_vm0, %v4617_v36  ;;  %3218 = vmatpush.xpose.msk.msra.mxu3 %vm50_vm0, %v4617_v36 }
  0xea   :  { %3250 = vmatpush.xpose.msk.msra.mxu2 %vm50_vm0, %v4617_v36 }
  0xed   :  { %3202 = vmatpush.xpose.msk.msrb.mxu0 %vm50_vm0, %v4632_v19  ;;  %3219 = vmatpush.xpose.msk.msra.mxu3 %vm50_vm0, %v4632_v19 }
  0xee   :  { %3251 = vmatpush.xpose.msk.msra.mxu2 %vm50_vm0, %v4632_v19 }
  0xef   :  { %3177 = vmatmul.msk.f32.gmra.mxu0 %vm50_vm0, %v4639_v8  ;;  %3193 = vmatmul.msk.f32.gmra.mxu1 %vm50_vm0, %v4639_v8 }
  0xf1   :  { %3203 = vmatpush.xpose.msk.msrb.mxu0 %vm50_vm0, %v4644_v59  ;;  %3220 = vmatpush.xpose.msk.msra.mxu3 %vm50_vm0, %v4644_v59 }
  0xf2   :  { %3252 = vmatpush.xpose.msk.msra.mxu2 %vm50_vm0, %v4644_v59 }
  0xf5   :  { %3204 = vmatpush.xpose.msk.msrb.mxu0 %vm50_vm0, %v4639_v8  ;;  %3221 = vmatpush.xpose.msk.msra.mxu3 %vm50_vm0, %v4639_v8 }
  0xf6   :  { %3253 = vmatpush.xpose.msk.msra.mxu2 %vm50_vm0, %v4639_v8 }
  0xf7   :  { %3178 = vmatmul.msk.f32.gmra.mxu0 %vm50_vm0, %v4644_v59  ;;  %3194 = vmatmul.msk.f32.gmra.mxu1 %vm50_vm0, %v4644_v59 }
  0xf9   :  { %3205 = vmatpush.xpose.msk.msrb.mxu0 %vm50_vm0, %v4608_v4  ;;  %3222 = vmatpush.xpose.msk.msra.mxu3 %vm50_vm0, %v4608_v4 }
  0xfa   :  { %3254 = vmatpush.xpose.msk.msra.mxu2 %vm50_vm0, %v4608_v4 }
  0xfd   :  { %3206 = vmatpush.xpose.msk.msrb.mxu0 %vm50_vm0, %v4511_v18  ;;  %3223 = vmatpush.xpose.msk.msra.mxu3 %vm50_vm0, %v4511_v18 }
  0xfe   :  { %3255 = vmatpush.xpose.msk.msra.mxu2 %vm50_vm0, %v4511_v18 }
  0xff   :  { %3179 = vmatmul.msk.f32.gmra.mxu0 %vm50_vm0, %v4632_v19  ;;  %3195 = vmatmul.msk.f32.gmra.mxu1 %vm50_vm0, %v4632_v19 }
 0x101   :  { %3207 = vmatpush.xpose.msk.msrb.mxu0 %vm50_vm0, %v4508_v28  ;;  %3224 = vmatpush.xpose.msk.msra.mxu3 %vm50_vm0, %v4508_v28 }
 0x102   :  { %3256 = vmatpush.xpose.msk.msra.mxu2 %vm50_vm0, %v4508_v28 }
 0x105   :  { %3208 = vmatpush.xpose.msk.msrb.mxu0 %vm50_vm0, %v4480_v34  ;;  %3225 = vmatpush.xpose.msk.msra.mxu3 %vm50_vm0, %v4480_v34 }
 0x106   :  { %3257 = vmatpush.xpose.msk.msra.mxu2 %vm50_vm0, %v4480_v34 }
 0x107   :  { %3180 = vmatmul.msk.f32.gmra.mxu0 %vm50_vm0, %v4617_v36  ;;  %3196 = vmatmul.msk.f32.gmra.mxu1 %vm50_vm0, %v4617_v36 }
 0x109   :  { %3209 = vmatpush.xpose.msk.msrb.mxu0 %vm50_vm0, %v4425_v45  ;;  %3226 = vmatpush.xpose.msk.msra.mxu3 %vm50_vm0, %v4425_v45 }
 0x10a   :  { %3258 = vmatpush.xpose.msk.msra.mxu2 %vm50_vm0, %v4425_v45 }
 0x10d   :  { %3210 = vmatpush.xpose.msk.msrb.mxu0 %vm50_vm0, %v4382_v35  ;;  %3227 = vmatpush.xpose.msk.msra.mxu3 %vm50_vm0, %v4382_v35 }
 0x10e   :  { %3259 = vmatpush.xpose.msk.msra.mxu2 %vm50_vm0, %v4382_v35 }
 0x10f   :  { %3181 = vmatmul.msk.f32.gmra.mxu0 %vm50_vm0, %v4613_v29  ;;  %3197 = vmatmul.msk.f32.gmra.mxu1 %vm50_vm0, %v4613_v29 }
 0x111   :  { %3211 = vmatpush.xpose.msk.msrb.mxu0 %vm50_vm0, %v4337_v14  ;;  %3228 = vmatpush.xpose.msk.msra.mxu3 %vm50_vm0, %v4337_v14 }
 0x112   :  { %3260 = vmatpush.xpose.msk.msra.mxu2 %vm50_vm0, %v4337_v14 }
 0x115   :  { %3212 = vmatpush.xpose.msk.msrb.mxu0 %vm50_vm0, %v4306_v11  ;;  %3229 = vmatpush.xpose.msk.msra.mxu3 %vm50_vm0, %v4306_v11 }
 0x116   :  { %3261 = vmatpush.xpose.msk.msra.mxu2 %vm50_vm0, %v4306_v11 }
 0x117   :  { %3182 = vmatmul.msk.f32.gmra.mxu0 %vm50_vm0, %v4563_v12  ;;  %3198 = vmatmul.msk.f32.gmra.mxu1 %vm50_vm0, %v4563_v12 }
 0x119   :  { %3213 = vmatpush.xpose.msk.msrb.mxu0 %vm50_vm0, %v4272_v51  ;;  %3230 = vmatpush.xpose.msk.msra.mxu3 %vm50_vm0, %v4272_v51 }
 0x11a   :  { %3262 = vmatpush.xpose.msk.msra.mxu2 %vm50_vm0, %v4272_v51 }
 0x11c   :  { %v541_v49 = vpop.f32.mrf.mxu0  ;;  %v4742_v47 = vpop.f32.mrf.mxu1 }
 0x11d   :  { %1905 = vrot.lane.b32.xlu1 %v541_v49, %s3921_s18  ;;  %968 = vrot.lane.b32.xlu2 %v541_v49, %s3922_s19 }
 0x11e   :  { %3214 = vmatpush.xpose.msk.msrb.mxu0 %vm50_vm0, %v4236_v9  ;;  %3231 = vmatpush.xpose.msk.msra.mxu3 %vm50_vm0, %v4236_v9 }
 0x11f   :  { %3263 = vmatpush.xpose.msk.msra.mxu2 %vm50_vm0, %v4236_v9 }
 0x121   :  { %3232 = vmatmul.msk.f32.vlgmr.msra.gmra.mxu3 %vm50_vm0, %v541_v49  ;;  %3215 = vmatmul.msk.f32.vlgmr.msrb.gmra.mxu0 %vm50_vm0, %v37_v43 }
 0x122   :  { %3296 = vmatpush.xpose.msk.msrb.mxu3 %vm50_vm0, %v4563_v12 }
 0x124   :  { %v544_v44 = vpop.f32.mrf.mxu0  ;;  %v4761_v53 = vpop.f32.mrf.mxu1 }
 0x125   :  { %1469 = vrot.lane.b32.xlu2 %v541_v49, %s3923_s22  ;;  %970 = vrot.lane.b32.xlu0 %v544_v44, %s3922_s19  ;;  %v4767_v50 = vpack.i.bf16 %v4742_v47, %v4761_v53 }
 0x126   :  { %3297 = vmatpush.xpose.msk.msrb.mxu3 %vm50_vm0, %v4613_v29 }
 0x127   :  { %3429 = vrot.lane.b32.xlu1 %v4767_v50, %s3922_s19 }
 0x129   :  { %3233 = vmatmul.msk.f32.gmra.mxu3 %vm50_vm0, %v544_v44 }
 0x12a   :  { %3298 = vmatpush.xpose.msk.msrb.mxu3 %vm50_vm0, %v4617_v36 }
 0x12c   :  { %v547_v13 = vpop.f32.mrf.mxu0  ;;  %v4776_v39 = vpop.f32.mrf.mxu1 }
 0x12d   :  { %1907 = vrot.lane.b32.xlu2 %v544_v44, %s3921_s18  ;;  %1471 = vrot.lane.b32.xlu0 %v544_v44, %s3923_s22 }
 0x12e   :  { %3299 = vmatpush.xpose.msk.msrb.mxu3 %vm50_vm0, %v4632_v19 }
 0x12f   :  { %972 = vrot.lane.b32.xlu1 %v547_v13, %s3922_s19 }
 0x131   :  { %3234 = vmatmul.msk.f32.gmra.mxu3 %vm50_vm0, %v547_v13 }
 0x132   :  { %3300 = vmatpush.xpose.msk.msrb.mxu3 %vm50_vm0, %v4644_v59 }
 0x134   :  { %v550_v17 = vpop.f32.mrf.mxu0  ;;  %v4786_v26 = vpop.f32.mrf.mxu1 }
 0x135   :  { %1473 = vrot.lane.b32.xlu0 %v547_v13, %s3923_s22  ;;  %974 = vrot.lane.b32.xlu2 %v550_v17, %s3922_s19  ;;  %v4798_v58 = vpack.i.bf16 %v4776_v39, %v4786_v26 }
 0x136   :  { %3301 = vmatpush.xpose.msk.msrb.mxu3 %vm50_vm0, %v4639_v8 }
 0x137   :  { %1909 = vrot.lane.b32.xlu1 %v547_v13, %s3921_s18 }
 0x139   :  { %3235 = vmatmul.msk.f32.gmra.mxu3 %vm50_vm0, %v550_v17 }
 0x13a   :  { %3302 = vmatpush.xpose.msk.msrb.mxu3 %vm50_vm0, %v4608_v4 }
 0x13c   :  { %v553_v5 = vpop.f32.mrf.mxu0  ;;  %v4800_v61 = vpop.f32.mrf.mxu1 }
 0x13d   :  { %1475 = vrot.lane.b32.xlu0 %v550_v17, %s3923_s22  ;;  %3434 = vrot.lane.b32.xlu2 %v4798_v58, %s3922_s19 }
 0x13e   :  { %3303 = vmatpush.xpose.msk.msrb.mxu3 %vm50_vm0, %v4511_v18 }
 0x141   :  { %3236 = vmatmul.msk.f32.gmra.mxu3 %vm50_vm0, %v553_v5 }
 0x142   :  { %3304 = vmatpush.xpose.msk.msrb.mxu3 %vm50_vm0, %v4508_v28 }
 0x144   :  { %v556_v25 = vpop.f32.mrf.mxu0  ;;  %v4810_v22 = vpop.f32.mrf.mxu1 }
 0x145   :  { %1911 = vrot.lane.b32.xlu0 %v550_v17, %s3921_s18  ;;  %1477 = vrot.lane.b32.xlu2 %v553_v5, %s3923_s22  ;;  %v4832_v60 = vpack.i.bf16 %v4800_v61, %v4810_v22 }
 0x146   :  { %3305 = vmatpush.xpose.msk.msrb.mxu3 %vm50_vm0, %v4480_v34  ;;  %1479 = vrot.lane.b32.xlu1 %v556_v25, %s3923_s22 }
 0x149   :  { %3237 = vmatmul.msk.f32.gmra.mxu3 %vm50_vm0, %v556_v25 }
 0x14a   :  { %3306 = vmatpush.xpose.msk.msrb.mxu3 %vm50_vm0, %v4425_v45 }
 0x14c   :  { %v559_v3 = vpop.f32.mrf.mxu0  ;;  %v4820_v46 = vpop.f32.mrf.mxu1 }
 0x14d   :  { %1913 = vrot.lane.b32.xlu2 %v553_v5, %s3921_s18  ;;  %976 = vrot.lane.b32.xlu0 %v553_v5, %s3922_s19 }
 0x14e   :  { %3307 = vmatpush.xpose.msk.msrb.mxu3 %vm50_vm0, %v4382_v35  ;;  %1915 = vrot.lane.b32.xlu1 %v556_v25, %s3921_s18 }
 0x151   :  { %3238 = vmatmul.msk.f32.gmra.mxu3 %vm50_vm0, %v559_v3 }
 0x152   :  { %3308 = vmatpush.xpose.msk.msrb.mxu3 %vm50_vm0, %v4337_v14 }
 0x154   :  { %v562_v40 = vpop.f32.mrf.mxu0  ;;  %v4834_v7 = vpop.f32.mrf.mxu1 }
 0x155   :  { %3439 = vrot.lane.b32.xlu0 %v4832_v60, %s3922_s19  ;;  %978 = vrot.lane.b32.xlu2 %v556_v25, %s3922_s19  ;;  %v4857_v54 = vpack.i.bf16 %v4820_v46, %v4834_v7 }
 0x156   :  { %3309 = vmatpush.xpose.msk.msrb.mxu3 %vm50_vm0, %v4306_v11  ;;  %980 = vrot.lane.b32.xlu1 %v559_v3, %s3922_s19 }
 0x159   :  { %3239 = vmatmul.msk.f32.gmra.mxu3 %vm50_vm0, %v562_v40 }
 0x15a   :  { %3310 = vmatpush.xpose.msk.msrb.mxu3 %vm50_vm0, %v4272_v51 }
 0x15c   :  { %v565_v2 = vpop.f32.mrf.mxu0  ;;  %v4845_v10 = vpop.f32.mrf.mxu1 }
 0x15d   :  { %1481 = vrot.lane.b32.xlu0 %v559_v3, %s3923_s22  ;;  %984 = vrot.lane.b32.xlu2 %v565_v2, %s3922_s19 }
 0x15e   :  { %3311 = vmatpush.xpose.msk.msrb.mxu3 %vm50_vm0, %v4236_v9  ;;  %1917 = vrot.lane.b32.xlu1 %v559_v3, %s3921_s18 }
 0x161   :  { %3240 = vmatmul.msk.f32.gmra.mxu3 %vm50_vm0, %v565_v2 }
 0x164   :  { %v568_v52 = vpop.f32.mrf.mxu0  ;;  %v633_v63 = vpop.f32.mrf.mxu1 }
 0x165   :  { %982 = vrot.lane.b32.xlu0 %v562_v40, %s3922_s19  ;;  %1487 = vrot.lane.b32.xlu2 %v568_v52, %s3923_s22  ;;  %v4873_v38 = vpack.i.bf16 %v4845_v10, %v633_v63 }
 0x166   :  { %1919 = vrot.lane.b32.xlu1 %v562_v40, %s3921_s18 }
 0x167   :  { %6672 = vst [vmem:[#allocation3_spill] sm:$0xff] %v4873_v38 }
 0x169   :  { %3241 = vmatmul.msk.f32.gmra.mxu3 %vm50_vm0, %v568_v52 }
 0x16c   :  { %v571_v55 = vpop.f32.mrf.mxu0  ;;  %v636_v24 = vpop.f32.mrf.mxu1 }
 0x16d   :  { %3444 = vrot.lane.b32.xlu0 %v4857_v54, %s3922_s19 }
 0x16e   :  { %1485 = vrot.lane.b32.xlu1 %v565_v2, %s3923_s22 }
 0x171   :  { %3242 = vmatmul.msk.f32.gmra.mxu3 %vm50_vm0, %v571_v55 }
 0x174   :  { %v574_v30 = vpop.f32.mrf.mxu0  ;;  %v639_v57 = vpop.f32.mrf.mxu1 }
 0x175   :  { %1483 = vrot.lane.b32.xlu0 %v562_v40, %s3923_s22  ;;  %990 = vrot.lane.b32.xlu2 %v574_v30, %s3922_s19  ;;  %v4877_v37 = vpack.i.bf16 %v636_v24, %v639_v57 }
 0x176   :  { %986 = vrot.lane.b32.xlu1 %v568_v52, %s3922_s19 }
 0x177   :  { %v969_v1 = vpop.permute.xlu2 %968 }
 0x178   :  { %3264 = vmatmul.msk.f32.vlgmr.msra.gmra.mxu2 %vm50_vm0, %v969_v1  ;;  %v794_v1 = vld [vmem:[%s6638_s0 + $0x18] sm:$0xff] }
 0x179   :  { %3243 = vmatmul.msk.f32.gmra.mxu3 %vm50_vm0, %v574_v30 }
 0x17c   :  { %v577_v15 = vpop.f32.mrf.mxu0  ;;  %v642_v56 = vpop.f32.mrf.mxu1 }
 0x17d   :  { %1921 = vrot.lane.b32.xlu0 %v565_v2, %s3921_s18  ;;  %1927 = vrot.lane.b32.xlu2 %v574_v30, %s3921_s18 }
 0x17e   :  { %1489 = vrot.lane.b32.xlu1 %v571_v55, %s3923_s22 }
 0x17f   :  { %v1470_v6 = vpop.permute.xlu2 %1469 }
 0x181   :  { %3244 = vmatmul.msk.f32.gmra.mxu3 %vm50_vm0, %v577_v15 }
 0x184   :  { %v4875_v48 = vpop.f32.mrf.mxu0  ;;  %v645_v41 = vpop.f32.mrf.mxu1 }
 0x185   :  { %3449 = vrot.lane.b32.xlu0 %v4873_v38, %s3922_s19  ;;  %v4926_v25 = vpack.i.bf16 %v642_v56, %v645_v41 }
 0x186   :  { %3454 = vrot.lane.b32.xlu1 %v4877_v37, %s3922_s19 }
 0x187   :  { %v4883_v21 = vpop.permute.xlu2 %1907 }
 0x189   :  { %3245 = vmatmul.msk.f32.gmra.mxu3 %vm50_vm0, %v4875_v48 }
 0x18c   :  { %v4887_v27 = vpop.f32.mrf.mxu0  ;;  %v648_v62 = vpop.f32.mrf.mxu1 }
 0x18d   :  { %1923 = vrot.lane.b32.xlu0 %v568_v52, %s3921_s18  ;;  %996 = vrot.lane.b32.xlu2 %v4887_v27, %s3922_s19  ;;  %v791_v52 = vld [vmem:[%s6638_s0] sm:$0xff] }
 0x18e   :  { %1491 = vrot.lane.b32.xlu1 %v574_v30, %s3923_s22 }
 0x18f   :  { %v4893_v31 = vpop.permute.xlu1 %1905  ;;  %v975_v20 = vpop.permute.xlu2 %974 }
 0x191   :  { %3246 = vmatmul.msk.f32.gmra.mxu3 %vm50_vm0, %v4887_v27 }
 0x194   :  { %v651_v23 = vpop.f32.mrf.mxu1  ;;  %v4903_v42 = vpop.f32.mrf.mxu0 }
 0x195   :  { %988 = vrot.lane.b32.xlu0 %v571_v55, %s3922_s19  ;;  %1403 = vmatpush.msrb.mxu1 %v651_v23  ;;  %v4898_v32 = vpack.i.bf16 %v648_v62, %v651_v23  ;;  %v796_v23 = vld [vmem:[%s6638_s0 + $0x28] sm:$0xff] }
 0x196   :  { %992 = vrot.lane.b32.xlu1 %v577_v15, %s3922_s19 }
 0x197   :  { %1404 = vmatpush.msrb.mxu1 %v648_v62  ;;  %3464 = vrot.lane.b32.xlu2 %v4898_v32, %s3922_s19  ;;  %v971_v33 = vpop.permute.xlu0 %970  ;;  %v4910_v49 = vpop.permute.xlu2 %3434 }
 0x198   :  { %3265 = vmatmul.msk.f32.gmra.mxu2 %vm50_vm0, %v971_v33 }
 0x199   :  { %v4906_v0 = vpop.permute.xlu1 %3429  ;;  %1405 = vmatpush.msrb.mxu1 %v645_v41  ;;  %3247 = vmatmul.msk.f32.gmra.mxu3 %vm50_vm0, %v4903_v42 }
 0x19b   :  { %1406 = vmatpush.msrb.mxu1 %v642_v56 }
 0x19d   :  { %1929 = vrot.lane.b32.xlu0 %v577_v15, %s3921_s18  ;;  %1407 = vmatpush.msrb.mxu1 %v639_v57 }
 0x19e   :  { %1925 = vrot.lane.b32.xlu1 %v571_v55, %s3921_s18 }
 0x19f   :  { %1408 = vmatpush.msrb.mxu1 %v636_v24  ;;  %v1472_v43 = vpop.permute.xlu0 %1471  ;;  %v1478_v17 = vpop.permute.xlu2 %1477 }
 0x1a1   :  { %v973_v44 = vpop.permute.xlu1 %972  ;;  %1409 = vmatpush.msrb.mxu1 %v633_v63  ;;  %3312 = vmatmul.msk.f32.vlgmr.msrb.gmra.mxu3 %vm50_vm0, %v1470_v6 }
 0x1a2   :  { %3266 = vmatmul.msk.f32.gmra.mxu2 %vm50_vm0, %v973_v44 }
 0x1a3   :  { %1410 = vmatpush.msrb.mxu1 %v4845_v10 }
 0x1a4   :  { %v743_v13 = vpop.f32.mrf.mxu3 }
 0x1a5   :  { %1411 = vmatpush.msrb.mxu1 %v4834_v7  ;;  %994 = vrot.lane.b32.xlu0 %v4875_v48, %s3922_s19 }
 0x1a6   :  { %1493 = vrot.lane.b32.xlu1 %v577_v15, %s3923_s22 }
 0x1a7   :  { %1412 = vmatpush.msrb.mxu1 %v4820_v46  ;;  %v1474_v5 = vpop.permute.xlu0 %1473  ;;  %v4933_v46 = vpop.permute.xlu2 %1913 }
 0x1a9   :  { %1413 = vmatpush.msrb.mxu1 %v4810_v22  ;;  %3313 = vmatmul.msk.f32.gmra.mxu3 %vm50_vm0, %v1472_v43  ;;  %v4936_v40 = vpop.permute.xlu1 %1909 }
 0x1aa   :  { %3267 = vmatmul.msk.f32.gmra.mxu2 %vm50_vm0, %v975_v20 }
 0x1ab   :  { %1414 = vmatpush.msrb.mxu1 %v4800_v61  ;;  %v4940_v61 = vpop.f32.mrf.mxu0 }
 0x1ac   :  { %v746_v3 = vpop.f32.mrf.mxu3  ;;  %v4946_v7 = vperm.slane %v4940_v61, 0 }
 0x1ad   :  { %1415 = vmatpush.msrb.mxu1 %v4786_v26  ;;  %3459 = vrot.lane.b32.xlu0 %v4926_v25, %s3922_s19 }
 0x1ae   :  { %998 = vrot.lane.b32.xlu1 %v4903_v42, %s3922_s19 }
 0x1af   :  { %1416 = vmatpush.msrb.mxu1 %v4776_v39  ;;  %v1476_v22 = vpop.permute.xlu0 %1475  ;;  %v979_v10 = vpop.permute.xlu2 %978 }
 0x1b1   :  { %1417 = vmatpush.msrb.mxu1 %v4761_v53  ;;  %3314 = vmatmul.msk.f32.gmra.mxu3 %vm50_vm0, %v1474_v5  ;;  %v744_v53 = vadd.f32 %v743_v13, %v4946_v7  ;;  %v793_v5 = vld [vmem:[%s6638_s0 + $0x10] sm:$0xff] }
 0x1b3   :  { %1418 = vmatpush.msrb.mxu1 %v4742_v47  ;;  %v4955_v63 = vadd.f32 %v791_v52, %v744_v53 }
 0x1b4   :  { %v749_v26 = vpop.f32.mrf.mxu3 }
 0x1b5   :  { %1495 = vrot.lane.b32.xlu0 %v4875_v48, %s3923_s22 }
 0x1b7   :  { %v4948_v2 = vpop.permute.xlu0 %1911  ;;  %v985_v30 = vpop.permute.xlu2 %984 }
 0x1b8   :  { %v1480_v39 = vpop.permute.xlu1 %1479 }
 0x1b9   :  { %3315 = vmatmul.msk.f32.gmra.mxu3 %vm50_vm0, %v1476_v22 }
 0x1bc   :  { %v752_v47 = vpop.f32.mrf.mxu3 }
 0x1bd   :  { %v753_v57 = vadd.f32 %v752_v47, %v4946_v7  ;;  %v747_v47 = vadd.f32 %v746_v3, %v4946_v7 }
 0x1bf   :  { %v977_v55 = vpop.permute.xlu0 %976  ;;  %v4966_v56 = vadd.f32 %v794_v1, %v753_v57  ;;  %v1488_v62 = vpop.permute.xlu2 %1487  ;;  %v797_v57 = vld [vmem:[%s6638_s0 + $0x30] sm:$0xff] }
 0x1c0   :  { %v4957_v24 = vpop.permute.xlu1 %1915  ;;  %3268 = vmatmul.msk.f32.gmra.mxu2 %vm50_vm0, %v977_v55  ;;  %823 = vmax.xlane.f32.xlu2 %v4955_v63 }
 0x1c1   :  { %3316 = vmatmul.msk.f32.gmra.mxu3 %vm50_vm0, %v1478_v17  ;;  %v750_v17 = vadd.f32 %v749_v26, %v4946_v7  ;;  %v792_v26 = vld [vmem:[%s6638_s0 + $0x8] sm:$0xff] }
 0x1c2   :  { %v5002_v1 = vadd.f32 %v792_v26, %v747_v47 }
 0x1c4   :  { %v755_v15 = vpop.f32.mrf.mxu3 }
 0x1c7   :  { %v4968_v6 = vpop.permute.xlu0 %3439 }
 0x1c8   :  { %v981_v41 = vpop.permute.xlu1 %980  ;;  %3269 = vmatmul.msk.f32.gmra.mxu2 %vm50_vm0, %v979_v10  ;;  %829 = vmax.xlane.f32.xlu2 %v4966_v56 }
 0x1c9   :  { %3317 = vmatmul.msk.f32.gmra.mxu3 %vm50_vm0, %v1480_v39  ;;  %v4988_v39 = vadd.f32 %v793_v5, %v750_v17 }
 0x1cc   :  { %v758_v20 = vpop.f32.mrf.mxu3 }
 0x1cd   :  { %v759_v33 = vadd.f32 %v758_v20, %v4946_v7 }
 0x1cf   :  { %v1482_v43 = vpop.permute.xlu0 %1481  ;;  %v4977_v44 = vadd.f32 %v796_v23, %v759_v33  ;;  %v991_v22 = vpop.permute.xlu2 %990  ;;  %v756_v33 = vadd.f32 %v755_v15, %v4946_v7 }
 0x1d0   :  { %v4979_v13 = vpop.permute.xlu1 %1917  ;;  %3270 = vmatmul.msk.f32.gmra.mxu2 %vm50_vm0, %v981_v41 }
 0x1d1   :  { %3318 = vmatmul.msk.f32.gmra.mxu3 %vm50_vm0, %v1482_v43  ;;  %833 = vmax.xlane.f32.xlu2 %v4977_v44  ;;  %v795_v43 = vld [vmem:[%s6638_s0 + $0x20] sm:$0xff] }
 0x1d2   :  { %v5017_v17 = vadd.f32 %v795_v43, %v756_v33 }
 0x1d4   :  { %v761_v10 = vpop.f32.mrf.mxu3 }
 0x1d5   :  { %v762_v55 = vadd.f32 %v761_v10, %v4946_v7 }
 0x1d7   :  { %v983_v53 = vpop.permute.xlu0 %982  ;;  %v5004_v41 = vadd.f32 %v797_v57, %v762_v55  ;;  %v5006_v20 = vpop.permute.xlu2 %1927 }
 0x1d8   :  { %v4990_v52 = vpop.permute.xlu1 %1919  ;;  %827 = vmax.xlane.f32.xlu1 %v4988_v39  ;;  %3271 = vmatmul.msk.f32.gmra.mxu2 %vm50_vm0, %v983_v53  ;;  %6674 = vst [vmem:[#allocation5_spill] sm:$0xff] %v5006_v20 }
 0x1d9   :  { %6673 = vst [vmem:[#allocation4_spill] sm:$0xff] %v4990_v52 }
 0x1dc   :  { %v764_v5 = vpop.f32.mrf.mxu3 }
 0x1dd   :  { %v765_v55 = vadd.f32 %v764_v5, %v4946_v7 }
 0x1df   :  { %v5008_v23 = vpop.permute.xlu0 %3444  ;;  %825 = vmax.xlane.f32.xlu0 %v5002_v1 }
 0x1e0   :  { %v1486_v3 = vpop.permute.xlu1 %1485  ;;  %835 = vmax.xlane.f32.xlu1 %v5004_v41  ;;  %3272 = vmatmul.msk.f32.gmra.mxu2 %vm50_vm0, %v985_v30  ;;  %v798_v30 = vld [vmem:[%s6638_s0 + $0x38] sm:$0xff] }
 0x1e1   :  { %v5026_v15 = vadd.f32 %v798_v30, %v765_v55  ;;  %v3280_v30 = vld [vmem:[%s6638_s0 + $0x80] sm:$0xff] }
 0x1e7   :  { %v997_v10 = vpop.permute.xlu2 %996  ;;  %v1484_v53 = vpop.permute.xlu0 %1483  ;;  %831 = vmax.xlane.f32.xlu0 %v5017_v17 }
 0x1e8   :  { %v987_v47 = vpop.permute.xlu1 %986  ;;  %3319 = vmatmul.msk.f32.gmra.mxu3 %vm50_vm0, %v1484_v53 }
 0x1e9   :  { %3273 = vmatmul.msk.f32.gmra.mxu2 %vm50_vm0, %v987_v47  ;;  %v5033_v47 = vperm.slane %v4940_v61, 1 }
 0x1ef   :  { %v5028_v26 = vpop.permute.xlu0 %1921  ;;  %837 = vmax.xlane.f32.xlu0 %v5026_v15 }
 0x1f0   :  { %6675 = vst [vmem:[#allocation6_spill] sm:$0xff] %v5028_v26  ;;  %v1490_v57 = vpop.permute.xlu1 %1489  ;;  %3320 = vmatmul.msk.f32.gmra.mxu3 %vm50_vm0, %v1486_v3 }
 0x1f1   :  { %v3465_v33 = vpop.permute.xlu2 %3464 }
 0x1f2   :  { %v3467_v43 = vunpack.i.h.bf16 %v3465_v33  ;;  %v3466_v53 = vunpack.i.l.bf16 %v3465_v33 }
 0x1f4   :  { %1338 = vmatpush.msra.mxu0 %v3466_v53 }
 0x1f6   :  { %1339 = vmatpush.msra.mxu0 %v3467_v43 }
 0x1f7   :  { %v3450_v5 = vpop.permute.xlu0 %3449 }
 0x1f8   :  { %v3455_v16 = vpop.permute.xlu1 %3454  ;;  %3321 = vmatmul.msk.f32.gmra.mxu3 %vm50_vm0, %v1488_v62 }
 0x1f9   :  { %v3457_v38 = vunpack.i.h.bf16 %v3455_v16 }
 0x1fb   :  { %v1049_v55 = vpop.f32.mrf.mxu2 }
 0x1fc   :  { %v1050_v20 = vadd.f32 %v1049_v55, %v5033_v47 }
 0x1fe   :  { %v5040_v3 = vadd.f32 %v3280_v30, %v1050_v20  ;;  %v3281_v30 = vld [vmem:[%s6638_s0 + $0x88] sm:$0xff] }
 0x1ff   :  { %v5042_v26 = vpop.permute.xlu0 %1923 }
 0x200   :  { %6676 = vst [vmem:[#allocation7_spill] sm:$0xff] %v5042_v26  ;;  %v1492_v33 = vpop.permute.xlu1 %1491  ;;  %3322 = vmatmul.msk.f32.gmra.mxu3 %vm50_vm0, %v1490_v57  ;;  %1130 = vmax.xlane.f32.xlu0 %v5040_v3 }
 0x207   :  { %v989_v43 = vpop.permute.xlu0 %988 }
 0x208   :  { %v993_v53 = vpop.permute.xlu1 %992  ;;  %3274 = vmatmul.msk.f32.gmra.mxu2 %vm50_vm0, %v989_v43  ;;  %3323 = vmatmul.msk.f32.gmra.mxu3 %vm50_vm0, %v1492_v33 }
 0x20f   :  { %v5048_v62 = vpop.permute.xlu0 %1929 }
 0x210   :  { %6677 = vst [vmem:[#allocation8_spill] sm:$0xff] %v5048_v62  ;;  %v5050_v52 = vpop.permute.xlu1 %1925  ;;  %3275 = vmatmul.msk.f32.gmra.mxu2 %vm50_vm0, %v991_v22 }
 0x211   :  { %6678 = vst [vmem:[#allocation9_spill] sm:$0xff] %v5050_v52  ;;  %v3282_v52 = vld [vmem:[%s6638_s0 + $0x90] sm:$0xff] }
 0x217   :  { %v995_v20 = vpop.permute.xlu0 %994 }
 0x218   :  { %v1494_v55 = vpop.permute.xlu1 %1493  ;;  %3276 = vmatmul.msk.f32.gmra.mxu2 %vm50_vm0, %v993_v53  ;;  %v3456_v53 = vunpack.i.l.bf16 %v3455_v16 }
 0x219   :  { %3324 = vmatmul.msk.f32.gmra.mxu3 %vm50_vm0, %v1494_v55 }
 0x21b   :  { %v1052_v57 = vpop.f32.mrf.mxu2 }
 0x21c   :  { %v1053_v43 = vadd.f32 %v1052_v57, %v5033_v47 }
 0x21e   :  { %v5059_v33 = vadd.f32 %v3281_v30, %v1053_v43  ;;  %v3451_v43 = vunpack.i.l.bf16 %v3450_v5 }
 0x21f   :  { %v3460_v62 = vpop.permute.xlu0 %3459 }
 0x220   :  { %v3461_v26 = vunpack.i.l.bf16 %v3460_v62  ;;  %3277 = vmatmul.msk.f32.gmra.mxu2 %vm50_vm0, %v995_v20  ;;  %1132 = vmax.xlane.f32.xlu2 %v5059_v33  ;;  %v3462_v22 = vunpack.i.h.bf16 %v3460_v62  ;;  %v3446_v62 = vunpack.i.l.bf16 %v5008_v23 }
 0x222   :  { %1340 = vmatpush.msra.mxu0 %v3461_v26  ;;  %v3452_v26 = vunpack.i.h.bf16 %v3450_v5 }
 0x224   :  { %1341 = vmatpush.msra.mxu0 %v3462_v22  ;;  %v3283_v22 = vld [vmem:[%s6638_s0 + $0x98] sm:$0xff] }
 0x225   :  { %v1055_v55 = vpop.f32.mrf.mxu2 }
 0x226   :  { %v1056_v57 = vadd.f32 %v1055_v55, %v5033_v47  ;;  %1342 = vmatpush.msra.mxu0 %v3456_v53  ;;  %v3447_v53 = vunpack.i.h.bf16 %v5008_v23  ;;  %v3442_v55 = vunpack.i.h.bf16 %v4968_v6 }
 0x227   :  { %v1496_v30 = vpop.permute.xlu0 %1495 }
 0x228   :  { %3278 = vmatmul.msk.f32.gmra.mxu2 %vm50_vm0, %v997_v10  ;;  %1343 = vmatpush.msra.mxu0 %v3457_v38  ;;  %v5068_v20 = vadd.f32 %v3282_v52, %v1056_v57  ;;  %v999_v52 = vpop.permute.xlu1 %998  ;;  %v3441_v10 = vunpack.i.l.bf16 %v4968_v6 }
 0x229   :  { %3325 = vmatmul.msk.f32.gmra.mxu3 %vm50_vm0, %v1496_v30  ;;  %v3436_v30 = vunpack.i.l.bf16 %v4910_v49 }
 0x22a   :  { %1344 = vmatpush.msra.mxu0 %v3451_v43  ;;  %1134 = vmax.xlane.f32.xlu1 %v5068_v20  ;;  %v3437_v43 = vunpack.i.h.bf16 %v4910_v49 }
 0x22c   :  { %1345 = vmatpush.msra.mxu0 %v3452_v26 }
 0x22d   :  { %v1058_v16 = vpop.f32.mrf.mxu2 }
 0x22e   :  { %v1059_v38 = vadd.f32 %v1058_v16, %v5033_v47  ;;  %1346 = vmatpush.msra.mxu0 %v3446_v62  ;;  %v3431_v62 = vunpack.i.l.bf16 %v4906_v0  ;;  %v3432_v16 = vunpack.i.h.bf16 %v4906_v0 }
 0x230   :  { %3279 = vmatmul.msk.f32.gmra.mxu2 %vm50_vm0, %v999_v52  ;;  %1347 = vmatpush.msra.mxu0 %v3447_v53  ;;  %v5080_v5 = vadd.f32 %v3283_v22, %v1059_v38 }
 0x232   :  { %1348 = vmatpush.msra.mxu0 %v3441_v10  ;;  %1136 = vmax.xlane.f32.xlu0 %v5080_v5 }
 0x233   :  { %v824_v57 = vpop.xlane.xlu2 %823 }
 0x234   :  { %v855_v23 = vsub.f32 %v4955_v63, %v824_v57  ;;  %1349 = vmatpush.msra.mxu0 %v3442_v55  ;;  %v3284_v63 = vld [vmem:[%s6638_s0 + $0xa0] sm:$0xff] }
 0x236   :  { %v871_v26 = vmul.f32 1.442695, %v855_v23  ;;  %1350 = vmatpush.msra.mxu0 %v3436_v30 }
 0x238   :  { %3582 = vpow2.f32 %v871_v26  ;;  %1351 = vmatpush.msra.mxu0 %v3437_v43 }
 0x23a   :  { %1352 = vmatpush.msra.mxu0 %v3431_v62  ;;  %v3290_v62 = vld [vmem:[%s6638_s0 + $0xd0] sm:$0xff] }
 0x23c   :  { %1353 = vmatpush.msra.mxu0 %v3432_v16 }
 0x23e   :  { %3344 = vmatpush.xpose.msk.msrb.mxu0 %vm50_vm0, %v4563_v12  ;;  %v5091_v6 = vpop.eup %3582 }
 0x23f   :  { %903 = vadd.xlane.f32.xlu2 %v5091_v6 }
 0x242   :  { %3345 = vmatpush.xpose.msk.msrb.mxu0 %vm50_vm0, %v4613_v29  ;;  %v3285_v29 = vld [vmem:[%s6638_s0 + $0xa8] sm:$0xff] }
 0x243   :  { %v1061_v49 = vpop.f32.mrf.mxu2 }
 0x244   :  { %v1062_v22 = vadd.f32 %v1061_v49, %v5033_v47  ;;  %v5172_v49 = vpop.xlane.xlu2 %829 }
 0x246   :  { %3346 = vmatpush.xpose.msk.msrb.mxu0 %vm50_vm0, %v4617_v36  ;;  %v5102_v0 = vadd.f32 %v3284_v63, %v1062_v22 }
 0x248   :  { %1138 = vmax.xlane.f32.xlu1 %v5102_v0 }
 0x24a   :  { %3347 = vmatpush.xpose.msk.msrb.mxu0 %vm50_vm0, %v4632_v19  ;;  %v3286_v19 = vld [vmem:[%s6638_s0 + $0xb0] sm:$0xff] }
 0x24b   :  { %v1064_v12 = vpop.f32.mrf.mxu2 }
 0x24c   :  { %v1065_v53 = vadd.f32 %v1064_v12, %v5033_v47  ;;  %v5181_v22 = vpop.xlane.xlu2 %833 }
 0x24e   :  { %3348 = vmatpush.xpose.msk.msrb.mxu0 %vm50_vm0, %v4644_v59  ;;  %v5113_v38 = vadd.f32 %v3285_v29, %v1065_v53 }
 0x250   :  { %1140 = vmax.xlane.f32.xlu2 %v5113_v38 }
 0x252   :  { %3349 = vmatpush.xpose.msk.msrb.mxu0 %vm50_vm0, %v4639_v8  ;;  %v3287_v8 = vld [vmem:[%s6638_s0 + $0xb8] sm:$0xff] }
 0x253   :  { %v1067_v36 = vpop.f32.mrf.mxu2 }
 0x254   :  { %v1068_v52 = vadd.f32 %v1067_v36, %v5033_v47  ;;  %v3292_v36 = vld [vmem:[%s6638_s0 + $0xe0] sm:$0xff] }
 0x256   :  { %3350 = vmatpush.xpose.msk.msrb.mxu0 %vm50_vm0, %v4608_v4  ;;  %v5124_v10 = vadd.f32 %v3286_v19, %v1068_v52 }
 0x258   :  { %1142 = vmax.xlane.f32.xlu1 %v5124_v10 }
 0x25a   :  { %3351 = vmatpush.xpose.msk.msrb.mxu0 %vm50_vm0, %v4511_v18  ;;  %v3288_v18 = vld [vmem:[%s6638_s0 + $0xc0] sm:$0xff] }
 0x25b   :  { %v1070_v59 = vpop.f32.mrf.mxu2 }
 0x25c   :  { %v1071_v55 = vadd.f32 %v1070_v59, %v5033_v47 }
 0x25e   :  { %3352 = vmatpush.xpose.msk.msrb.mxu0 %vm50_vm0, %v4508_v28  ;;  %v5135_v57 = vadd.f32 %v3287_v8, %v1071_v55 }
 0x260   :  { %1144 = vmax.xlane.f32.xlu1 %v5135_v57 }
 0x262   :  { %3353 = vmatpush.xpose.msk.msrb.mxu0 %vm50_vm0, %v4480_v34  ;;  %v3289_v34 = vld [vmem:[%s6638_s0 + $0xc8] sm:$0xff] }
 0x263   :  { %v1073_v4 = vpop.f32.mrf.mxu2 }
 0x264   :  { %v1074_v30 = vadd.f32 %v1073_v4, %v5033_v47 }
 0x266   :  { %3354 = vmatpush.xpose.msk.msrb.mxu0 %vm50_vm0, %v4425_v45  ;;  %v5146_v23 = vadd.f32 %v3288_v18, %v1074_v30  ;;  %v3293_v18 = vld [vmem:[%s6638_s0 + $0xe8] sm:$0xff]  ;;  %v828_v30 = vpop.xlane.xlu1 %827 }
 0x268   :  { %1146 = vmax.xlane.f32.xlu0 %v5146_v23 }
 0x26a   :  { %3355 = vmatpush.xpose.msk.msrb.mxu0 %vm50_vm0, %v4382_v35  ;;  %v826_v35 = vpop.xlane.xlu0 %825 }
 0x26c   :  { %v1076_v28 = vpop.f32.mrf.mxu2 }
 0x26d   :  { %v1077_v43 = vadd.f32 %v1076_v28, %v5033_v47 }
 0x26e   :  { %3356 = vmatpush.xpose.msk.msrb.mxu0 %vm50_vm0, %v4337_v14 }
 0x26f   :  { %v5157_v26 = vadd.f32 %v3289_v34, %v1077_v43 }
 0x271   :  { %1148 = vmax.xlane.f32.xlu0 %v5157_v26 }
 0x272   :  { %3357 = vmatpush.xpose.msk.msrb.mxu0 %vm50_vm0, %v4306_v11  ;;  %v5169_v14 = vpop.xlane.xlu0 %831 }
 0x276   :  { %3358 = vmatpush.xpose.msk.msrb.mxu0 %vm50_vm0, %v4272_v51 }
 0x27a   :  { %3359 = vmatpush.xpose.msk.msrb.mxu0 %vm50_vm0, %v4236_v9  ;;  %v3291_v9 = vld [vmem:[%s6638_s0 + $0xd8] sm:$0xff]  ;;  %v5183_v12 = vpop.xlane.xlu0 %837 }
 0x282   :  { %v1131_v52 = vpop.xlane.xlu0 %1130 }
 0x28b   :  { %v1079_v45 = vpop.f32.mrf.mxu2 }
 0x28c   :  { %v1080_v16 = vadd.f32 %v1079_v45, %v5033_v47 }
 0x28e   :  { %v5174_v63 = vadd.f32 %v3290_v62, %v1080_v16  ;;  %v856_v16 = vsub.f32 %v5002_v1, %v826_v35  ;;  %v1162_v1 = vsub.f32 %v5040_v3, %v1131_v52 }
 0x290   :  { %1150 = vmax.xlane.f32.xlu0 %v5174_v63 }
 0x293   :  { %v1082_v51 = vpop.f32.mrf.mxu2  ;;  %v1133_v59 = vpop.xlane.xlu2 %1132 }
 0x294   :  { %v1083_v11 = vadd.f32 %v1082_v51, %v5033_v47  ;;  %v1163_v55 = vsub.f32 %v5059_v33, %v1133_v59  ;;  %v3294_v51 = vld [vmem:[%s6638_s0 + $0xf0] sm:$0xff] }
 0x296   :  { %v5185_v29 = vadd.f32 %v3291_v9, %v1083_v11  ;;  %v1180_v34 = vmul.f32 1.442695, %v1163_v55  ;;  %v3295_v55 = vld [vmem:[%s6638_s0 + $0xf8] sm:$0xff] }
 0x298   :  { %1152 = vmax.xlane.f32.xlu2 %v5185_v29  ;;  %3584 = vpow2.f32 %v1180_v34 }
 0x29b   :  { %v1085_v53 = vpop.f32.mrf.mxu2 }
 0x29c   :  { %v1086_v19 = vadd.f32 %v1085_v53, %v5033_v47  ;;  %v5209_v53 = vpop.xlane.xlu1 %835 }
 0x29e   :  { %v5192_v8 = vadd.f32 %v3292_v36, %v1086_v19  ;;  %v873_v36 = vmul.f32 1.442695, %v856_v16  ;;  %v5213_v59 = vpop.eup %3584 }
 0x2a0   :  { %1154 = vmax.xlane.f32.xlu2 %v5192_v8 }
 0x2a3   :  { %v1088_v4 = vpop.f32.mrf.mxu2 }
 0x2a4   :  { %v1089_v28 = vadd.f32 %v1088_v4, %v5033_v47 }
 0x2a5   :  { %v1137_v43 = vpop.xlane.xlu0 %1136 }
 0x2a6   :  { %v5200_v45 = vadd.f32 %v3293_v18, %v1089_v28  ;;  %v1165_v62 = vsub.f32 %v5080_v5, %v1137_v43  ;;  %v1178_v18 = vmul.f32 1.442695, %v1162_v1  ;;  %v1135_v28 = vpop.xlane.xlu1 %1134 }
 0x2a7   :  { %v1164_v52 = vsub.f32 %v5068_v20, %v1135_v28  ;;  %v857_v20 = vsub.f32 %v4988_v39, %v828_v30 }
 0x2a8   :  { %1156 = vmax.xlane.f32.xlu2 %v5200_v45  ;;  %v1184_v11 = vmul.f32 1.442695, %v1165_v62 }
 0x2a9   :  { %v1182_v16 = vmul.f32 1.442695, %v1164_v52 }
 0x2aa   :  { %3586 = vpow2.f32 %v1184_v11 }
 0x2ab   :  { %v1091_v33 = vpop.f32.mrf.mxu2  ;;  %3588 = vpow2.f32 %v873_v36  ;;  %v767_v36 = vpop.f32.mrf.mxu3 }
 0x2ac   :  { %v1092_v9 = vadd.f32 %v1091_v33, %v5033_v47  ;;  %v768_v1 = vadd.f32 %v767_v36, %v4946_v7 }
 0x2ae   :  { %v5211_v19 = vadd.f32 %v3294_v51, %v1092_v9 }
 0x2b0   :  { %1158 = vmax.xlane.f32.xlu1 %v5211_v19  ;;  %1212 = vadd.xlane.f32.xlu2 %v5213_v59  ;;  %v5224_v43 = vpop.eup %3586 }
 0x2b1   :  { %v5226_v62 = vpop.eup %3588 }
 0x2b2   :  { %v904_v5 = vpop.xlane.xlu2 %903 }
 0x2b3   :  { %3590 = vrcp.f32 %v904_v5  ;;  %v1094_v35 = vpop.f32.mrf.mxu2  ;;  %v799_v5 = vld [vmem:[%s6638_s0 + $0x40] sm:$0xff] }
 0x2b4   :  { %v1095_v4 = vadd.f32 %v1094_v35, %v5033_v47  ;;  %3592 = vpow2.f32 %v1178_v18  ;;  %v5257_v30 = vadd.f32 %v799_v5, %v768_v1 }
 0x2b5   :  { %3594 = vpow2.f32 %v1182_v16  ;;  %v770_v16 = vpop.f32.mrf.mxu3 }
 0x2b6   :  { %v5222_v34 = vadd.f32 %v3295_v55, %v1095_v4 }
 0x2b8   :  { %1160 = vmax.xlane.f32.xlu0 %v5222_v34  ;;  %1216 = vadd.xlane.f32.xlu1 %v5224_v43 }
 0x2b9   :  { %v3591_v3 = vpop.eup %3590  ;;  %905 = vadd.xlane.f32.xlu2 %v5226_v62 }
 0x2ba   :  { %v951_v47 = vmul.f32 %v3591_v3, %v5091_v6  ;;  %v5233_v33 = vpop.eup %3592  ;;  %v875_v6 = vmul.f32 1.442695, %v857_v20 }
 0x2bb   :  { %v5236_v51 = vpop.eup %3594  ;;  %v1139_v3 = vpop.xlane.xlu1 %1138 }
 0x2bc   :  { %1419 = vmatmul.f32.vlgmr.msrb.gmra.mxu1 %v951_v47  ;;  %3596 = vpow2.f32 %v875_v6  ;;  %v1166_v20 = vsub.f32 %v5102_v0, %v1139_v3  ;;  %v800_v6 = vld [vmem:[%s6638_s0 + $0x48] sm:$0xff] }
 0x2c0   :  { %1210 = vadd.xlane.f32.xlu0 %v5233_v33 }
 0x2c3   :  { %v1141_v18 = vpop.xlane.xlu2 %1140 }
 0x2c4   :  { %v1167_v0 = vsub.f32 %v5113_v38, %v1141_v18 }
 0x2c6   :  { %v1188_v5 = vmul.f32 1.442695, %v1167_v0  ;;  %v859_v0 = vsub.f32 %v5017_v17, %v5169_v14 }
 0x2c8   :  { %1214 = vadd.xlane.f32.xlu0 %v5236_v51 }
 0x2cb   :  { %v1143_v1 = vpop.xlane.xlu1 %1142 }
 0x2d1   :  { %1931 = vrot.lane.b32.xlu2 %v4875_v48, %s3921_s18  ;;  %1497 = vrot.lane.b32.xlu1 %v4887_v27, %s3923_s22  ;;  %v858_v48 = vsub.f32 %v4966_v56, %v5172_v49 }
 0x2d3   :  { %v877_v55 = vmul.f32 1.442695, %v858_v48  ;;  %v1145_v38 = vpop.xlane.xlu1 %1144 }
 0x2db   :  { %v1147_v9 = vpop.xlane.xlu0 %1146 }
 0x2dc   :  { %1499 = vrot.lane.b32.xlu0 %v4903_v42, %s3923_s22  ;;  %v1170_v11 = vsub.f32 %v5146_v23, %v1147_v9 }
 0x2de   :  { %v1194_v35 = vmul.f32 1.442695, %v1170_v11  ;;  %v1186_v11 = vmul.f32 1.442695, %v1166_v20 }
 0x2e0   :  { %3598 = vpow2.f32 %v1194_v35 }
 0x2e1   :  { %3600 = vpow2.f32 %v877_v55 }
 0x2e4   :  { %1933 = vrot.lane.b32.xlu0 %v4887_v27, %s3921_s18  ;;  %v5255_v27 = vpop.eup %3596  ;;  %v1149_v39 = vpop.xlane.xlu0 %1148 }
 0x2e5   :  { %v1171_v56 = vsub.f32 %v5157_v26, %v1149_v39  ;;  %v771_v26 = vadd.f32 %v770_v16, %v4946_v7 }
 0x2e6   :  { %v5262_v49 = vpop.eup %3598 }
 0x2e7   :  { %v1196_v23 = vmul.f32 1.442695, %v1171_v56  ;;  %v5264_v4 = vpop.eup %3600  ;;  %v5277_v48 = vadd.f32 %v800_v6, %v771_v26  ;;  %v773_v56 = vpop.f32.mrf.mxu3  ;;  %v1169_v26 = vsub.f32 %v5135_v57, %v1145_v38 }
 0x2e8   :  { %v774_v57 = vadd.f32 %v773_v56, %v4946_v7 }
 0x2e9   :  { %3602 = vpow2.f32 %v1196_v23 }
 0x2ef   :  { %v5274_v9 = vpop.eup %3602  ;;  %v5295_v20 = vpop.f32.mrf.mxu3 }
 0x2fa   :  { %907 = vadd.xlane.f32.xlu2 %v5255_v27 }
 0x2fb   :  { %839 = vmax.xlane.f32.xlu1 %v5257_v30 }
 0x302   :  { %1226 = vadd.xlane.f32.xlu2 %v5262_v49 }
 0x303   :  { %v1151_v28 = vpop.xlane.xlu0 %1150  ;;  %909 = vadd.xlane.f32.xlu1 %v5264_v4 }
 0x304   :  { %v1172_v52 = vsub.f32 %v5174_v63, %v1151_v28  ;;  %v1168_v28 = vsub.f32 %v5124_v10, %v1143_v1  ;;  %v1192_v10 = vmul.f32 1.442695, %v1169_v26 }
 0x306   :  { %v1198_v47 = vmul.f32 1.442695, %v1172_v52  ;;  %v1190_v3 = vmul.f32 1.442695, %v1168_v28 }
 0x308   :  { %3604 = vpow2.f32 %v1198_v47 }
 0x309   :  { %3606 = vpow2.f32 %v1186_v11 }
 0x30a   :  { %3608 = vpow2.f32 %v1188_v5  ;;  %v779_v5 = vpop.f32.mrf.mxu3 }
 0x30b   :  { %1228 = vadd.xlane.f32.xlu1 %v5274_v9  ;;  %v1153_v36 = vpop.xlane.xlu2 %1152 }
 0x30c   :  { %v1173_v1 = vsub.f32 %v5185_v29, %v1153_v36 }
 0x30e   :  { %v5279_v63 = vpop.eup %3604  ;;  %841 = vmax.xlane.f32.xlu0 %v5277_v48 }
 0x30f   :  { %1230 = vadd.xlane.f32.xlu2 %v5279_v63  ;;  %v5285_v39 = vpop.eup %3606 }
 0x310   :  { %v5290_v47 = vpop.eup %3608 }
 0x313   :  { %v1155_v35 = vpop.xlane.xlu2 %1154 }
 0x314   :  { %v1174_v55 = vsub.f32 %v5192_v8, %v1155_v35  ;;  %v879_v35 = vmul.f32 1.442695, %v859_v0 }
 0x316   :  { %v1202_v23 = vmul.f32 1.442695, %v1174_v55  ;;  %1218 = vadd.xlane.f32.xlu0 %v5285_v39  ;;  %v801_v55 = vld [vmem:[%s6638_s0 + $0x50] sm:$0xff] }
 0x317   :  { %v5315_v29 = vadd.f32 %v801_v55, %v774_v57  ;;  %v780_v57 = vadd.f32 %v779_v5, %v4946_v7 }
 0x318   :  { %3610 = vpow2.f32 %v1202_v23  ;;  %v1200_v23 = vmul.f32 1.442695, %v1173_v1 }
 0x319   :  { %3612 = vpow2.f32 %v1190_v3 }
 0x31b   :  { %v1157_v52 = vpop.xlane.xlu2 %1156 }
 0x31c   :  { %v1175_v18 = vsub.f32 %v5200_v45, %v1157_v52 }
 0x31e   :  { %v5292_v16 = vpop.eup %3610  ;;  %v1204_v8 = vmul.f32 1.442695, %v1175_v18  ;;  %1220 = vadd.xlane.f32.xlu0 %v5290_v47  ;;  %v782_v18 = vpop.f32.mrf.mxu3 }
 0x31f   :  { %1234 = vadd.xlane.f32.xlu1 %v5292_v16  ;;  %v5299_v11 = vpop.eup %3612 }
 0x320   :  { %3614 = vpow2.f32 %v1204_v8 }
 0x321   :  { %3616 = vpow2.f32 %v1192_v10 }
 0x323   :  { %v1213_v6 = vpop.xlane.xlu2 %1212  ;;  %v1159_v3 = vpop.xlane.xlu1 %1158 }
 0x324   :  { %v1176_v56 = vsub.f32 %v5211_v19, %v1159_v3  ;;  %v860_v19 = vsub.f32 %v4977_v44, %v5181_v22 }
 0x326   :  { %v5301_v45 = vpop.eup %3614  ;;  %1222 = vadd.xlane.f32.xlu0 %v5299_v11  ;;  %v1206_v8 = vmul.f32 1.442695, %v1176_v56  ;;  %v881_v55 = vmul.f32 1.442695, %v860_v19  ;;  %v785_v44 = vpop.f32.mrf.mxu3 }
 0x327   :  { %1236 = vadd.xlane.f32.xlu2 %v5301_v45  ;;  %v5313_v52 = vpop.eup %3616 }
 0x32b   :  { %v1161_v28 = vpop.xlane.xlu0 %1160 }
 0x32c   :  { %v1177_v17 = vsub.f32 %v5222_v34, %v1161_v28  ;;  %v906_v14 = vpop.xlane.xlu2 %905 }
 0x32d   :  { %3618 = vrcp.f32 %v906_v14  ;;  %v783_v14 = vadd.f32 %v782_v18, %v4946_v7  ;;  %v862_v18 = vsub.f32 %v5026_v15, %v5183_v12 }
 0x32e   :  { %3620 = vpow2.f32 %v879_v35  ;;  %v1208_v36 = vmul.f32 1.442695, %v1177_v17  ;;  %1224 = vadd.xlane.f32.xlu0 %v5313_v52 }
 0x32f   :  { %3622 = vpow2.f32 %v1200_v23  ;;  %843 = vmax.xlane.f32.xlu2 %v5315_v29  ;;  %v1217_v23 = vpop.xlane.xlu1 %1216  ;;  %v885_v19 = vmul.f32 1.442695, %v862_v18 }
 0x330   :  { %3624 = vpow2.f32 %v1208_v36 }
 0x333   :  { %v3619_v38 = vpop.eup %3618  ;;  %v1211_v34 = vpop.xlane.xlu0 %1210 }
 0x334   :  { %v5320_v26 = vpop.eup %3620  ;;  %3626 = vrcp.f32 %v1211_v34  ;;  %v952_v10 = vmul.f32 %v3619_v38, %v5226_v62  ;;  %v803_v62 = vld [vmem:[%s6638_s0 + $0x60] sm:$0xff] }
 0x335   :  { %v5323_v0 = vpop.eup %3622  ;;  %3628 = vpow2.f32 %v1206_v8  ;;  %v5339_v22 = vadd.f32 %v803_v62, %v780_v57 }
 0x336   :  { %v5325_v1 = vpop.eup %3624  ;;  %1422 = vmatmul.f32.gmra.mxu1 %v952_v10  ;;  %1232 = vadd.xlane.f32.xlu0 %v5323_v0  ;;  %3630 = vrcp.f32 %v1213_v6  ;;  %v861_v6 = vsub.f32 %v5004_v41, %v5209_v53  ;;  %v788_v53 = vpop.f32.mrf.mxu3  ;;  %v786_v10 = vadd.f32 %v785_v44, %v4946_v7 }
 0x337   :  { %1240 = vadd.xlane.f32.xlu1 %v5325_v1  ;;  %911 = vadd.xlane.f32.xlu2 %v5320_v26  ;;  %3632 = vpow2.f32 %v881_v55  ;;  %v789_v12 = vadd.f32 %v788_v53, %v4946_v7  ;;  %v777_v53 = vadd.f32 %v5295_v20, %v4946_v7 }
 0x338   :  { %v883_v36 = vmul.f32 1.442695, %v861_v6 }
 0x33a   :  { %v3627_v35 = vpop.eup %3626 }
 0x33b   :  { %v1258_v28 = vmul.f32 %v3627_v35, %v5233_v33  ;;  %v5337_v3 = vpop.eup %3628  ;;  %v1215_v5 = vpop.xlane.xlu0 %1214  ;;  %v804_v33 = vld [vmem:[%s6638_s0 + $0x68] sm:$0xff] }
 0x33c   :  { %v3631_v17 = vpop.eup %3630  ;;  %3634 = vrcp.f32 %v1215_v5  ;;  %v5353_v41 = vadd.f32 %v804_v33, %v783_v14 }
 0x33d   :  { %1354 = vmatmul.f32.vlgmr.msra.gmra.mxu0 %v1258_v28  ;;  %v1259_v38 = vmul.f32 %v3631_v17, %v5213_v59  ;;  %v5351_v8 = vpop.eup %3632  ;;  %3636 = vpow2.f32 %v883_v36  ;;  %v805_v59 = vld [vmem:[%s6638_s0 + $0x70] sm:$0xff]  ;;  %v5384_v17 = vpop.permute.xlu2 %1931 }
 0x33e   :  { %1238 = vadd.xlane.f32.xlu0 %v5337_v3  ;;  %3638 = vrcp.f32 %v1217_v23  ;;  %v5366_v62 = vadd.f32 %v805_v59, %v786_v10  ;;  %v806_v23 = vld [vmem:[%s6638_s0 + $0x78] sm:$0xff] }
 0x33f   :  { %847 = vmax.xlane.f32.xlu2 %v5339_v22  ;;  %3640 = vpow2.f32 %v885_v19  ;;  %v5380_v6 = vadd.f32 %v806_v23, %v789_v12  ;;  %v3332_v12 = vld [vmem:[%s6638_s0 + $0x120] sm:$0xff] }
 0x342   :  { %v3635_v34 = vpop.eup %3634 }
 0x343   :  { %v1498_v56 = vpop.permute.xlu1 %1497  ;;  %v1260_v57 = vmul.f32 %v3635_v34, %v5236_v51  ;;  %v5364_v35 = vpop.eup %3636  ;;  %v802_v34 = vld [vmem:[%s6638_s0 + $0x58] sm:$0xff] }
 0x344   :  { %3326 = vmatmul.msk.f32.gmra.mxu3 %vm50_vm0, %v1498_v56  ;;  %v3639_v15 = vpop.eup %3638  ;;  %v1550_v51 = vpop.f32.mrf.mxu3  ;;  %v5393_v59 = vadd.f32 %v802_v34, %v777_v53 }
 0x345   :  { %1357 = vmatmul.f32.gmra.mxu0 %v1259_v38  ;;  %v1261_v28 = vmul.f32 %v3639_v15, %v5224_v43  ;;  %v5378_v44 = vpop.eup %3640  ;;  %v3328_v15 = vld [vmem:[%s6638_s0 + $0x100] sm:$0xff] }
 0x346   :  { %913 = vadd.xlane.f32.xlu0 %v5351_v8 }
 0x347   :  { %849 = vmax.xlane.f32.xlu2 %v5353_v41 }
 0x34c   :  { %v1553_v5 = vpop.f32.mrf.mxu3 }
 0x34d   :  { %1360 = vmatmul.f32.gmra.mxu0 %v1260_v57 }
 0x34e   :  { %v1500_v55 = vpop.permute.xlu0 %1499  ;;  %915 = vadd.xlane.f32.xlu0 %v5364_v35 }
 0x34f   :  { %3327 = vmatmul.msk.f32.gmra.mxu3 %vm50_vm0, %v1500_v55  ;;  %851 = vmax.xlane.f32.xlu2 %v5366_v62  ;;  %v5400_v55 = vperm.slane %v4940_v61, 2 }
 0x350   :  { %1935 = vrot.lane.b32.xlu1 %v4903_v42, %s3921_s18 }
 0x351   :  { %v1551_v7 = vadd.f32 %v1550_v51, %v5400_v55 }
 0x354   :  { %v1556_v42 = vpop.f32.mrf.mxu3 }
 0x355   :  { %1363 = vmatmul.f32.gmra.mxu0 %v1261_v28  ;;  %v5413_v28 = vadd.f32 %v3328_v15, %v1551_v7  ;;  %v1557_v34 = vadd.f32 %v1556_v42, %v5400_v55  ;;  %v3331_v42 = vld [vmem:[%s6638_s0 + $0x118] sm:$0xff] }
 0x356   :  { %917 = vadd.xlane.f32.xlu0 %v5378_v44  ;;  %v5397_v57 = vpop.permute.xlu0 %1933 }
 0x357   :  { %853 = vmax.xlane.f32.xlu2 %v5380_v6 }
 0x35c   :  { %v1559_v36 = vpop.f32.mrf.mxu3 }
 0x35d   :  { %v1560_v15 = vadd.f32 %v1559_v36, %v5400_v55 }
 0x36d   :  { %v908_v14 = vpop.xlane.xlu2 %907 }
 0x36e   :  { %3642 = vrcp.f32 %v908_v14  ;;  %v840_v33 = vpop.xlane.xlu1 %839 }
 0x36f   :  { %v863_v56 = vsub.f32 %v5257_v30, %v840_v33  ;;  %v1562_v30 = vpop.f32.mrf.mxu3 }
 0x371   :  { %v887_v43 = vmul.f32 1.442695, %v863_v56  ;;  %v1554_v56 = vadd.f32 %v1553_v5, %v5400_v55  ;;  %v3330_v5 = vld [vmem:[%s6638_s0 + $0x110] sm:$0xff] }
 0x373   :  { %3644 = vpow2.f32 %v887_v43 }
 0x374   :  { %v3643_v38 = vpop.eup %3642 }
 0x375   :  { %v953_v18 = vmul.f32 %v3643_v38, %v5255_v27  ;;  %v1563_v27 = vadd.f32 %v1562_v30, %v5400_v55  ;;  %v3329_v38 = vld [vmem:[%s6638_s0 + $0x108] sm:$0xff]  ;;  %v5434_v30 = vadd.f32 %v3330_v5, %v1557_v34 }
 0x376   :  { %v910_v10 = vpop.xlane.xlu1 %909 }
 0x377   :  { %3646 = vrcp.f32 %v910_v10  ;;  %1425 = vmatmul.f32.gmra.mxu1 %v953_v18  ;;  %v5415_v14 = vadd.f32 %v3332_v12, %v1563_v27  ;;  %v1227_v18 = vpop.xlane.xlu2 %1226 }
 0x379   :  { %v5395_v19 = vpop.eup %3644 }
 0x37a   :  { %919 = vadd.xlane.f32.xlu0 %v5395_v19  ;;  %845 = vmax.xlane.f32.xlu1 %v5393_v59 }
 0x37d   :  { %v3647_v20 = vpop.eup %3646 }
 0x37e   :  { %v954_v23 = vmul.f32 %v3647_v20, %v5264_v4  ;;  %v5424_v4 = vadd.f32 %v3329_v38, %v1554_v56 }
 0x380   :  { %1428 = vmatmul.f32.gmra.mxu1 %v954_v23  ;;  %v5442_v23 = vadd.f32 %v3331_v42, %v1560_v15 }
 0x381   :  { %v842_v33 = vpop.xlane.xlu0 %841 }
 0x382   :  { %v864_v51 = vsub.f32 %v5277_v48, %v842_v33  ;;  %1631 = vmax.xlane.f32.xlu0 %v5413_v28  ;;  %1639 = vmax.xlane.f32.xlu1 %v5415_v14  ;;  %v1231_v20 = vpop.xlane.xlu2 %1230 }
 0x384   :  { %v889_v43 = vmul.f32 1.442695, %v864_v51 }
 0x386   :  { %3648 = vpow2.f32 %v889_v43 }
 0x389   :  { %v1219_v53 = vpop.xlane.xlu0 %1218 }
 0x38a   :  { %3650 = vrcp.f32 %v1219_v53  ;;  %1633 = vmax.xlane.f32.xlu0 %v5424_v4 }
 0x38c   :  { %v5427_v48 = vpop.eup %3648 }
 0x38d   :  { %921 = vadd.xlane.f32.xlu2 %v5427_v48 }
 0x390   :  { %v3651_v10 = vpop.eup %3650 }
 0x391   :  { %v1221_v7 = vpop.xlane.xlu0 %1220  ;;  %v1262_v27 = vmul.f32 %v3651_v10, %v5285_v39 }
 0x392   :  { %3652 = vrcp.f32 %v1221_v7  ;;  %1635 = vmax.xlane.f32.xlu0 %v5434_v30 }
 0x393   :  { %1366 = vmatmul.f32.gmra.mxu0 %v1262_v27 }
 0x398   :  { %v3653_v12 = vpop.eup %3652 }
 0x399   :  { %v1223_v33 = vpop.xlane.xlu0 %1222  ;;  %v1263_v51 = vmul.f32 %v3653_v12, %v5290_v47 }
 0x39a   :  { %3654 = vrcp.f32 %v1223_v33  ;;  %1637 = vmax.xlane.f32.xlu0 %v5442_v23  ;;  %v5446_v39 = vpop.xlane.xlu2 %1236 }
 0x39b   :  { %3474 = vrot.lane.b32.xlu1 %v4926_v25, %s3923_s22  ;;  %1369 = vmatmul.f32.gmra.mxu0 %v1263_v51 }
 0x3a0   :  { %v3655_v36 = vpop.eup %3654 }
 0x3a1   :  { %v1225_v56 = vpop.xlane.xlu0 %1224  ;;  %v1264_v43 = vmul.f32 %v3655_v36, %v5299_v11 }
 0x3a2   :  { %3656 = vrcp.f32 %v1225_v56  ;;  %v844_v38 = vpop.xlane.xlu2 %843 }
 0x3a3   :  { %v865_v53 = vsub.f32 %v5315_v29, %v844_v38  ;;  %3504 = vrot.lane.b32.xlu1 %v4877_v37, %s3921_s18  ;;  %1372 = vmatmul.f32.gmra.mxu0 %v1264_v43  ;;  %v1229_v29 = vpop.xlane.xlu1 %1228 }
 0x3a5   :  { %v891_v47 = vmul.f32 1.442695, %v865_v53 }
 0x3a7   :  { %3658 = vpow2.f32 %v891_v47 }
 0x3a8   :  { %v3657_v34 = vpop.eup %3656  ;;  %3660 = vrcp.f32 %v1227_v18 }
 0x3a9   :  { %v1233_v5 = vpop.xlane.xlu0 %1232  ;;  %v1265_v10 = vmul.f32 %v3657_v34, %v5313_v52 }
 0x3aa   :  { %v912_v7 = vpop.xlane.xlu2 %911 }
 0x3ab   :  { %3509 = vrot.lane.b32.xlu1 %v4832_v60, %s3923_s22  ;;  %1375 = vmatmul.f32.gmra.mxu0 %v1265_v10  ;;  %3662 = vrcp.f32 %v912_v7 }
 0x3ac   :  { %3664 = vrcp.f32 %v1229_v29 }
 0x3ad   :  { %v5457_v11 = vpop.eup %3658  ;;  %3666 = vrcp.f32 %v1231_v20 }
 0x3ae   :  { %v3661_v27 = vpop.eup %3660  ;;  %3469 = vrot.lane.b32.xlu0 %v4898_v32, %s3923_s22  ;;  %923 = vadd.xlane.f32.xlu2 %v5457_v11 }
 0x3af   :  { %v1266_v15 = vmul.f32 %v3661_v27, %v5262_v49 }
 0x3b1   :  { %v1239_v18 = vpop.xlane.xlu0 %1238  ;;  %v3663_v52 = vpop.eup %3662 }
 0x3b2   :  { %v5463_v42 = vpop.xlane.xlu2 %847  ;;  %v955_v12 = vmul.f32 %v3663_v52, %v5320_v26  ;;  %v3665_v33 = vpop.eup %3664 }
 0x3b3   :  { %1378 = vmatmul.f32.gmra.mxu0 %v1266_v15  ;;  %v1267_v36 = vmul.f32 %v3665_v33, %v5274_v9  ;;  %v3667_v49 = vpop.eup %3666 }
 0x3b4   :  { %1431 = vmatmul.f32.gmra.mxu1 %v955_v12  ;;  %v1268_v53 = vmul.f32 %v3667_v49, %v5279_v63  ;;  %v1565_v12 = vpop.f32.mrf.mxu3 }
 0x3b5   :  { %v1566_v33 = vadd.f32 %v1565_v12, %v5400_v55 }
 0x3b6   :  { %3484 = vrot.lane.b32.xlu0 %v4898_v32, %s3921_s18  ;;  %v1235_v32 = vpop.xlane.xlu1 %1234 }
 0x3b9   :  { %v914_v51 = vpop.xlane.xlu0 %913 }
 0x3ba   :  { %3668 = vrcp.f32 %v914_v51  ;;  %v5469_v56 = vpop.xlane.xlu2 %849 }
 0x3bb   :  { %1381 = vmatmul.f32.gmra.mxu0 %v1267_v36  ;;  %3670 = vrcp.f32 %v1233_v5 }
 0x3c0   :  { %v3669_v43 = vpop.eup %3668 }
 0x3c1   :  { %v916_v38 = vpop.xlane.xlu0 %915  ;;  %v956_v26 = vmul.f32 %v3669_v43, %v5351_v8  ;;  %v3671_v20 = vpop.eup %3670 }
 0x3c2   :  { %3672 = vrcp.f32 %v916_v38  ;;  %v5473_v47 = vpop.xlane.xlu2 %851  ;;  %v1269_v10 = vmul.f32 %v3671_v20, %v5323_v0  ;;  %v5496_v43 = vpop.f32.mrf.mxu0 }
 0x3c3   :  { %1384 = vmatmul.f32.gmra.mxu0 %v1268_v53  ;;  %1434 = vmatmul.f32.gmra.mxu1 %v956_v26  ;;  %3674 = vrcp.f32 %v1235_v32 }
 0x3c8   :  { %v3673_v9 = vpop.eup %3672 }
 0x3c9   :  { %v918_v34 = vpop.xlane.xlu0 %917  ;;  %v957_v7 = vmul.f32 %v3673_v9, %v5364_v35  ;;  %v3675_v8 = vpop.eup %3674 }
 0x3ca   :  { %3676 = vrcp.f32 %v918_v34  ;;  %v854_v5 = vpop.xlane.xlu2 %853  ;;  %v1270_v15 = vmul.f32 %v3675_v8, %v5292_v16  ;;  %v1241_v16 = vpop.xlane.xlu1 %1240 }
 0x3cb   :  { %1387 = vmatmul.f32.gmra.mxu0 %v1269_v10  ;;  %1437 = vmatmul.f32.gmra.mxu1 %v957_v7  ;;  %v870_v63 = vsub.f32 %v5380_v6, %v854_v5  ;;  %3678 = vrcp.f32 %v5446_v39  ;;  %v3333_v39 = vld [vmem:[%s6638_s0 + $0x128] sm:$0xff]  ;;  %v5505_v20 = vpop.f32.mrf.mxu0 }
 0x3cc   :  { %v5489_v51 = vadd.f32 %v3333_v39, %v1566_v33 }
 0x3cd   :  { %v901_v29 = vmul.f32 1.442695, %v870_v63 }
 0x3cf   :  { %3680 = vpow2.f32 %v901_v29 }
 0x3d0   :  { %v3677_v27 = vpop.eup %3676  ;;  %3682 = vrcp.f32 %v1239_v18 }
 0x3d1   :  { %v958_v52 = vmul.f32 %v3677_v27, %v5378_v44  ;;  %v3679_v0 = vpop.eup %3678  ;;  %3684 = vrcp.f32 %v1241_v16 }
 0x3d2   :  { %v1271_v6 = vmul.f32 %v3679_v0, %v5301_v45  ;;  %v5493_v18 = vpop.permute.xlu1 %1935 }
 0x3d3   :  { %1390 = vmatmul.f32.gmra.mxu0 %v1270_v15  ;;  %1440 = vmatmul.f32.gmra.mxu1 %v958_v52  ;;  %v5519_v10 = vpop.f32.mrf.mxu0 }
 0x3d5   :  { %v5481_v35 = vpop.eup %3680 }
 0x3d6   :  { %933 = vadd.xlane.f32.xlu1 %v5481_v35  ;;  %v3683_v44 = vpop.eup %3682 }
 0x3d7   :  { %v1272_v36 = vmul.f32 %v3683_v44, %v5337_v3  ;;  %v3685_v45 = vpop.eup %3684  ;;  %v867_v3 = vsub.f32 %v5339_v22, %v5463_v42 }
 0x3d8   :  { %v1273_v49 = vmul.f32 %v3685_v45, %v5325_v1 }
 0x3db   :  { %1393 = vmatmul.f32.gmra.mxu0 %v1271_v6  ;;  %v5530_v63 = vpop.f32.mrf.mxu0 }
 0x3e0   :  { %1641 = vmax.xlane.f32.xlu0 %v5489_v51 }
 0x3e3   :  { %1396 = vmatmul.f32.gmra.mxu0 %v1272_v36 }
 0x3eb   :  { %1399 = vmatmul.f32.gmra.mxu0 %v1273_v49 }
 0x3ed   :  { %v920_v38 = vpop.xlane.xlu0 %919  ;;  %v846_v53 = vpop.xlane.xlu1 %845 }
 0x3ee   :  { %3686 = vrcp.f32 %v920_v38  ;;  %v866_v26 = vsub.f32 %v5393_v59, %v846_v53  ;;  %v895_v59 = vmul.f32 1.442695, %v867_v3 }
 0x3ef   :  { %3529 = vrot.lane.b32.xlu1 %v4767_v50, %s3923_s22 }
 0x3f0   :  { %v893_v32 = vmul.f32 1.442695, %v866_v26  ;;  %v6679_v26 = vld [vmem:[#allocation3_spill] sm:$0xff] }
 0x3f2   :  { %3688 = vpow2.f32 %v893_v32  ;;  %v6680_v32 = vld [vmem:[#allocation4_spill] sm:$0xff] }
 0x3f3   :  { %3360 = vmatmul.msk.f32.vlgmr.msrb.gmra.mxu0 %vm50_vm0, %v4893_v31  ;;  %3690 = vpow2.f32 %v895_v59  ;;  %v868_v31 = vsub.f32 %v5353_v41, %v5469_v56 }
 0x3f4   :  { %v3687_v1 = vpop.eup %3686  ;;  %3499 = vrot.lane.b32.xlu0 %v4857_v54, %s3923_s22 }
 0x3f5   :  { %v959_v9 = vmul.f32 %v3687_v1, %v5395_v19  ;;  %v1632_v22 = vpop.xlane.xlu0 %1631  ;;  %v897_v42 = vmul.f32 1.442695, %v868_v31  ;;  %v5551_v0 = vpop.xlane.xlu1 %1639 }
 0x3f6   :  { %v1663_v27 = vsub.f32 %v5413_v28, %v1632_v22  ;;  %v6683_v22 = vld [vmem:[#allocation9_spill] sm:$0xff] }
 0x3f7   :  { %1443 = vmatmul.f32.gmra.mxu1 %v959_v9  ;;  %3539 = vrot.lane.b32.xlu1 %v4798_v58, %s3921_s18  ;;  %v6681_v9 = vld [vmem:[#allocation6_spill] sm:$0xff] }
 0x3f8   :  { %v5510_v34 = vpop.eup %3688  ;;  %v1679_v12 = vmul.f32 1.442695, %v1663_v27 }
 0x3f9   :  { %925 = vadd.xlane.f32.xlu2 %v5510_v34  ;;  %v5521_v19 = vpop.eup %3690 }
 0x3fb   :  { %3361 = vmatmul.msk.f32.gmra.mxu0 %vm50_vm0, %v4883_v21 }
 0x3fd   :  { %v5526_v5 = vpop.xlane.xlu0 %1633 }
 0x400   :  { %v922_v7 = vpop.xlane.xlu2 %921 }
 0x401   :  { %3692 = vrcp.f32 %v922_v7  ;;  %927 = vadd.xlane.f32.xlu2 %v5521_v19  ;;  %v6684_v7 = vld [vmem:[#allocation5_spill] sm:$0xff] }
 0x402   :  { %3694 = vpow2.f32 %v897_v42  ;;  %v869_v42 = vsub.f32 %v5366_v62, %v5473_v47  ;;  %v1664_v62 = vsub.f32 %v5424_v4, %v5526_v5  ;;  %v5625_v4 = vperm.slane %v4940_v61, 3 }
 0x403   :  { %3362 = vmatmul.msk.f32.gmra.mxu0 %vm50_vm0, %v4936_v40  ;;  %v1568_v40 = vpop.f32.mrf.mxu3  ;;  %3696 = vpow2.f32 %v1679_v12 }
 0x404   :  { %v1569_v15 = vadd.f32 %v1568_v40, %v5400_v55  ;;  %v1681_v27 = vmul.f32 1.442695, %v1664_v62 }
 0x405   :  { %v5536_v8 = vpop.xlane.xlu0 %1635 }
 0x407   :  { %v3693_v41 = vpop.eup %3692 }
 0x408   :  { %v5528_v56 = vpop.eup %3694  ;;  %v960_v21 = vmul.f32 %v3693_v41, %v5427_v48 }
 0x409   :  { %929 = vadd.xlane.f32.xlu2 %v5528_v56  ;;  %v5564_v44 = vpop.eup %3696 }
 0x40a   :  { %1446 = vmatmul.f32.gmra.mxu1 %v960_v21  ;;  %v6685_v21 = vld [vmem:[#allocation8_spill] sm:$0xff] }
 0x40b   :  { %3363 = vmatmul.msk.f32.gmra.mxu0 %vm50_vm0, %v4948_v2  ;;  %v3334_v2 = vld [vmem:[%s6638_s0 + $0x130] sm:$0xff] }
 0x40d   :  { %v5544_v52 = vpop.xlane.xlu0 %1637  ;;  %v3475_v16 = vpop.permute.xlu1 %3474 }
 0x40e   :  { %v3476_v36 = vunpack.i.l.bf16 %v3475_v16  ;;  %v3477_v45 = vunpack.i.h.bf16 %v3475_v16 }
 0x410   :  { %v5538_v29 = vpop.f32.mrf.mxu0 }
 0x413   :  { %3364 = vmatmul.msk.f32.gmra.mxu0 %vm50_vm0, %v4933_v46  ;;  %v5555_v46 = vadd.f32 %v3334_v2, %v1569_v15  ;;  %v1665_v15 = vsub.f32 %v5434_v30, %v5536_v8  ;;  %v3376_v30 = vld [vmem:[%s6638_s0 + $0x180] sm:$0xff] }
 0x415   :  { %v1683_v2 = vmul.f32 1.442695, %v1665_v15 }
 0x418   :  { %v5546_v48 = vpop.f32.mrf.mxu0 }
 0x41b   :  { %3365 = vmatmul.msk.f32.gmra.mxu0 %vm50_vm0, %v4957_v24 }
 0x41e   :  { %1643 = vmax.xlane.f32.xlu0 %v5555_v46 }
 0x420   :  { %v3470_v28 = vpop.permute.xlu0 %3469  ;;  %v5558_v6 = vpop.f32.mrf.mxu0 }
 0x421   :  { %3479 = vrot.lane.b32.xlu2 %v4877_v37, %s3923_s22  ;;  %v924_v33 = vpop.xlane.xlu2 %923  ;;  %v3471_v39 = vunpack.i.l.bf16 %v3470_v28  ;;  %v3472_v24 = vunpack.i.h.bf16 %v3470_v28 }
 0x422   :  { %3698 = vrcp.f32 %v924_v33 }
 0x423   :  { %1823 = vmatpush.msrb.mxu2 %v3471_v39  ;;  %3366 = vmatmul.msk.f32.gmra.mxu0 %vm50_vm0, %v4979_v13 }
 0x425   :  { %1824 = vmatpush.msrb.mxu2 %v3472_v24  ;;  %v3377_v24 = vld [vmem:[%s6638_s0 + $0x188] sm:$0xff] }
 0x426   :  { %1711 = vadd.xlane.f32.xlu0 %v5564_v44 }
 0x427   :  { %1825 = vmatpush.msrb.mxu2 %v3476_v36 }
 0x428   :  { %v3699_v49 = vpop.eup %3698  ;;  %v3485_v38 = vpop.permute.xlu0 %3484 }
 0x429   :  { %v5567_v37 = vpop.f32.mrf.mxu0  ;;  %v3486_v53 = vunpack.i.l.bf16 %v3485_v38  ;;  %1826 = vmatpush.msrb.mxu2 %v3477_v45  ;;  %3489 = vrot.lane.b32.xlu2 %v6679_v26, %s3923_s22  ;;  %v961_v13 = vmul.f32 %v3699_v49, %v5457_v11  ;;  %v3487_v3 = vunpack.i.h.bf16 %v3485_v38  ;;  %v6682_v11 = vld [vmem:[#allocation7_spill] sm:$0xff] }
 0x42b   :  { %1449 = vmatmul.f32.gmra.mxu1 %v961_v13  ;;  %3367 = vmatmul.msk.f32.gmra.mxu0 %vm50_vm0, %v6680_v32 }
 0x42c   :  { %2259 = vmatpush.msra.mxu1 %v3486_v53 }
 0x42e   :  { %2260 = vmatpush.msra.mxu1 %v3487_v3 }
 0x431   :  { %v5574_v1 = vpop.f32.mrf.mxu0  ;;  %3494 = vrot.lane.b32.xlu2 %v4926_v25, %s3921_s18 }
 0x433   :  { %3368 = vmatmul.msk.f32.gmra.mxu0 %vm50_vm0, %v6681_v9 }
 0x439   :  { %v5580_v59 = vpop.f32.mrf.mxu0 }
 0x43a   :  { %3524 = vrot.lane.b32.xlu0 %v4857_v54, %s3921_s18  ;;  %v899_v54 = vmul.f32 1.442695, %v869_v42  ;;  %v3505_v42 = vpop.permute.xlu1 %3504 }
 0x43b   :  { %3369 = vmatmul.msk.f32.gmra.mxu0 %vm50_vm0, %v6682_v11 }
 0x43c   :  { %3700 = vpow2.f32 %v899_v54 }
 0x43d   :  { %3702 = vpow2.f32 %v1681_v27 }
 0x43e   :  { %3704 = vpow2.f32 %v1683_v2 }
 0x441   :  { %v5586_v31 = vpop.f32.mrf.mxu0 }
 0x442   :  { %3534 = vrot.lane.b32.xlu0 %v4832_v60, %s3921_s18  ;;  %v5604_v60 = vpop.eup %3700 }
 0x443   :  { %3370 = vmatmul.msk.f32.gmra.mxu0 %vm50_vm0, %v6683_v22  ;;  %v5619_v28 = vpop.eup %3702 }
 0x444   :  { %v5631_v8 = vpop.eup %3704 }
 0x449   :  { %v5592_v25 = vpop.f32.mrf.mxu0 }
 0x44b   :  { %3371 = vmatmul.msk.f32.gmra.mxu0 %vm50_vm0, %v6684_v7 }
 0x451   :  { %v5598_v41 = vpop.f32.mrf.mxu0 }
 0x453   :  { %3372 = vmatmul.msk.f32.gmra.mxu0 %vm50_vm0, %v6685_v21  ;;  %v5658_v11 = vpop.xlane.xlu0 %1641 }
 0x459   :  { %v5602_v40 = vpop.f32.mrf.mxu0 }
 0x45a   :  { %931 = vadd.xlane.f32.xlu2 %v5604_v60 }
 0x45b   :  { %3373 = vmatmul.msk.f32.gmra.mxu0 %vm50_vm0, %v5384_v17 }
 0x461   :  { %v5611_v47 = vpop.f32.mrf.mxu0 }
 0x463   :  { %3374 = vmatmul.msk.f32.gmra.mxu0 %vm50_vm0, %v5397_v57 }
 0x466   :  { %v3500_v62 = vpop.permute.xlu0 %3499 }
 0x469   :  { %v5617_v12 = vpop.f32.mrf.mxu0 }
 0x46a   :  { %6686 = vst [vmem:[#allocation3_spill] sm:$0xff] %v5617_v12 }
 0x46b   :  { %3375 = vmatmul.msk.f32.gmra.mxu0 %vm50_vm0, %v5493_v18 }
 0x46c   :  { %1713 = vadd.xlane.f32.xlu0 %v5619_v28  ;;  %v926_v17 = vpop.xlane.xlu2 %925 }
 0x46d   :  { %3706 = vrcp.f32 %v926_v17  ;;  %v3501_v17 = vunpack.i.l.bf16 %v3500_v62 }
 0x471   :  { %v1986_v57 = vpop.f32.mrf.mxu0 }
 0x472   :  { %v1987_v5 = vadd.f32 %v1986_v57, %v5625_v4  ;;  %3514 = vrot.lane.b32.xlu2 %v6679_v26, %s3921_s18  ;;  %v3378_v26 = vld [vmem:[%s6638_s0 + $0x190] sm:$0xff]  ;;  %v3510_v57 = vpop.permute.xlu1 %3509 }
 0x473   :  { %v3707_v18 = vpop.eup %3706 }
 0x474   :  { %v5635_v33 = vadd.f32 %v3376_v30, %v1987_v5  ;;  %1715 = vadd.xlane.f32.xlu0 %v5631_v8  ;;  %v928_v39 = vpop.xlane.xlu2 %927  ;;  %v962_v61 = vmul.f32 %v3707_v18, %v5510_v34  ;;  %v3502_v5 = vunpack.i.h.bf16 %v3500_v62  ;;  %v1571_v18 = vpop.f32.mrf.mxu3 }
 0x475   :  { %3708 = vrcp.f32 %v928_v39 }
 0x476   :  { %2067 = vmax.xlane.f32.xlu1 %v5635_v33  ;;  %1452 = vmatmul.f32.gmra.mxu1 %v962_v61 }
 0x479   :  { %v1989_v16 = vpop.f32.mrf.mxu0 }
 0x47a   :  { %v1990_v36 = vadd.f32 %v1989_v16, %v5625_v4  ;;  %3519 = vrot.lane.b32.xlu2 %v4798_v58, %s3923_s22  ;;  %v3511_v16 = vunpack.i.l.bf16 %v3510_v57 }
 0x47b   :  { %v3709_v45 = vpop.eup %3708 }
 0x47c   :  { %v5646_v49 = vadd.f32 %v3377_v24, %v1990_v36  ;;  %v930_v38 = vpop.xlane.xlu2 %929  ;;  %v963_v34 = vmul.f32 %v3709_v45, %v5521_v19  ;;  %v3512_v36 = vunpack.i.h.bf16 %v3510_v57  ;;  %v1666_v57 = vsub.f32 %v5442_v23, %v5544_v52  ;;  %v3381_v52 = vld [vmem:[%s6638_s0 + $0x1a8] sm:$0xff] }
 0x47d   :  { %3710 = vrcp.f32 %v930_v38  ;;  %v3506_v38 = vunpack.i.l.bf16 %v3505_v42 }
 0x47e   :  { %2069 = vmax.xlane.f32.xlu1 %v5646_v49  ;;  %1455 = vmatmul.f32.gmra.mxu1 %v963_v34  ;;  %v3507_v34 = vunpack.i.h.bf16 %v3505_v42 }
 0x481   :  { %v1992_v53 = vpop.f32.mrf.mxu0 }
 0x482   :  { %v1993_v13 = vadd.f32 %v1992_v53, %v5625_v4  ;;  %v1572_v53 = vadd.f32 %v1571_v18, %v5400_v55 }
 0x483   :  { %v3711_v32 = vpop.eup %3710 }
 0x484   :  { %v5654_v3 = vadd.f32 %v3378_v26, %v1993_v13  ;;  %v3480_v58 = vpop.permute.xlu2 %3479  ;;  %v964_v9 = vmul.f32 %v3711_v32, %v5528_v56  ;;  %v3380_v56 = vld [vmem:[%s6638_s0 + $0x1a0] sm:$0xff]  ;;  %v3335_v26 = vld [vmem:[%s6638_s0 + $0x138] sm:$0xff]  ;;  %v1574_v13 = vpop.f32.mrf.mxu3 }
 0x485   :  { %v3481_v19 = vunpack.i.l.bf16 %v3480_v58  ;;  %v3482_v22 = vunpack.i.h.bf16 %v3480_v58  ;;  %v3382_v58 = vld [vmem:[%s6638_s0 + $0x1b0] sm:$0xff]  ;;  %v1575_v42 = vadd.f32 %v1574_v13, %v5400_v55 }
 0x486   :  { %2071 = vmax.xlane.f32.xlu1 %v5654_v3  ;;  %1458 = vmatmul.f32.gmra.mxu1 %v964_v9  ;;  %v5674_v9 = vadd.f32 %v3335_v26, %v1572_v53 }
 0x487   :  { %1827 = vmatpush.msrb.mxu2 %v3481_v19 }
 0x489   :  { %v1995_v7 = vpop.f32.mrf.mxu0  ;;  %1828 = vmatpush.msrb.mxu2 %v3482_v22 }
 0x48c   :  { %v3490_v54 = vpop.permute.xlu2 %3489 }
 0x48d   :  { %v3491_v21 = vunpack.i.l.bf16 %v3490_v54  ;;  %v3492_v27 = vunpack.i.h.bf16 %v3490_v54  ;;  %v3336_v54 = vld [vmem:[%s6638_s0 + $0x140] sm:$0xff] }
 0x48f   :  { %1829 = vmatpush.msrb.mxu2 %v3491_v21  ;;  %v5685_v21 = vpop.f32.mrf.mxu3 }
 0x491   :  { %v1998_v15 = vpop.f32.mrf.mxu0  ;;  %1830 = vmatpush.msrb.mxu2 %v3492_v27  ;;  %v3383_v27 = vld [vmem:[%s6638_s0 + $0x1b8] sm:$0xff]  ;;  %v5723_v13 = vpop.xlane.xlu0 %1643 }
 0x492   :  { %v1999_v2 = vadd.f32 %v1998_v15, %v5625_v4  ;;  %v5690_v15 = vadd.f32 %v3336_v54, %v1575_v42  ;;  %v3338_v54 = vld [vmem:[%s6638_s0 + $0x150] sm:$0xff] }
 0x493   :  { %1831 = vmatpush.msrb.mxu2 %v3501_v17  ;;  %v1996_v17 = vadd.f32 %v1995_v7, %v5625_v4  ;;  %v1685_v7 = vmul.f32 1.442695, %v1666_v57 }
 0x494   :  { %v5664_v30 = vadd.f32 %v3380_v56, %v1999_v2  ;;  %v3495_v39 = vpop.permute.xlu2 %3494 }
 0x495   :  { %v3496_v61 = vunpack.i.l.bf16 %v3495_v39  ;;  %1832 = vmatpush.msrb.mxu2 %v3502_v5  ;;  %v3497_v24 = vunpack.i.h.bf16 %v3495_v39  ;;  %v3379_v5 = vld [vmem:[%s6638_s0 + $0x198] sm:$0xff]  ;;  %v3384_v39 = vld [vmem:[%s6638_s0 + $0x1c0] sm:$0xff]  ;;  %3712 = vpow2.f32 %v1685_v7  ;;  %v934_v7 = vpop.xlane.xlu1 %933 }
 0x496   :  { %2075 = vmax.xlane.f32.xlu1 %v5664_v30 }
 0x497   :  { %1833 = vmatpush.msrb.mxu2 %v3511_v16  ;;  %2261 = vmatpush.msra.mxu1 %v3496_v61  ;;  %v5706_v61 = vadd.f32 %v3379_v5, %v1996_v17 }
 0x499   :  { %v2001_v45 = vpop.f32.mrf.mxu0  ;;  %1834 = vmatpush.msrb.mxu2 %v3512_v36  ;;  %2262 = vmatpush.msra.mxu1 %v3497_v24  ;;  %v1580_v24 = vpop.f32.mrf.mxu3 }
 0x49a   :  { %v2002_v23 = vadd.f32 %v2001_v45, %v5625_v4  ;;  %v1581_v42 = vadd.f32 %v1580_v24, %v5400_v55 }
 0x49b   :  { %2263 = vmatpush.msra.mxu1 %v3506_v38  ;;  %v5728_v45 = vpop.eup %3712 }
 0x49c   :  { %v5720_v53 = vadd.f32 %v3381_v52, %v2002_v23  ;;  %v5744_v57 = vadd.f32 %v3338_v54, %v1581_v42 }
 0x49d   :  { %2264 = vmatpush.msra.mxu1 %v3507_v34  ;;  %v3385_v34 = vld [vmem:[%s6638_s0 + $0x1c8] sm:$0xff] }
 0x4a1   :  { %v2004_v32 = vpop.f32.mrf.mxu0 }
 0x4a2   :  { %v2005_v19 = vadd.f32 %v2004_v32, %v5625_v4 }
 0x4a3   :  { %1645 = vmax.xlane.f32.xlu2 %v5674_v9 }
 0x4a4   :  { %v5677_v22 = vadd.f32 %v3382_v58, %v2005_v19  ;;  %v5730_v58 = vpop.f32.mrf.mxu3  ;;  %v1667_v19 = vsub.f32 %v5415_v14, %v5551_v0  ;;  %v1712_v14 = vpop.xlane.xlu0 %1711 }
 0x4a6   :  { %2079 = vmax.xlane.f32.xlu1 %v5677_v22  ;;  %v1687_v17 = vmul.f32 1.442695, %v1667_v19 }
 0x4a8   :  { %3714 = vpow2.f32 %v1687_v17 }
 0x4a9   :  { %v2007_v62 = vpop.f32.mrf.mxu0 }
 0x4aa   :  { %v2008_v56 = vadd.f32 %v2007_v62, %v5625_v4 }
 0x4ab   :  { %1647 = vmax.xlane.f32.xlu2 %v5690_v15 }
 0x4ac   :  { %v5693_v2 = vadd.f32 %v3383_v27, %v2008_v56  ;;  %v3386_v27 = vld [vmem:[%s6638_s0 + $0x1d0] sm:$0xff]  ;;  %v3525_v23 = vpop.permute.xlu0 %3524 }
 0x4ad   :  { %v3527_v17 = vunpack.i.h.bf16 %v3525_v23 }
 0x4ae   :  { %2081 = vmax.xlane.f32.xlu1 %v5693_v2  ;;  %v5756_v24 = vpop.eup %3714 }
 0x4b1   :  { %v2010_v18 = vpop.f32.mrf.mxu0 }
 0x4b2   :  { %v2011_v16 = vadd.f32 %v2010_v18, %v5625_v4  ;;  %v1586_v18 = vpop.f32.mrf.mxu3 }
 0x4b3   :  { %2073 = vmax.xlane.f32.xlu2 %v5706_v61  ;;  %v1587_v0 = vadd.f32 %v1586_v18, %v5400_v55 }
 0x4b4   :  { %v5709_v36 = vadd.f32 %v3384_v39, %v2011_v16  ;;  %v3340_v39 = vld [vmem:[%s6638_s0 + $0x160] sm:$0xff]  ;;  %v3535_v54 = vpop.permute.xlu0 %3534 }
 0x4b5   :  { %v5754_v16 = vadd.f32 %v3340_v39, %v1587_v0  ;;  %v3536_v39 = vunpack.i.l.bf16 %v3535_v54 }
 0x4b6   :  { %2083 = vmax.xlane.f32.xlu0 %v5709_v36 }
 0x4b9   :  { %v2013_v38 = vpop.f32.mrf.mxu0 }
 0x4ba   :  { %v2014_v26 = vadd.f32 %v2013_v38, %v5625_v4 }
 0x4bb   :  { %2077 = vmax.xlane.f32.xlu2 %v5720_v53 }
 0x4bc   :  { %v5725_v32 = vadd.f32 %v3385_v34, %v2014_v26  ;;  %v3530_v34 = vpop.permute.xlu1 %3529 }
 0x4be   :  { %1717 = vadd.xlane.f32.xlu0 %v5728_v45  ;;  %2085 = vmax.xlane.f32.xlu1 %v5725_v32 }
 0x4c1   :  { %v2016_v62 = vpop.f32.mrf.mxu0 }
 0x4c2   :  { %v2017_v56 = vadd.f32 %v2016_v62, %v5625_v4 }
 0x4c4   :  { %v5746_v5 = vadd.f32 %v3386_v27, %v2017_v56  ;;  %v3526_v56 = vunpack.i.l.bf16 %v3525_v23 }
 0x4c6   :  { %1651 = vmax.xlane.f32.xlu0 %v5744_v57  ;;  %2087 = vmax.xlane.f32.xlu1 %v5746_v5 }
 0x4cd   :  { %v932_v52 = vpop.xlane.xlu2 %931 }
 0x4ce   :  { %1719 = vadd.xlane.f32.xlu0 %v5756_v24  ;;  %1655 = vmax.xlane.f32.xlu1 %v5754_v16  ;;  %3716 = vrcp.f32 %v932_v52  ;;  %v3540_v52 = vpop.permute.xlu1 %3539 }
 0x4cf   :  { %3718 = vrcp.f32 %v934_v7  ;;  %v3542_v23 = vunpack.i.h.bf16 %v3540_v52 }
 0x4d0   :  { %3720 = vrcp.f32 %v1712_v14  ;;  %v3531_v14 = vunpack.i.l.bf16 %v3530_v34 }
 0x4d4   :  { %v3717_v38 = vpop.eup %3716 }
 0x4d5   :  { %v3515_v26 = vpop.permute.xlu2 %3514  ;;  %v965_v19 = vmul.f32 %v3717_v38, %v5604_v60  ;;  %v3719_v27 = vpop.eup %3718  ;;  %v3537_v60 = vunpack.i.h.bf16 %v3535_v54 }
 0x4d6   :  { %v3516_v42 = vunpack.i.l.bf16 %v3515_v26  ;;  %v3517_v62 = vunpack.i.h.bf16 %v3515_v26  ;;  %v966_v0 = vmul.f32 %v3719_v27, %v5481_v35  ;;  %v3721_v26 = vpop.eup %3720  ;;  %v3532_v35 = vunpack.i.h.bf16 %v3530_v34 }
 0x4d7   :  { %1461 = vmatmul.f32.gmra.mxu1 %v965_v19  ;;  %v3541_v19 = vunpack.i.l.bf16 %v3540_v52 }
 0x4d8   :  { %2265 = vmatpush.msra.mxu1 %v3516_v42  ;;  %v1759_v42 = vmul.f32 %v3721_v26, %v5564_v44 }
 0x4da   :  { %2266 = vmatpush.msra.mxu1 %v3517_v62 }
 0x4dc   :  { %2267 = vmatpush.msra.mxu1 %v3526_v56 }
 0x4dd   :  { %v3520_v18 = vpop.permute.xlu2 %3519 }
 0x4de   :  { %2268 = vmatpush.msra.mxu1 %v3527_v17  ;;  %v3521_v7 = vunpack.i.l.bf16 %v3520_v18  ;;  %v3522_v38 = vunpack.i.h.bf16 %v3520_v18 }
 0x4df   :  { %v1714_v12 = vpop.xlane.xlu0 %1713  ;;  %1464 = vmatmul.f32.gmra.mxu1 %v966_v0 }
 0x4e0   :  { %1835 = vmatpush.msrb.mxu2 %v3521_v7  ;;  %2269 = vmatpush.msra.mxu1 %v3536_v39  ;;  %3722 = vrcp.f32 %v1714_v12 }
 0x4e2   :  { %1836 = vmatpush.msrb.mxu2 %v3522_v38  ;;  %2270 = vmatpush.msra.mxu1 %v3537_v60  ;;  %v1584_v38 = vadd.f32 %v5730_v58, %v5400_v55 }
 0x4e4   :  { %1837 = vmatpush.msrb.mxu2 %v3531_v14  ;;  %2271 = vmatpush.msra.mxu1 %v3541_v19 }
 0x4e6   :  { %1838 = vmatpush.msrb.mxu2 %v3532_v35  ;;  %2272 = vmatpush.msra.mxu1 %v3542_v23  ;;  %v3723_v56 = vpop.eup %3722 }
 0x4e7   :  { %1839 = vmatmul.f32.vlgmr.msrb.gmra.mxu2 %v1759_v42  ;;  %v1716_v54 = vpop.xlane.xlu0 %1715  ;;  %v1760_v18 = vmul.f32 %v3723_v56, %v5619_v28  ;;  %v5795_v42 = vpop.f32.mrf.mxu3 }
 0x4e8   :  { %3724 = vrcp.f32 %v1716_v54 }
 0x4e9   :  { %v2068_v62 = vpop.xlane.xlu1 %2067 }
 0x4ea   :  { %v2099_v27 = vsub.f32 %v5635_v33, %v2068_v62 }
 0x4ec   :  { %v2115_v17 = vmul.f32 1.442695, %v2099_v27 }
 0x4ee   :  { %3726 = vpow2.f32 %v2115_v17  ;;  %v3725_v34 = vpop.eup %3724 }
 0x4ef   :  { %1842 = vmatmul.f32.gmra.mxu2 %v1760_v18  ;;  %v1761_v7 = vmul.f32 %v3725_v34, %v5631_v8  ;;  %v3339_v8 = vld [vmem:[%s6638_s0 + $0x158] sm:$0xff]  ;;  %v1592_v17 = vpop.f32.mrf.mxu3 }
 0x4f0   :  { %v5781_v19 = vadd.f32 %v3339_v8, %v1584_v38  ;;  %v1593_v18 = vadd.f32 %v1592_v17, %v5400_v55 }
 0x4f1   :  { %v2070_v12 = vpop.xlane.xlu1 %2069 }
 0x4f2   :  { %v2100_v0 = vsub.f32 %v5646_v49, %v2070_v12  ;;  %v1669_v49 = vsub.f32 %v5555_v46, %v5723_v13  ;;  %v2019_v46 = vpop.f32.mrf.mxu0 }
 0x4f4   :  { %v5766_v39 = vpop.eup %3726  ;;  %v2117_v44 = vmul.f32 1.442695, %v2100_v0  ;;  %v1691_v26 = vmul.f32 1.442695, %v1669_v49  ;;  %v3342_v0 = vld [vmem:[%s6638_s0 + $0x170] sm:$0xff] }
 0x4f5   :  { %2147 = vadd.xlane.f32.xlu2 %v5766_v39 }
 0x4f6   :  { %3728 = vpow2.f32 %v2117_v44 }
 0x4f7   :  { %1845 = vmatmul.f32.gmra.mxu2 %v1761_v7  ;;  %v5814_v7 = vadd.f32 %v3342_v0, %v1593_v18 }
 0x4f9   :  { %v2072_v33 = vpop.xlane.xlu1 %2071 }
 0x4fa   :  { %v2101_v52 = vsub.f32 %v5654_v3, %v2072_v33  ;;  %v2022_v62 = vpop.f32.mrf.mxu0 }
 0x4fb   :  { %v2023_v54 = vadd.f32 %v2022_v62, %v5625_v4 }
 0x4fc   :  { %v5771_v60 = vpop.eup %3728  ;;  %v2119_v28 = vmul.f32 1.442695, %v2101_v52 }
 0x4fd   :  { %2149 = vadd.xlane.f32.xlu0 %v5771_v60 }
 0x4fe   :  { %3730 = vpow2.f32 %v2119_v28 }
 0x4ff   :  { %3732 = vpow2.f32 %v1691_v26 }
 0x504   :  { %v5783_v3 = vpop.eup %3730 }
 0x505   :  { %1653 = vmax.xlane.f32.xlu0 %v5781_v19  ;;  %2151 = vadd.xlane.f32.xlu1 %v5783_v3  ;;  %v5788_v23 = vpop.eup %3732 }
 0x509   :  { %v2076_v14 = vpop.xlane.xlu1 %2075 }
 0x50a   :  { %v2103_v13 = vsub.f32 %v5664_v30, %v2076_v14  ;;  %v3388_v30 = vld [vmem:[%s6638_s0 + $0x1e0] sm:$0xff]  ;;  %v1578_v14 = vadd.f32 %v5685_v21, %v5400_v55 }
 0x50c   :  { %v2123_v58 = vmul.f32 1.442695, %v2103_v13 }
 0x50d   :  { %3544 = vrot.lane.b32.xlu2 %v4767_v50, %s3921_s18  ;;  %1723 = vadd.xlane.f32.xlu0 %v5788_v23  ;;  %v5804_v50 = vadd.f32 %v3388_v30, %v2023_v54 }
 0x50e   :  { %3734 = vpow2.f32 %v2123_v58 }
 0x514   :  { %v5793_v35 = vpop.eup %3734 }
 0x515   :  { %2155 = vadd.xlane.f32.xlu0 %v5793_v35 }
 0x516   :  { %v1646_v27 = vpop.xlane.xlu2 %1645 }
 0x517   :  { %v1670_v26 = vsub.f32 %v5674_v9, %v1646_v27 }
 0x519   :  { %v5802_v56 = vpop.xlane.xlu1 %2079  ;;  %v1693_v13 = vmul.f32 1.442695, %v1670_v26 }
 0x51a   :  { %v2105_v26 = vsub.f32 %v5677_v22, %v5802_v56 }
 0x51d   :  { %2091 = vmax.xlane.f32.xlu0 %v5804_v50 }
 0x51e   :  { %v5808_v12 = vpop.xlane.xlu2 %1647 }
 0x521   :  { %v2082_v34 = vpop.xlane.xlu1 %2081 }
 0x522   :  { %v2106_v44 = vsub.f32 %v5693_v2, %v2082_v34  ;;  %v1668_v2 = vsub.f32 %v5489_v51, %v5658_v11  ;;  %v3387_v34 = vld [vmem:[%s6638_s0 + $0x1d8] sm:$0xff] }
 0x524   :  { %v2129_v33 = vmul.f32 1.442695, %v2106_v44  ;;  %v1689_v9 = vmul.f32 1.442695, %v1668_v2 }
 0x525   :  { %1659 = vmax.xlane.f32.xlu0 %v5814_v7 }
 0x526   :  { %3736 = vpow2.f32 %v2129_v33  ;;  %v2074_v52 = vpop.xlane.xlu2 %2073 }
 0x527   :  { %v2102_v28 = vsub.f32 %v5706_v61, %v2074_v52  ;;  %v3337_v61 = vld [vmem:[%s6638_s0 + $0x148] sm:$0xff] }
 0x528   :  { %v5832_v27 = vadd.f32 %v3337_v61, %v1578_v14  ;;  %v1590_v14 = vadd.f32 %v5795_v42, %v5400_v55  ;;  %v3343_v42 = vld [vmem:[%s6638_s0 + $0x178] sm:$0xff] }
 0x529   :  { %v2084_v49 = vpop.xlane.xlu0 %2083  ;;  %v2121_v38 = vmul.f32 1.442695, %v2102_v28 }
 0x52a   :  { %v2107_v22 = vsub.f32 %v5709_v36, %v2084_v49 }
 0x52b   :  { %3738 = vpow2.f32 %v2121_v38 }
 0x52c   :  { %v5818_v8 = vpop.eup %3736 }
 0x52d   :  { %2161 = vadd.xlane.f32.xlu0 %v5818_v8 }
 0x52e   :  { %v2078_v58 = vpop.xlane.xlu2 %2077 }
 0x52f   :  { %v2104_v51 = vsub.f32 %v5720_v53, %v2078_v58  ;;  %v2020_v53 = vadd.f32 %v2019_v46, %v5625_v4  ;;  %v3389_v46 = vld [vmem:[%s6638_s0 + $0x1e8] sm:$0xff] }
 0x531   :  { %v1718_v62 = vpop.xlane.xlu0 %1717  ;;  %v5829_v54 = vpop.eup %3738  ;;  %v2125_v21 = vmul.f32 1.442695, %v2104_v51  ;;  %v5852_v52 = vadd.f32 %v3387_v34, %v2020_v53 }
 0x532   :  { %3740 = vrcp.f32 %v1718_v62  ;;  %2153 = vadd.xlane.f32.xlu1 %v5829_v54  ;;  %v2086_v38 = vpop.xlane.xlu1 %2085  ;;  %v1595_v62 = vpop.f32.mrf.mxu3 }
 0x533   :  { %3742 = vpow2.f32 %v1693_v13  ;;  %v3341_v13 = vld [vmem:[%s6638_s0 + $0x168] sm:$0xff]  ;;  %v1596_v56 = vadd.f32 %v1595_v62, %v5400_v55  ;;  %v2108_v55 = vsub.f32 %v5725_v32, %v2086_v38  ;;  %v3390_v38 = vld [vmem:[%s6638_s0 + $0x1f0] sm:$0xff] }
 0x534   :  { %3744 = vpow2.f32 %v1689_v9  ;;  %v2127_v9 = vmul.f32 1.442695, %v2105_v26  ;;  %v5870_v51 = vadd.f32 %v3341_v13, %v1590_v14  ;;  %v5907_v13 = vpop.f32.mrf.mxu1 }
 0x535   :  { %3746 = vpow2.f32 %v2125_v21  ;;  %v2131_v21 = vmul.f32 1.442695, %v2107_v22  ;;  %v2133_v49 = vmul.f32 1.442695, %v2108_v55 }
 0x536   :  { %1649 = vmax.xlane.f32.xlu2 %v5832_v27 }
 0x538   :  { %v3741_v11 = vpop.eup %3740 }
 0x539   :  { %v5836_v30 = vpop.xlane.xlu0 %1651  ;;  %v1762_v17 = vmul.f32 %v3741_v11, %v5728_v45  ;;  %v5839_v18 = vpop.eup %3742 }
 0x53a   :  { %1725 = vadd.xlane.f32.xlu1 %v5839_v18  ;;  %v5842_v0 = vpop.eup %3744  ;;  %v2025_v45 = vpop.f32.mrf.mxu0 }
 0x53b   :  { %1848 = vmatmul.f32.gmra.mxu2 %v1762_v17  ;;  %v5849_v33 = vpop.eup %3746  ;;  %v2026_v28 = vadd.f32 %v2025_v45, %v5625_v4  ;;  %v5880_v11 = vpop.xlane.xlu1 %2087  ;;  %v5882_v17 = vadd.f32 %v3343_v42, %v1596_v56 }
 0x53d   :  { %v5866_v61 = vadd.f32 %v3389_v46, %v2026_v28 }
 0x53e   :  { %1721 = vadd.xlane.f32.xlu2 %v5842_v0 }
 0x541   :  { %v1720_v44 = vpop.xlane.xlu0 %1719 }
 0x542   :  { %3748 = vrcp.f32 %v1720_v44  ;;  %2157 = vadd.xlane.f32.xlu1 %v5849_v33 }
 0x543   :  { %3750 = vpow2.f32 %v2127_v9  ;;  %v1656_v34 = vpop.xlane.xlu1 %1655 }
 0x544   :  { %3752 = vpow2.f32 %v2131_v21 }
 0x546   :  { %2089 = vmax.xlane.f32.xlu2 %v5852_v52 }
 0x548   :  { %v3749_v2 = vpop.eup %3748 }
 0x549   :  { %v1763_v58 = vmul.f32 %v3749_v2, %v5756_v24  ;;  %v1671_v24 = vsub.f32 %v5690_v15, %v5808_v12  ;;  %v5886_v36 = vpop.eup %3750  ;;  %v2028_v15 = vpop.f32.mrf.mxu0  ;;  %v1675_v12 = vsub.f32 %v5754_v16, %v1656_v34 }
 0x54a   :  { %2093 = vmax.xlane.f32.xlu1 %v5866_v61  ;;  %v5889_v44 = vpop.eup %3752  ;;  %v2029_v32 = vadd.f32 %v2028_v15, %v5625_v4 }
 0x54b   :  { %1851 = vmatmul.f32.gmra.mxu2 %v1763_v58  ;;  %v1695_v53 = vmul.f32 1.442695, %v1671_v24  ;;  %v1703_v28 = vmul.f32 1.442695, %v1675_v12  ;;  %v3391_v58 = vld [vmem:[%s6638_s0 + $0x1f8] sm:$0xff] }
 0x54c   :  { %v5903_v26 = vadd.f32 %v3390_v38, %v2029_v32 }
 0x54d   :  { %3754 = vpow2.f32 %v1695_v53 }
 0x54e   :  { %1657 = vmax.xlane.f32.xlu2 %v5870_v51  ;;  %3756 = vpow2.f32 %v2133_v49 }
 0x54f   :  { %3758 = vpow2.f32 %v1703_v28 }
 0x551   :  { %v2031_v2 = vpop.f32.mrf.mxu0 }
 0x552   :  { %1661 = vmax.xlane.f32.xlu1 %v5882_v17  ;;  %v2032_v16 = vadd.f32 %v2031_v2, %v5625_v4  ;;  %v5918_v4 = vpop.f32.mrf.mxu1 }
 0x553   :  { %v5893_v45 = vpop.eup %3754 }
 0x554   :  { %v5900_v46 = vpop.eup %3756  ;;  %v5915_v9 = vadd.f32 %v3391_v58, %v2032_v16 }
 0x555   :  { %v5912_v62 = vpop.eup %3758 }
 0x556   :  { %2159 = vadd.xlane.f32.xlu2 %v5886_v36 }
 0x55a   :  { %2163 = vadd.xlane.f32.xlu1 %v5889_v44  ;;  %v5921_v15 = vpop.f32.mrf.mxu1 }
 0x55e   :  { %1727 = vadd.xlane.f32.xlu2 %v5893_v45 }
 0x562   :  { %2165 = vadd.xlane.f32.xlu1 %v5900_v46  ;;  %v5925_v16 = vpop.f32.mrf.mxu1 }
 0x566   :  { %2095 = vmax.xlane.f32.xlu2 %v5903_v26 }
 0x568   :  { %v2148_v14 = vpop.xlane.xlu2 %2147 }
 0x569   :  { %3760 = vrcp.f32 %v2148_v14 }
 0x56a   :  { %1735 = vadd.xlane.f32.xlu1 %v5912_v62 }
 0x56e   :  { %2097 = vmax.xlane.f32.xlu2 %v5915_v9 }
 0x56f   :  { %v3761_v42 = vpop.eup %3760 }
 0x570   :  { %v2150_v22 = vpop.xlane.xlu0 %2149  ;;  %v3545_v56 = vpop.permute.xlu2 %3544  ;;  %v2195_v53 = vmul.f32 %v3761_v42, %v5766_v39 }
 0x571   :  { %v3546_v24 = vunpack.i.l.bf16 %v3545_v56  ;;  %3762 = vrcp.f32 %v2150_v22  ;;  %v3547_v21 = vunpack.i.h.bf16 %v3545_v56  ;;  %v5931_v22 = vpop.f32.mrf.mxu1 }
 0x573   :  { %2273 = vmatpush.msra.mxu1 %v3546_v24 }
 0x575   :  { %2274 = vmatpush.msra.mxu1 %v3547_v21 }
 0x576   :  { %2275 = vmatmul.f32.vlgmr.msra.gmra.mxu1 %v2195_v53 }
 0x577   :  { %v3763_v34 = vpop.eup %3762 }
 0x578   :  { %v1654_v55 = vpop.xlane.xlu0 %1653  ;;  %v2152_v49 = vpop.xlane.xlu1 %2151  ;;  %v2196_v28 = vmul.f32 %v3763_v34, %v5771_v60 }
 0x579   :  { %v1674_v12 = vsub.f32 %v5781_v19, %v1654_v55  ;;  %3764 = vrcp.f32 %v2152_v49  ;;  %v5933_v56 = vpop.f32.mrf.mxu1 }
 0x57b   :  { %v1701_v32 = vmul.f32 1.442695, %v1674_v12 }
 0x57d   :  { %3766 = vpow2.f32 %v1701_v32 }
 0x57e   :  { %2278 = vmatmul.f32.gmra.mxu1 %v2196_v28 }
 0x57f   :  { %v3765_v2 = vpop.eup %3764 }
 0x580   :  { %v1724_v38 = vpop.xlane.xlu0 %1723  ;;  %v2197_v14 = vmul.f32 %v3765_v2, %v5783_v3 }
 0x581   :  { %v5938_v21 = vpop.f32.mrf.mxu1 }
 0x583   :  { %v5927_v39 = vpop.eup %3766 }
 0x584   :  { %1733 = vadd.xlane.f32.xlu2 %v5927_v39 }
 0x586   :  { %2281 = vmatmul.f32.gmra.mxu1 %v2197_v14 }
 0x588   :  { %v2156_v58 = vpop.xlane.xlu0 %2155 }
 0x589   :  { %v5941_v53 = vpop.f32.mrf.mxu1 }
 0x590   :  { %v2092_v19 = vpop.xlane.xlu0 %2091 }
 0x591   :  { %v2111_v60 = vsub.f32 %v5804_v50, %v2092_v19  ;;  %v5944_v32 = vpop.f32.mrf.mxu1  ;;  %v1673_v50 = vsub.f32 %v5744_v57, %v5836_v30 }
 0x593   :  { %v2139_v42 = vmul.f32 1.442695, %v2111_v60  ;;  %v1699_v19 = vmul.f32 1.442695, %v1673_v50 }
 0x595   :  { %3768 = vpow2.f32 %v2139_v42 }
 0x59b   :  { %v5936_v24 = vpop.eup %3768 }
 0x59c   :  { %2171 = vadd.xlane.f32.xlu1 %v5936_v24 }
 0x5a5   :  { %v2154_v3 = vpop.xlane.xlu1 %2153 }
 0x5a6   :  { %3770 = vrcp.f32 %v2154_v3  ;;  %v2109_v3 = vsub.f32 %v5746_v5, %v5880_v11 }
 0x5a7   :  { %3772 = vrcp.f32 %v2156_v58 }
 0x5a8   :  { %v2135_v58 = vmul.f32 1.442695, %v2109_v3 }
 0x5a9   :  { %v1650_v55 = vpop.xlane.xlu2 %1649 }
 0x5aa   :  { %v1672_v49 = vsub.f32 %v5832_v27, %v1650_v55  ;;  %v5951_v27 = vpop.f32.mrf.mxu1 }
 0x5ac   :  { %v1697_v34 = vmul.f32 1.442695, %v1672_v49  ;;  %v3771_v12 = vpop.eup %3770 }
 0x5ad   :  { %v1726_v28 = vpop.xlane.xlu1 %1725  ;;  %v2198_v2 = vmul.f32 %v3771_v12, %v5829_v54  ;;  %v3773_v60 = vpop.eup %3772 }
 0x5ae   :  { %3774 = vpow2.f32 %v1697_v34  ;;  %v2199_v30 = vmul.f32 %v3773_v60, %v5793_v35  ;;  %v1660_v34 = vpop.xlane.xlu0 %1659 }
 0x5af   :  { %2284 = vmatmul.f32.gmra.mxu1 %v2198_v2  ;;  %v1677_v35 = vsub.f32 %v5814_v7, %v1660_v34 }
 0x5b1   :  { %v1722_v14 = vpop.xlane.xlu2 %1721 }
 0x5b2   :  { %3776 = vrcp.f32 %v1722_v14  ;;  %v5961_v2 = vpop.f32.mrf.mxu1 }
 0x5b3   :  { %3778 = vpow2.f32 %v1699_v19 }
 0x5b4   :  { %v5949_v42 = vpop.eup %3774 }
 0x5b5   :  { %1729 = vadd.xlane.f32.xlu0 %v5949_v42  ;;  %v2158_v57 = vpop.xlane.xlu1 %2157 }
 0x5b6   :  { %3780 = vrcp.f32 %v2158_v57 }
 0x5b7   :  { %3782 = vrcp.f32 %v1724_v38  ;;  %2287 = vmatmul.f32.gmra.mxu1 %v2199_v30 }
 0x5b8   :  { %v3777_v54 = vpop.eup %3776  ;;  %3784 = vpow2.f32 %v2135_v58 }
 0x5b9   :  { %v2090_v55 = vpop.xlane.xlu2 %2089  ;;  %v1764_v49 = vmul.f32 %v3777_v54, %v5842_v0  ;;  %v5959_v50 = vpop.eup %3778 }
 0x5ba   :  { %v2110_v12 = vsub.f32 %v5852_v52, %v2090_v55  ;;  %v1707_v52 = vmul.f32 1.442695, %v1677_v35  ;;  %v5972_v54 = vpop.f32.mrf.mxu1 }
 0x5bb   :  { %1854 = vmatmul.f32.gmra.mxu2 %v1764_v49 }
 0x5bc   :  { %v2137_v5 = vmul.f32 1.442695, %v2110_v12  ;;  %v3781_v11 = vpop.eup %3780 }
 0x5bd   :  { %1731 = vadd.xlane.f32.xlu0 %v5959_v50  ;;  %v3783_v38 = vpop.eup %3782  ;;  %v2094_v14 = vpop.xlane.xlu1 %2093  ;;  %v2200_v0 = vmul.f32 %v3781_v11, %v5849_v33 }
 0x5be   :  { %3786 = vpow2.f32 %v2137_v5  ;;  %v1765_v60 = vmul.f32 %v3783_v38, %v5788_v23  ;;  %v5968_v57 = vpop.eup %3784  ;;  %v2162_v11 = vpop.xlane.xlu0 %2161 }
 0x5bf   :  { %3788 = vrcp.f32 %v1726_v28  ;;  %2290 = vmatmul.f32.gmra.mxu1 %v2200_v0  ;;  %v2112_v28 = vsub.f32 %v5866_v61, %v2094_v14 }
 0x5c0   :  { %3790 = vpow2.f32 %v1707_v52 }
 0x5c1   :  { %v1658_v19 = vpop.xlane.xlu2 %1657  ;;  %v2141_v34 = vmul.f32 1.442695, %v2112_v28 }
 0x5c2   :  { %v1676_v3 = vsub.f32 %v5870_v51, %v1658_v19  ;;  %v5985_v61 = vpop.f32.mrf.mxu1 }
 0x5c3   :  { %1857 = vmatmul.f32.gmra.mxu2 %v1765_v60 }
 0x5c4   :  { %v5970_v30 = vpop.eup %3786  ;;  %v1705_v7 = vmul.f32 1.442695, %v1676_v3 }
 0x5c5   :  { %2167 = vadd.xlane.f32.xlu0 %v5968_v57  ;;  %2169 = vadd.xlane.f32.xlu2 %v5970_v30  ;;  %v3789_v33 = vpop.eup %3788  ;;  %v1662_v23 = vpop.xlane.xlu1 %1661 }
 0x5c6   :  { %3792 = vpow2.f32 %v1705_v7  ;;  %v1678_v51 = vsub.f32 %v5882_v17, %v1662_v23  ;;  %v1766_v49 = vmul.f32 %v3789_v33, %v5839_v18  ;;  %v5979_v12 = vpop.eup %3790 }
 0x5c8   :  { %v1709_v58 = vmul.f32 1.442695, %v1678_v51 }
 0x5c9   :  { %v2160_v55 = vpop.xlane.xlu2 %2159 }
 0x5ca   :  { %3794 = vrcp.f32 %v2160_v55  ;;  %v5994_v60 = vpop.f32.mrf.mxu1 }
 0x5cb   :  { %3796 = vpow2.f32 %v1709_v58  ;;  %1860 = vmatmul.f32.gmra.mxu2 %v1766_v49 }
 0x5cc   :  { %v5981_v5 = vpop.eup %3792  ;;  %3798 = vpow2.f32 %v2141_v34 }
 0x5cd   :  { %1739 = vadd.xlane.f32.xlu2 %v5979_v12  ;;  %1737 = vadd.xlane.f32.xlu0 %v5981_v5  ;;  %3800 = vrcp.f32 %v2162_v11  ;;  %v2164_v14 = vpop.xlane.xlu1 %2163 }
 0x5d0   :  { %v3795_v17 = vpop.eup %3794 }
 0x5d1   :  { %v5987_v35 = vpop.eup %3796  ;;  %v1728_v18 = vpop.xlane.xlu2 %1727  ;;  %v2201_v38 = vmul.f32 %v3795_v17, %v5886_v36 }
 0x5d2   :  { %3802 = vrcp.f32 %v1728_v18  ;;  %1741 = vadd.xlane.f32.xlu1 %v5987_v35  ;;  %v5991_v0 = vpop.eup %3798  ;;  %v5999_v58 = vpop.f32.mrf.mxu1 }
 0x5d3   :  { %2293 = vmatmul.f32.gmra.mxu1 %v2201_v38  ;;  %v3801_v52 = vpop.eup %3800  ;;  %3804 = vrcp.f32 %v2164_v14  ;;  %v1840_v18 = vpop.f32.mrf.mxu2 }
 0x5d4   :  { %v2202_v33 = vmul.f32 %v3801_v52, %v5818_v8 }
 0x5d5   :  { %2173 = vadd.xlane.f32.xlu0 %v5991_v0  ;;  %v2166_v23 = vpop.xlane.xlu1 %2165 }
 0x5d8   :  { %v3803_v19 = vpop.eup %3802 }
 0x5d9   :  { %v2096_v3 = vpop.xlane.xlu2 %2095  ;;  %v1767_v7 = vmul.f32 %v3803_v19, %v5893_v45  ;;  %v3805_v51 = vpop.eup %3804  ;;  %v6017_v19 = vld [vmem:[%s6637_s2] sm:$0xff] }
 0x5da   :  { %v2113_v36 = vsub.f32 %v5903_v26, %v2096_v3  ;;  %v2203_v49 = vmul.f32 %v3805_v51, %v5889_v44  ;;  %v6007_v17 = vpop.f32.mrf.mxu1  ;;  %v1421_v44 = vadd.f32 %v5907_v13, %v5496_v43  ;;  %v1424_v43 = vadd.f32 %v5918_v4, %v5505_v20  ;;  %v3904_v20 = vld [vmem:[%s6635_s1 + $0x8] sm:$0xff] }
 0x5db   :  { %1863 = vmatmul.f32.gmra.mxu2 %v1767_v7  ;;  %2296 = vmatmul.f32.gmra.mxu1 %v2202_v33  ;;  %v1843_v3 = vpop.f32.mrf.mxu2  ;;  %v3903_v7 = vld [vmem:[%s6635_s1] sm:$0xff] }
 0x5dc   :  { %v2143_v28 = vmul.f32 1.442695, %v2113_v36  ;;  %v1889_v36 = vadd.f32 %v1843_v3, %v1424_v43 }
 0x5de   :  { %3806 = vpow2.f32 %v2143_v28 }
 0x5df   :  { %3808 = vrcp.f32 %v2166_v23 }
 0x5e1   :  { %v2098_v55 = vpop.xlane.xlu2 %2097 }
 0x5e2   :  { %v2114_v34 = vsub.f32 %v5915_v9, %v2098_v55  ;;  %v1888_v9 = vadd.f32 %v1840_v18, %v1421_v44 }
 0x5e3   :  { %2299 = vmatmul.f32.gmra.mxu1 %v2203_v49 }
 0x5e4   :  { %v6003_v45 = vpop.eup %3806  ;;  %v2145_v8 = vmul.f32 1.442695, %v2114_v34  ;;  %v1846_v34 = vpop.f32.mrf.mxu2 }
 0x5e5   :  { %2175 = vadd.xlane.f32.xlu2 %v6003_v45  ;;  %v3809_v26 = vpop.eup %3808 }
 0x5e6   :  { %3810 = vpow2.f32 %v2145_v8  ;;  %v2204_v11 = vmul.f32 %v3809_v26, %v5900_v46  ;;  %v6020_v46 = vperm.slane %v6017_v19, 4  ;;  %v1427_v8 = vadd.f32 %v5921_v15, %v5519_v10  ;;  %v3905_v10 = vld [vmem:[%s6635_s1 + $0x10] sm:$0xff] }
 0x5eb   :  { %2302 = vmatmul.f32.gmra.mxu1 %v2204_v11  ;;  %v1890_v11 = vadd.f32 %v1846_v34, %v1427_v8 }
 0x5ec   :  { %v6009_v38 = vpop.eup %3810 }
 0x5ed   :  { %2177 = vadd.xlane.f32.xlu0 %v6009_v38 }
 0x5f3   :  { %v2276_v14 = vpop.f32.mrf.mxu1 }
 0x5f4   :  { %v2324_v52 = vadd.f32 %v2276_v14, %v1888_v9 }
 0x5f6   :  { %v2340_v33 = vadd.f32 %v3903_v7, %v2324_v52 }
 0x5f8   :  { %v6028_v13 = vadd.f32 %v6020_v46, %v2340_v33 }
 0x5fa   :  { %v2373_v28 = vsel %vm50_vm0, %v6028_v13, 0.0  ;;  %v2437_v23 = vmul.f32 %v6028_v13, %v6028_v13 }
 0x5fb   :  { %v2279_v51 = vpop.f32.mrf.mxu1  ;;  %2374 = vadd.xlane.f32.xlu1 %v2373_v28  ;;  %v1849_v28 = vpop.f32.mrf.mxu2 }
 0x5fc   :  { %v2325_v55 = vadd.f32 %v2279_v51, %v1889_v36  ;;  %v2453_v49 = vsel %vm50_vm0, %v2437_v23, 0.0  ;;  %v1430_v23 = vadd.f32 %v5925_v16, %v5530_v63  ;;  %v1734_v16 = vpop.xlane.xlu2 %1733 }
 0x5fd   :  { %2454 = vadd.xlane.f32.xlu2 %v2453_v49 }
 0x5fe   :  { %v2341_v4 = vadd.f32 %v3904_v20, %v2325_v55  ;;  %v1891_v51 = vadd.f32 %v1849_v28, %v1430_v23  ;;  %v1736_v28 = vpop.xlane.xlu1 %1735 }
 0x600   :  { %v6041_v26 = vadd.f32 %v6020_v46, %v2341_v4  ;;  %v3906_v4 = vld [vmem:[%s6635_s1 + $0x18] sm:$0xff] }
 0x602   :  { %v2376_v18 = vsel %vm50_vm0, %v6041_v26, 0.0  ;;  %v2438_v44 = vmul.f32 %v6041_v26, %v6041_v26 }
 0x603   :  { %v2282_v9 = vpop.f32.mrf.mxu1  ;;  %2377 = vadd.xlane.f32.xlu0 %v2376_v18  ;;  %v1852_v18 = vpop.f32.mrf.mxu2 }
 0x604   :  { %v2326_v14 = vadd.f32 %v2282_v9, %v1890_v11  ;;  %v2456_v52 = vsel %vm50_vm0, %v2438_v44, 0.0  ;;  %v1433_v44 = vadd.f32 %v5931_v22, %v5538_v29  ;;  %v3907_v29 = vld [vmem:[%s6635_s1 + $0x20] sm:$0xff] }
 0x605   :  { %2457 = vadd.xlane.f32.xlu1 %v2456_v52 }
 0x606   :  { %v2342_v15 = vadd.f32 %v3905_v10, %v2326_v14  ;;  %v1892_v63 = vadd.f32 %v1852_v18, %v1433_v44 }
 0x608   :  { %v6052_v3 = vadd.f32 %v6020_v46, %v2342_v15 }
 0x60a   :  { %v2379_v7 = vsel %vm50_vm0, %v6052_v3, 0.0  ;;  %v2439_v33 = vmul.f32 %v6052_v3, %v6052_v3 }
 0x60b   :  { %2380 = vadd.xlane.f32.xlu2 %v2379_v7 }
 0x60c   :  { %v2459_v43 = vsel %vm50_vm0, %v2439_v33, 0.0 }
 0x60d   :  { %2460 = vadd.xlane.f32.xlu0 %v2459_v43 }
 0x628   :  { %v1730_v36 = vpop.xlane.xlu0 %1729 }
 0x629   :  { %3812 = vrcp.f32 %v1730_v36 }
 0x62c   :  { %v2285_v55 = vpop.f32.mrf.mxu1 }
 0x62d   :  { %v2327_v49 = vadd.f32 %v2285_v55, %v1891_v51 }
 0x62f   :  { %v3813_v20 = vpop.eup %3812  ;;  %v2343_v34 = vadd.f32 %v3906_v4, %v2327_v49 }
 0x630   :  { %v1732_v8 = vpop.xlane.xlu0 %1731  ;;  %v1768_v11 = vmul.f32 %v3813_v20, %v5949_v42  ;;  %v1436_v20 = vadd.f32 %v5933_v56, %v5546_v48  ;;  %v3908_v48 = vld [vmem:[%s6635_s1 + $0x28] sm:$0xff] }
 0x631   :  { %3814 = vrcp.f32 %v1732_v8  ;;  %v6068_v9 = vadd.f32 %v6020_v46, %v2343_v34 }
 0x632   :  { %1866 = vmatmul.f32.gmra.mxu2 %v1768_v11  ;;  %3816 = vrcp.f32 %v1734_v16 }
 0x633   :  { %v2382_v14 = vsel %vm50_vm0, %v6068_v9, 0.0  ;;  %v2440_v52 = vmul.f32 %v6068_v9, %v6068_v9 }
 0x634   :  { %v2288_v10 = vpop.f32.mrf.mxu1  ;;  %2383 = vadd.xlane.f32.xlu1 %v2382_v14  ;;  %v2172_v14 = vpop.xlane.xlu1 %2171 }
 0x635   :  { %v2328_v42 = vadd.f32 %v2288_v10, %v1892_v63  ;;  %v2462_v15 = vsel %vm50_vm0, %v2440_v52, 0.0 }
 0x636   :  { %2463 = vadd.xlane.f32.xlu2 %v2462_v15 }
 0x637   :  { %v3815_v7 = vpop.eup %3814  ;;  %v2344_v22 = vadd.f32 %v3907_v29, %v2328_v42 }
 0x638   :  { %v2168_v33 = vpop.xlane.xlu0 %2167  ;;  %v1769_v43 = vmul.f32 %v3815_v7, %v5959_v50  ;;  %v2170_v23 = vpop.xlane.xlu2 %2169 }
 0x639   :  { %3818 = vrcp.f32 %v2168_v33  ;;  %v6080_v36 = vadd.f32 %v6020_v46, %v2344_v22  ;;  %v3817_v49 = vpop.eup %3816 }
 0x63a   :  { %1869 = vmatmul.f32.gmra.mxu2 %v1769_v43  ;;  %3820 = vrcp.f32 %v1736_v28  ;;  %v1770_v18 = vmul.f32 %v3817_v49, %v5927_v39 }
 0x63b   :  { %v2385_v51 = vsel %vm50_vm0, %v6080_v36, 0.0  ;;  %v2441_v55 = vmul.f32 %v6080_v36, %v6080_v36  ;;  %3822 = vrcp.f32 %v2170_v23 }
 0x63c   :  { %2386 = vadd.xlane.f32.xlu0 %v2385_v51  ;;  %v2291_v11 = vpop.f32.mrf.mxu1  ;;  %3824 = vrcp.f32 %v2172_v14  ;;  %v1439_v51 = vadd.f32 %v5938_v21, %v5558_v6  ;;  %v1442_v21 = vadd.f32 %v5941_v53, %v5567_v37 }
 0x63d   :  { %v2465_v4 = vsel %vm50_vm0, %v2441_v55, 0.0 }
 0x63e   :  { %v1855_v50 = vpop.f32.mrf.mxu2  ;;  %2466 = vadd.xlane.f32.xlu1 %v2465_v4 }
 0x63f   :  { %v3819_v34 = vpop.eup %3818  ;;  %v1893_v8 = vadd.f32 %v1855_v50, %v1436_v20  ;;  %v3909_v50 = vld [vmem:[%s6635_s1 + $0x30] sm:$0xff] }
 0x640   :  { %v2205_v44 = vmul.f32 %v3819_v34, %v5968_v57  ;;  %v1738_v16 = vpop.xlane.xlu0 %1737  ;;  %v3821_v52 = vpop.eup %3820 }
 0x641   :  { %v2329_v63 = vadd.f32 %v2291_v11, %v1893_v8  ;;  %v3823_v10 = vpop.eup %3822  ;;  %3826 = vrcp.f32 %v1738_v16  ;;  %v1771_v15 = vmul.f32 %v3821_v52, %v5912_v62  ;;  %v1740_v33 = vpop.xlane.xlu2 %1739 }
 0x642   :  { %1872 = vmatmul.f32.gmra.mxu2 %v1770_v18  ;;  %2305 = vmatmul.f32.gmra.mxu1 %v2205_v44  ;;  %v2206_v7 = vmul.f32 %v3823_v10, %v5970_v30  ;;  %v3825_v43 = vpop.eup %3824  ;;  %3828 = vrcp.f32 %v1740_v33 }
 0x643   :  { %v2345_v56 = vadd.f32 %v3908_v48, %v2329_v63  ;;  %v2207_v30 = vmul.f32 %v3825_v43, %v5936_v24 }
 0x645   :  { %v6095_v42 = vadd.f32 %v6020_v46, %v2345_v56  ;;  %v1742_v8 = vpop.xlane.xlu1 %1741  ;;  %v3910_v56 = vld [vmem:[%s6635_s1 + $0x38] sm:$0xff] }
 0x646   :  { %v1858_v22 = vpop.f32.mrf.mxu2 }
 0x647   :  { %v2388_v39 = vsel %vm50_vm0, %v6095_v42, 0.0  ;;  %v2442_v57 = vmul.f32 %v6095_v42, %v6095_v42  ;;  %v3827_v23 = vpop.eup %3826  ;;  %v1894_v55 = vadd.f32 %v1858_v22, %v1439_v51 }
 0x648   :  { %2389 = vadd.xlane.f32.xlu2 %v2388_v39  ;;  %v2174_v28 = vpop.xlane.xlu0 %2173  ;;  %v1772_v62 = vmul.f32 %v3827_v23, %v5981_v5  ;;  %v3829_v34 = vpop.eup %3828  ;;  %v1445_v39 = vadd.f32 %v5944_v32, %v5574_v1  ;;  %v3911_v23 = vld [vmem:[%s6635_s1 + $0x40] sm:$0xff] }
 0x649   :  { %v2468_v29 = vsel %vm50_vm0, %v2442_v57, 0.0  ;;  %3830 = vrcp.f32 %v2174_v28  ;;  %v1773_v14 = vmul.f32 %v3829_v34, %v5979_v12  ;;  %v40_v34 = vld [vmem:[%s6636_s3 + $0x10] sm:$0xff] }
 0x64a   :  { %1875 = vmatmul.f32.gmra.mxu2 %v1771_v15  ;;  %2308 = vmatmul.f32.gmra.mxu1 %v2206_v7  ;;  %3832 = vrcp.f32 %v1742_v8  ;;  %v6687_v8 = vld [vmem:[#allocation2_spill] sm:$0xff] }
 0x64b   :  { %2469 = vadd.xlane.f32.xlu0 %v2468_v29 }
 0x64e   :  { %v1861_v11 = vpop.f32.mrf.mxu2 }
 0x64f   :  { %v3831_v6 = vpop.eup %3830  ;;  %v1895_v24 = vadd.f32 %v1861_v11, %v1442_v21 }
 0x650   :  { %v2294_v49 = vpop.f32.mrf.mxu1  ;;  %v2208_v48 = vmul.f32 %v3831_v6, %v5991_v0  ;;  %v3833_v10 = vpop.eup %3832 }
 0x651   :  { %v2330_v20 = vadd.f32 %v2294_v49, %v1894_v55  ;;  %v1774_v43 = vmul.f32 %v3833_v10, %v5987_v35 }
 0x652   :  { %1878 = vmatmul.f32.gmra.mxu2 %v1772_v62  ;;  %2311 = vmatmul.f32.gmra.mxu1 %v2207_v30  ;;  %v49_v30 = vld [vmem:[%s6636_s3 + $0x58] sm:$0xff] }
 0x653   :  { %v2346_v4 = vadd.f32 %v3909_v50, %v2330_v20  ;;  %2852 = vmatpush.msra.mxu3 %v49_v30  ;;  %v46_v50 = vld [vmem:[%s6636_s3 + $0x40] sm:$0xff] }
 0x655   :  { %v6114_v18 = vadd.f32 %v6020_v46, %v2346_v4  ;;  %2853 = vmatpush.msra.mxu3 %v46_v50  ;;  %v43_v4 = vld [vmem:[%s6636_s3 + $0x28] sm:$0xff] }
 0x657   :  { %v2391_v5 = vsel %vm50_vm0, %v6114_v18, 0.0  ;;  %v2443_v44 = vmul.f32 %v6114_v18, %v6114_v18  ;;  %2854 = vmatpush.msra.mxu3 %v43_v4 }
 0x658   :  { %v2176_v63 = vpop.xlane.xlu2 %2175  ;;  %v2297_v16 = vpop.f32.mrf.mxu1  ;;  %2392 = vadd.xlane.f32.xlu1 %v2391_v5 }
 0x659   :  { %3834 = vrcp.f32 %v2176_v63  ;;  %v2331_v37 = vadd.f32 %v2297_v16, %v1895_v24  ;;  %v2471_v53 = vsel %vm50_vm0, %v2443_v44, 0.0  ;;  %2855 = vmatpush.msra.mxu3 %v40_v34 }
 0x65a   :  { %1881 = vmatmul.f32.gmra.mxu2 %v1773_v14  ;;  %2314 = vmatmul.f32.gmra.mxu1 %v2208_v48 }
 0x65b   :  { %v2347_v52 = vadd.f32 %v3910_v56, %v2331_v37  ;;  %2472 = vadd.xlane.f32.xlu2 %v2471_v53 }
 0x65d   :  { %v6129_v12 = vadd.f32 %v6020_v46, %v2347_v52 }
 0x65e   :  { %v1864_v0 = vpop.f32.mrf.mxu2 }
 0x65f   :  { %v3835_v57 = vpop.eup %3834  ;;  %v1896_v15 = vadd.f32 %v1864_v0, %v1445_v39  ;;  %v2394_v7 = vsel %vm50_vm0, %v6129_v12, 0.0  ;;  %v2444_v29 = vmul.f32 %v6129_v12, %v6129_v12 }
 0x660   :  { %v2178_v22 = vpop.xlane.xlu0 %2177  ;;  %v2300_v33 = vpop.f32.mrf.mxu1  ;;  %2395 = vadd.xlane.f32.xlu0 %v2394_v7  ;;  %v2209_v28 = vmul.f32 %v3835_v57, %v6003_v45 }
 0x661   :  { %3836 = vrcp.f32 %v2178_v22  ;;  %v2332_v1 = vadd.f32 %v2300_v33, %v1896_v15  ;;  %v2474_v32 = vsel %vm50_vm0, %v2444_v29, 0.0 }
 0x662   :  { %1884 = vmatmul.f32.gmra.mxu2 %v1774_v43  ;;  %2317 = vmatmul.f32.gmra.mxu1 %v2209_v28 }
 0x663   :  { %v2348_v51 = vadd.f32 %v3911_v23, %v2332_v1  ;;  %2475 = vadd.xlane.f32.xlu1 %v2474_v32 }
 0x665   :  { %v6142_v55 = vadd.f32 %v6020_v46, %v2348_v51 }
 0x667   :  { %v3837_v49 = vpop.eup %3836  ;;  %v2397_v35 = vsel %vm50_vm0, %v6142_v55, 0.0  ;;  %v2445_v45 = vmul.f32 %v6142_v55, %v6142_v55 }
 0x668   :  { %2398 = vadd.xlane.f32.xlu2 %v2397_v35  ;;  %v2210_v62 = vmul.f32 %v3837_v49, %v6009_v38  ;;  %v6170_v49 = vperm.slane %v6017_v19, 2 }
 0x669   :  { %v2477_v20 = vsel %vm50_vm0, %v2445_v45, 0.0 }
 0x66a   :  { %2320 = vmatmul.f32.gmra.mxu1 %v2210_v62  ;;  %2478 = vadd.xlane.f32.xlu0 %v2477_v20  ;;  %v6173_v62 = vperm.slane %v6017_v19, 3 }
 0x66e   :  { %v2375_v38 = vpop.xlane.xlu1 %2374 }
 0x66f   :  { %v2421_v11 = vmul.f32 %v2375_v38, %v6687_v8 }
 0x670   :  { %v2455_v6 = vpop.xlane.xlu2 %2454 }
 0x671   :  { %v2517_v21 = vmul.f32 %v2421_v11, %v2421_v11  ;;  %v2501_v24 = vmul.f32 %v2455_v6, %v6687_v8  ;;  %v2549_v51 = vsub.f32 %v6028_v13, %v2421_v11 }
 0x673   :  { %v2533_v5 = vsub.f32 %v2501_v24, %v2517_v21 }
 0x675   :  { %v2565_v44 = vadd.f32 1e-05, %v2533_v5 }
 0x676   :  { %v2378_v63 = vpop.xlane.xlu0 %2377 }
 0x677   :  { %3838 = vrsqrt.f32 %v2565_v44  ;;  %v2422_v16 = vmul.f32 %v2378_v63, %v6687_v8  ;;  %vm2587_vm6 = vweird.f32 %v2565_v44 }
 0x678   :  { %v2458_v14 = vpop.xlane.xlu1 %2457 }
 0x679   :  { %v2518_v48 = vmul.f32 %v2422_v16, %v2422_v16  ;;  %v2502_v37 = vmul.f32 %v2458_v14, %v6687_v8  ;;  %v2550_v21 = vsub.f32 %v6041_v26, %v2422_v16 }
 0x67b   :  { %v2534_v53 = vsub.f32 %v2502_v37, %v2518_v48 }
 0x67d   :  { %v3839_v56 = vpop.eup %3838  ;;  %v2566_v52 = vadd.f32 1e-05, %v2534_v53 }
 0x67e   :  { %v2582_v10 = vmul.f32 %v3839_v56, %v2565_v44  ;;  %v2381_v39 = vpop.xlane.xlu2 %2380  ;;  %vm2588_vm5 = vweird.f32 %v3839_v56 }
 0x67f   :  { %3840 = vrsqrt.f32 %v2566_v52  ;;  %v2423_v0 = vmul.f32 %v2381_v39, %v6687_v8  ;;  %vm2589_vm7 = vmor %vm2587_vm6, %vm2588_vm5  ;;  %vm2597_vm9 = vweird.f32 %v2566_v52 }
 0x680   :  { %v2583_v57 = vmul.f32 %v3839_v56, %v2582_v10  ;;  %v2461_v15 = vpop.xlane.xlu0 %2460 }
 0x681   :  { %v2519_v7 = vmul.f32 %v2423_v0, %v2423_v0  ;;  %v2503_v29 = vmul.f32 %v2461_v15, %v6687_v8  ;;  %v2551_v53 = vsub.f32 %v6052_v3, %v2423_v0 }
 0x682   :  { %v2584_v22 = vmul.f32 0.5, %v2583_v57 }
 0x683   :  { %v2535_v33 = vsub.f32 %v2503_v29, %v2519_v7 }
 0x684   :  { %v2585_v43 = vsub.f32 1.5, %v2584_v22 }
 0x685   :  { %v3841_v28 = vpop.eup %3840  ;;  %v2567_v1 = vadd.f32 1e-05, %v2535_v33 }
 0x686   :  { %v2586_v32 = vmul.f32 %v3839_v56, %v2585_v43  ;;  %v2592_v23 = vmul.f32 %v3841_v28, %v2566_v52  ;;  %vm2598_vm8 = vweird.f32 %v3841_v28 }
 0x687   :  { %3842 = vrsqrt.f32 %v2567_v1  ;;  %vm2599_vm10 = vmor %vm2597_vm9, %vm2598_vm8  ;;  %vm2607_vm12 = vweird.f32 %v2567_v1 }
 0x688   :  { %v2590_v35 = vsel %vm2589_vm7, %v3839_v56, %v2586_v32  ;;  %v2593_v45 = vmul.f32 %v3841_v28, %v2592_v23  ;;  %v1448_v23 = vadd.f32 %v5951_v27, %v5580_v59 }
 0x689   :  { %v2741_v30 = vmul.f32 %v2590_v35, %v2549_v51 }
 0x68a   :  { %v2594_v20 = vmul.f32 0.5, %v2593_v45 }
 0x68b   :  { %v2758_v50 = vmul.f32 %v6170_v49, %v2741_v30 }
 0x68c   :  { %v2595_v4 = vsub.f32 1.5, %v2594_v20  ;;  %v2303_v20 = vpop.f32.mrf.mxu1 }
 0x68d   :  { %v3843_v38 = vpop.eup %3842  ;;  %v2775_v34 = vadd.f32 %v6173_v62, %v2758_v50 }
 0x68e   :  { %v2596_v11 = vmul.f32 %v3841_v28, %v2595_v4  ;;  %v2602_v6 = vmul.f32 %v3843_v38, %v2567_v1  ;;  %vm2608_vm11 = vweird.f32 %v3843_v38 }
 0x68f   :  { %3392 = vmatmul.msk.f32.vlgmr.msra.gmra.mxu3 %vm50_vm0, %v2775_v34  ;;  %vm2609_vm13 = vmor %vm2607_vm12, %vm2608_vm11 }
 0x690   :  { %v2600_v24 = vsel %vm2599_vm10, %v3841_v28, %v2596_v11  ;;  %v2603_v19 = vmul.f32 %v3843_v38, %v2602_v6  ;;  %v3912_v11 = vld [vmem:[%s6635_s1 + $0x48] sm:$0xff] }
 0x691   :  { %v2742_v5 = vmul.f32 %v2600_v24, %v2550_v21  ;;  %v1451_v24 = vadd.f32 %v5961_v2, %v5586_v31 }
 0x692   :  { %v2604_v44 = vmul.f32 0.5, %v2603_v19 }
 0x693   :  { %v2759_v63 = vmul.f32 %v6170_v49, %v2742_v5 }
 0x694   :  { %v2605_v14 = vsub.f32 1.5, %v2604_v44 }
 0x695   :  { %v2776_v48 = vadd.f32 %v6173_v62, %v2759_v63 }
 0x696   :  { %v2606_v37 = vmul.f32 %v3843_v38, %v2605_v14 }
 0x697   :  { %3393 = vmatmul.msk.f32.gmra.mxu3 %vm50_vm0, %v2776_v48 }
 0x698   :  { %v2610_v16 = vsel %vm2609_vm13, %v3843_v38, %v2606_v37 }
 0x699   :  { %v2743_v56 = vmul.f32 %v2610_v16, %v2551_v53 }
 0x69b   :  { %v2760_v52 = vmul.f32 %v6170_v49, %v2743_v56 }
 0x69d   :  { %v2777_v10 = vadd.f32 %v6173_v62, %v2760_v52 }
 0x69f   :  { %3394 = vmatmul.msk.f32.gmra.mxu3 %vm50_vm0, %v2777_v10 }
 0x6a7   :  { %v2384_v39 = vpop.xlane.xlu1 %2383 }
 0x6a8   :  { %v2424_v57 = vmul.f32 %v2384_v39, %v6687_v8 }
 0x6a9   :  { %v2464_v15 = vpop.xlane.xlu2 %2463 }
 0x6aa   :  { %v2520_v7 = vmul.f32 %v2424_v57, %v2424_v57  ;;  %v2504_v29 = vmul.f32 %v2464_v15, %v6687_v8  ;;  %v2552_v39 = vsub.f32 %v6068_v9, %v2424_v57 }
 0x6ac   :  { %v2536_v22 = vsub.f32 %v2504_v29, %v2520_v7 }
 0x6ae   :  { %v2568_v0 = vadd.f32 1e-05, %v2536_v22 }
 0x6af   :  { %v2387_v33 = vpop.xlane.xlu0 %2386 }
 0x6b0   :  { %3844 = vrsqrt.f32 %v2568_v0  ;;  %v6189_v43 = vmul.f32 %v2387_v33, %v6687_v8  ;;  %vm2617_vm15 = vweird.f32 %v2568_v0  ;;  %v3913_v33 = vld [vmem:[%s6635_s1 + $0x50] sm:$0xff] }
 0x6b1   :  { %v2467_v28 = vpop.xlane.xlu1 %2466 }
 0x6b2   :  { %v2521_v1 = vmul.f32 %v6189_v43, %v6189_v43  ;;  %v2505_v32 = vmul.f32 %v2467_v28, %v6687_v8 }
 0x6b4   :  { %v2537_v51 = vsub.f32 %v2505_v32, %v2521_v1  ;;  %v1454_v32 = vadd.f32 %v5972_v54, %v5592_v25 }
 0x6b5   :  { %v1867_v35 = vpop.f32.mrf.mxu2 }
 0x6b6   :  { %v1897_v45 = vadd.f32 %v1867_v35, %v1448_v23  ;;  %v3845_v30 = vpop.eup %3844  ;;  %v2569_v50 = vadd.f32 1e-05, %v2537_v51 }
 0x6b7   :  { %v2612_v4 = vmul.f32 %v3845_v30, %v2568_v0  ;;  %vm2618_vm14 = vweird.f32 %v3845_v30 }
 0x6b8   :  { %v2333_v38 = vadd.f32 %v2303_v20, %v1897_v45  ;;  %3846 = vrsqrt.f32 %v2569_v50  ;;  %vm2619_vm1 = vmor %vm2617_vm15, %vm2618_vm14  ;;  %vm2627_vm3 = vweird.f32 %v2569_v50 }
 0x6b9   :  { %v2613_v34 = vmul.f32 %v3845_v30, %v2612_v4 }
 0x6ba   :  { %v2349_v6 = vadd.f32 %v3912_v11, %v2333_v38 }
 0x6bb   :  { %v2390_v21 = vpop.xlane.xlu2 %2389  ;;  %v2614_v59 = vmul.f32 0.5, %v2613_v34 }
 0x6bc   :  { %v6202_v27 = vadd.f32 %v6020_v46, %v2349_v6  ;;  %v6205_v19 = vmul.f32 %v2390_v21, %v6687_v8  ;;  %v2553_v6 = vsub.f32 %v6080_v36, %v6189_v43 }
 0x6bd   :  { %v1870_v5 = vpop.f32.mrf.mxu2  ;;  %v2615_v44 = vsub.f32 1.5, %v2614_v59 }
 0x6be   :  { %v2522_v63 = vmul.f32 %v6205_v19, %v6205_v19  ;;  %v2470_v14 = vpop.xlane.xlu0 %2469  ;;  %v1898_v48 = vadd.f32 %v1870_v5, %v1451_v24  ;;  %v3847_v37 = vpop.eup %3846  ;;  %v2400_v31 = vsel %vm50_vm0, %v6202_v27, 0.0  ;;  %v2446_v2 = vmul.f32 %v6202_v27, %v6202_v27  ;;  %v3914_v24 = vld [vmem:[%s6635_s1 + $0x58] sm:$0xff] }
 0x6bf   :  { %v2506_v53 = vmul.f32 %v2470_v14, %v6687_v8  ;;  %v2306_v16 = vpop.f32.mrf.mxu1  ;;  %v2616_v56 = vmul.f32 %v3845_v30, %v2615_v44  ;;  %v2622_v52 = vmul.f32 %v3847_v37, %v2569_v50  ;;  %2401 = vadd.xlane.f32.xlu1 %v2400_v31  ;;  %vm2628_vm2 = vweird.f32 %v3847_v37 }
 0x6c0   :  { %v2334_v10 = vadd.f32 %v2306_v16, %v1898_v48  ;;  %v2480_v7 = vsel %vm50_vm0, %v2446_v2, 0.0  ;;  %vm2629_vm4 = vmor %vm2627_vm3, %vm2628_vm2 }
 0x6c1   :  { %v2538_v15 = vsub.f32 %v2506_v53, %v2522_v63  ;;  %v2620_v29 = vsel %vm2619_vm1, %v3845_v30, %v2616_v56  ;;  %v2623_v22 = vmul.f32 %v3847_v37, %v2622_v52  ;;  %2481 = vadd.xlane.f32.xlu2 %v2480_v7  ;;  %v1457_v63 = vadd.f32 %v5985_v61, %v5598_v41 }
 0x6c2   :  { %v2350_v28 = vadd.f32 %v3913_v33, %v2334_v10  ;;  %v2744_v0 = vmul.f32 %v2620_v29, %v2552_v39 }
 0x6c3   :  { %v6220_v1 = vadd.f32 1e-05, %v2538_v15  ;;  %v2624_v57 = vmul.f32 0.5, %v2623_v22 }
 0x6c4   :  { %v6225_v23 = vadd.f32 %v6020_v46, %v2350_v28  ;;  %v2761_v35 = vmul.f32 %v6170_v49, %v2744_v0  ;;  %v3915_v28 = vld [vmem:[%s6635_s1 + $0x60] sm:$0xff] }
 0x6c5   :  { %3848 = vrsqrt.f32 %v6220_v1  ;;  %v1873_v51 = vpop.f32.mrf.mxu2  ;;  %v2625_v45 = vsub.f32 1.5, %v2624_v57  ;;  %vm2637_vm6 = vweird.f32 %v6220_v1 }
 0x6c6   :  { %v1899_v30 = vadd.f32 %v1873_v51, %v1454_v32  ;;  %v2403_v20 = vsel %vm50_vm0, %v6225_v23, 0.0  ;;  %v2447_v4 = vmul.f32 %v6225_v23, %v6225_v23  ;;  %v2778_v25 = vadd.f32 %v6173_v62, %v2761_v35 }
 0x6c7   :  { %v2309_v38 = vpop.f32.mrf.mxu1  ;;  %2404 = vadd.xlane.f32.xlu0 %v2403_v20  ;;  %v2626_v54 = vmul.f32 %v3847_v37, %v2625_v45  ;;  %v1460_v32 = vadd.f32 %v5994_v60, %v5602_v40  ;;  %v2554_v20 = vsub.f32 %v6095_v42, %v6205_v19 }
 0x6c8   :  { %v2335_v34 = vadd.f32 %v2309_v38, %v1899_v30  ;;  %v2483_v11 = vsel %vm50_vm0, %v2447_v4, 0.0  ;;  %3395 = vmatmul.msk.f32.gmra.mxu3 %vm50_vm0, %v2778_v25 }
 0x6c9   :  { %2484 = vadd.xlane.f32.xlu1 %v2483_v11  ;;  %v2630_v21 = vsel %vm2629_vm4, %v3847_v37, %v2626_v54 }
 0x6ca   :  { %v2351_v59 = vadd.f32 %v3914_v24, %v2335_v34  ;;  %v2745_v50 = vmul.f32 %v2630_v21, %v2553_v6 }
 0x6cb   :  { %v3849_v5 = vpop.eup %3848  ;;  %v2393_v44 = vpop.xlane.xlu1 %2392 }
 0x6cc   :  { %v2632_v14 = vmul.f32 %v3849_v5, %v6220_v1  ;;  %v6246_v43 = vadd.f32 %v6020_v46, %v2351_v59  ;;  %v6249_v48 = vmul.f32 %v2393_v44, %v6687_v8  ;;  %v2762_v53 = vmul.f32 %v6170_v49, %v2745_v50 }
 0x6cd   :  { %v1876_v37 = vpop.f32.mrf.mxu2  ;;  %vm2638_vm5 = vweird.f32 %v3849_v5 }
 0x6ce   :  { %v2633_v16 = vmul.f32 %v3849_v5, %v2632_v14  ;;  %v2523_v31 = vmul.f32 %v6249_v48, %v6249_v48  ;;  %v2473_v2 = vpop.xlane.xlu2 %2472  ;;  %v1900_v56 = vadd.f32 %v1876_v37, %v1457_v63  ;;  %v2406_v61 = vsel %vm50_vm0, %v6246_v43, 0.0  ;;  %vm2639_vm7 = vmor %vm2637_vm6, %vm2638_vm5 }
 0x6cf   :  { %v2507_v52 = vmul.f32 %v2473_v2, %v6687_v8  ;;  %v2312_v41 = vpop.f32.mrf.mxu1  ;;  %v2779_v10 = vadd.f32 %v6173_v62, %v2762_v53  ;;  %v2448_v39 = vmul.f32 %v6246_v43, %v6246_v43  ;;  %2407 = vadd.xlane.f32.xlu2 %v2406_v61  ;;  %v1463_v2 = vadd.f32 %v5999_v58, %v5611_v47  ;;  %v3063_v61 = vld [vmem:[%s6639_s4 + $0x70] sm:$0xff] }
 0x6d0   :  { %v2634_v15 = vmul.f32 0.5, %v2633_v16  ;;  %v2336_v7 = vadd.f32 %v2312_v41, %v1900_v56  ;;  %v3064_v41 = vld [vmem:[%s6639_s4 + $0x78] sm:$0xff] }
 0x6d1   :  { %v2539_v29 = vsub.f32 %v2507_v52, %v2523_v31  ;;  %3396 = vmatmul.msk.f32.gmra.mxu3 %vm50_vm0, %v2779_v10  ;;  %v2486_v22 = vsel %vm50_vm0, %v2448_v39, 0.0  ;;  %3066 = vmatpush.msrb.mxu1 %v3064_v41 }
 0x6d2   :  { %v2635_v33 = vsub.f32 1.5, %v2634_v15  ;;  %v2352_v0 = vadd.f32 %v3915_v28, %v2336_v7  ;;  %2487 = vadd.xlane.f32.xlu0 %v2486_v22  ;;  %v3062_v22 = vld [vmem:[%s6639_s4 + $0x68] sm:$0xff]  ;;  %3408 = vmatpush.msra.mxu2 %v3064_v41 }
 0x6d3   :  { %v6267_v57 = vadd.f32 1e-05, %v2539_v29  ;;  %v2396_v51 = vpop.xlane.xlu0 %2395  ;;  %3067 = vmatpush.msrb.mxu1 %v3063_v61 }
 0x6d4   :  { %v2636_v35 = vmul.f32 %v3849_v5, %v2635_v33  ;;  %v6271_v45 = vadd.f32 %v6020_v46, %v2352_v0  ;;  %v6274_v30 = vmul.f32 %v2396_v51, %v6687_v8  ;;  %v3061_v51 = vld [vmem:[%s6639_s4 + $0x60] sm:$0xff]  ;;  %3409 = vmatpush.msra.mxu2 %v3063_v61 }
 0x6d5   :  { %3850 = vrsqrt.f32 %v6267_v57  ;;  %v1879_v4 = vpop.f32.mrf.mxu2  ;;  %3068 = vmatpush.msrb.mxu1 %v3062_v22  ;;  %vm2647_vm9 = vweird.f32 %v6267_v57 }
 0x6d6   :  { %v2640_v40 = vsel %vm2639_vm7, %v3849_v5, %v2636_v35  ;;  %v2524_v60 = vmul.f32 %v6274_v30, %v6274_v30  ;;  %v2476_v38 = vpop.xlane.xlu1 %2475  ;;  %v1901_v25 = vadd.f32 %v1879_v4, %v1460_v32  ;;  %v2409_v34 = vsel %vm50_vm0, %v6271_v45, 0.0  ;;  %v3916_v5 = vld [vmem:[%s6635_s1 + $0x68] sm:$0xff]  ;;  %3410 = vmatpush.msra.mxu2 %v3062_v22 }
 0x6d7   :  { %v2508_v1 = vmul.f32 %v2476_v38, %v6687_v8  ;;  %v2315_v54 = vpop.f32.mrf.mxu1  ;;  %v2449_v11 = vmul.f32 %v6271_v45, %v6271_v45  ;;  %v2746_v19 = vmul.f32 %v2640_v40, %v2554_v20  ;;  %2410 = vadd.xlane.f32.xlu1 %v2409_v34  ;;  %v6688_v40 = vld [vmem:[#allocation3_spill] sm:$0xff]  ;;  %v3917_v38 = vld [vmem:[%s6635_s1 + $0x70] sm:$0xff]  ;;  %3069 = vmatpush.msrb.mxu1 %v3061_v51 }
 0x6d8   :  { %v2337_v6 = vadd.f32 %v2315_v54, %v1901_v25  ;;  %v2555_v34 = vsub.f32 %v6114_v18, %v6249_v48  ;;  %3411 = vmatpush.msra.mxu2 %v3061_v51 }
 0x6d9   :  { %v2540_v21 = vsub.f32 %v2508_v1, %v2524_v60  ;;  %v2489_v24 = vsel %vm50_vm0, %v2449_v11, 0.0  ;;  %v2763_v59 = vmul.f32 %v6170_v49, %v2746_v19  ;;  %v1466_v60 = vadd.f32 %v6007_v17, %v6688_v40 }
 0x6da   :  { %v2353_v44 = vadd.f32 %v3916_v5, %v2337_v6  ;;  %2490 = vadd.xlane.f32.xlu2 %v2489_v24 }
 0x6db   :  { %v3851_v50 = vpop.eup %3850  ;;  %v6291_v63 = vadd.f32 1e-05, %v2540_v21  ;;  %v2399_v14 = vpop.xlane.xlu2 %2398  ;;  %v2780_v37 = vadd.f32 %v6173_v62, %v2763_v59 }
 0x6dc   :  { %v2642_v53 = vmul.f32 %v3851_v50, %v6267_v57  ;;  %v6296_v16 = vadd.f32 %v6020_v46, %v2353_v44  ;;  %v6299_v31 = vmul.f32 %v2399_v14, %v6687_v8  ;;  %vm2648_vm8 = vweird.f32 %v3851_v50 }
 0x6dd   :  { %3852 = vrsqrt.f32 %v6291_v63  ;;  %3397 = vmatmul.msk.f32.gmra.mxu3 %vm50_vm0, %v2780_v37  ;;  %v2479_v56 = vpop.xlane.xlu0 %2478  ;;  %v1882_v52 = vpop.f32.mrf.mxu2  ;;  %vm2649_vm10 = vmor %vm2647_vm9, %vm2648_vm8  ;;  %vm2657_vm12 = vweird.f32 %v6291_v63 }
 0x6de   :  { %v2643_v10 = vmul.f32 %v3851_v50, %v2642_v53  ;;  %v2525_v39 = vmul.f32 %v6299_v31, %v6299_v31  ;;  %v2509_v47 = vmul.f32 %v2479_v56, %v6687_v8  ;;  %v1902_v58 = vadd.f32 %v1882_v52, %v1463_v2 }
 0x6df   :  { %v2318_v15 = vpop.f32.mrf.mxu1  ;;  %v2412_v7 = vsel %vm50_vm0, %v6296_v16, 0.0  ;;  %v2450_v29 = vmul.f32 %v6296_v16, %v6296_v16 }
 0x6e0   :  { %v2644_v33 = vmul.f32 0.5, %v2643_v10  ;;  %v2541_v28 = vsub.f32 %v2509_v47, %v2525_v39  ;;  %2413 = vadd.xlane.f32.xlu0 %v2412_v7  ;;  %v2338_v0 = vadd.f32 %v2318_v15, %v1902_v58  ;;  %v2556_v39 = vsub.f32 %v6129_v12, %v6274_v30 }
 0x6e1   :  { %v2492_v32 = vsel %vm50_vm0, %v2450_v29, 0.0 }
 0x6e2   :  { %v2645_v35 = vsub.f32 1.5, %v2644_v33  ;;  %v2573_v20 = vadd.f32 1e-05, %v2541_v28  ;;  %2493 = vadd.xlane.f32.xlu1 %v2492_v32  ;;  %v2354_v25 = vadd.f32 %v3917_v38, %v2338_v0  ;;  %v3060_v0 = vld [vmem:[%s6639_s4 + $0x58] sm:$0xff]  ;;  %v2557_v32 = vsub.f32 %v6142_v55, %v6299_v31  ;;  %v3057_v31 = vld [vmem:[%s6639_s4 + $0x40] sm:$0xff] }
 0x6e3   :  { %v3853_v4 = vpop.eup %3852  ;;  %3070 = vmatpush.msrb.mxu1 %v3060_v0  ;;  %3412 = vmatpush.msra.mxu2 %v3060_v0  ;;  %v3056_v38 = vld [vmem:[%s6639_s4 + $0x38] sm:$0xff] }
 0x6e4   :  { %v2646_v1 = vmul.f32 %v3851_v50, %v2645_v35  ;;  %v2652_v54 = vmul.f32 %v3853_v4, %v6291_v63  ;;  %3854 = vrsqrt.f32 %v2573_v20  ;;  %v6336_v17 = vadd.f32 %v6020_v46, %v2354_v25  ;;  %v3059_v35 = vld [vmem:[%s6639_s4 + $0x50] sm:$0xff] }
 0x6e5   :  { %v1885_v11 = vpop.f32.mrf.mxu2  ;;  %vm2658_vm11 = vweird.f32 %v3853_v4  ;;  %vm2667_vm15 = vweird.f32 %v2573_v20  ;;  %3071 = vmatpush.msrb.mxu1 %v3059_v35  ;;  %3413 = vmatpush.msra.mxu2 %v3059_v35  ;;  %v3055_v25 = vld [vmem:[%s6639_s4 + $0x30] sm:$0xff] }
 0x6e6   :  { %v2650_v19 = vsel %vm2649_vm10, %v3851_v50, %v2646_v1  ;;  %v2653_v6 = vmul.f32 %v3853_v4, %v2652_v54  ;;  %v1903_v21 = vadd.f32 %v1885_v11, %v1466_v60  ;;  %v2415_v57 = vsel %vm50_vm0, %v6336_v17, 0.0  ;;  %v3918_v50 = vld [vmem:[%s6635_s1 + $0x78] sm:$0xff]  ;;  %vm2659_vm13 = vmor %vm2657_vm12, %vm2658_vm11  ;;  %v3054_v1 = vld [vmem:[%s6639_s4 + $0x28] sm:$0xff] }
 0x6e7   :  { %v2321_v24 = vpop.f32.mrf.mxu1  ;;  %v2451_v59 = vmul.f32 %v6336_v17, %v6336_v17  ;;  %v2747_v5 = vmul.f32 %v2650_v19, %v2555_v34  ;;  %2416 = vadd.xlane.f32.xlu2 %v2415_v57  ;;  %v3053_v54 = vld [vmem:[%s6639_s4 + $0x20] sm:$0xff]  ;;  %v3052_v34 = vld [vmem:[%s6639_s4 + $0x18] sm:$0xff]  ;;  %v3051_v11 = vld [vmem:[%s6639_s4 + $0x10] sm:$0xff] }
 0x6e8   :  { %v2654_v44 = vmul.f32 0.5, %v2653_v6  ;;  %v2339_v48 = vadd.f32 %v2321_v24, %v1903_v21  ;;  %v3050_v19 = vld [vmem:[%s6639_s4 + $0x8] sm:$0xff]  ;;  %v3049_v6 = vld [vmem:[%s6639_s4] sm:$0xff] }
 0x6e9   :  { %v2495_v14 = vsel %vm50_vm0, %v2451_v59, 0.0  ;;  %v2764_v37 = vmul.f32 %v6170_v49, %v2747_v5  ;;  %v6407_v21 = vld [vmem:[%s6637_s2] sm:$0xff] }
 0x6ea   :  { %v3855_v53 = vpop.eup %3854  ;;  %v2655_v2 = vsub.f32 1.5, %v2654_v44  ;;  %v2355_v56 = vadd.f32 %v3918_v50, %v2339_v48  ;;  %2496 = vadd.xlane.f32.xlu0 %v2495_v14  ;;  %v6410_v24 = vperm.slane %v6407_v21, 6 }
 0x6eb   :  { %v2662_v52 = vmul.f32 %v3855_v53, %v2573_v20  ;;  %v2781_v41 = vadd.f32 %v6173_v62, %v2764_v37  ;;  %vm2668_vm14 = vweird.f32 %v3855_v53 }
 0x6ec   :  { %v2656_v61 = vmul.f32 %v3853_v4, %v2655_v2  ;;  %v6350_v10 = vadd.f32 %v6020_v46, %v2355_v56  ;;  %vm2669_vm1 = vmor %vm2667_vm15, %vm2668_vm14 }
 0x6ed   :  { %v2663_v47 = vmul.f32 %v3855_v53, %v2662_v52  ;;  %3398 = vmatmul.msk.f32.gmra.mxu3 %vm50_vm0, %v2781_v41 }
 0x6ee   :  { %v2660_v58 = vsel %vm2659_vm13, %v3853_v4, %v2656_v61  ;;  %v2418_v15 = vsel %vm50_vm0, %v6350_v10, 0.0  ;;  %v2452_v7 = vmul.f32 %v6350_v10, %v6350_v10  ;;  %v3058_v4 = vld [vmem:[%s6639_s4 + $0x48] sm:$0xff] }
 0x6ef   :  { %v2664_v29 = vmul.f32 0.5, %v2663_v47  ;;  %2419 = vadd.xlane.f32.xlu1 %v2418_v15  ;;  %v2748_v63 = vmul.f32 %v2660_v58, %v2556_v39  ;;  %3072 = vmatpush.msrb.mxu1 %v3058_v4 }
 0x6f0   :  { %v2498_v46 = vsel %vm50_vm0, %v2452_v7, 0.0  ;;  %3414 = vmatpush.msra.mxu2 %v3058_v4 }
 0x6f1   :  { %v2665_v22 = vsub.f32 1.5, %v2664_v29  ;;  %2499 = vadd.xlane.f32.xlu2 %v2498_v46  ;;  %v2765_v30 = vmul.f32 %v6170_v49, %v2748_v63  ;;  %3073 = vmatpush.msrb.mxu1 %v3057_v31 }
 0x6f2   :  { %3415 = vmatpush.msra.mxu2 %v3057_v31 }
 0x6f3   :  { %v2666_v33 = vmul.f32 %v3855_v53, %v2665_v22  ;;  %v2782_v28 = vadd.f32 %v6173_v62, %v2765_v30  ;;  %3074 = vmatpush.msrb.mxu1 %v3056_v38 }
 0x6f4   :  { %3416 = vmatpush.msra.mxu2 %v3056_v38 }
 0x6f5   :  { %v2670_v51 = vsel %vm2669_vm1, %v3855_v53, %v2666_v33  ;;  %3399 = vmatmul.msk.f32.gmra.mxu3 %vm50_vm0, %v2782_v28  ;;  %3075 = vmatpush.msrb.mxu1 %v3055_v25 }
 0x6f6   :  { %v2749_v20 = vmul.f32 %v2670_v51, %v2557_v32  ;;  %3417 = vmatpush.msra.mxu2 %v3055_v25 }
 0x6f7   :  { %3076 = vmatpush.msrb.mxu1 %v3054_v1 }
 0x6f8   :  { %v2766_v40 = vmul.f32 %v6170_v49, %v2749_v20  ;;  %3418 = vmatpush.msra.mxu2 %v3054_v1 }
 0x6f9   :  { %3077 = vmatpush.msrb.mxu1 %v3053_v54 }
 0x6fa   :  { %v2783_v60 = vadd.f32 %v6173_v62, %v2766_v40  ;;  %3419 = vmatpush.msra.mxu2 %v3053_v54 }
 0x6fb   :  { %3078 = vmatpush.msrb.mxu1 %v3052_v34 }
 0x6fc   :  { %3420 = vmatpush.msra.mxu2 %v3052_v34 }
 0x6fd   :  { %3400 = vmatmul.msk.f32.gmra.mxu3 %vm50_vm0, %v2783_v60  ;;  %3079 = vmatpush.msrb.mxu1 %v3051_v11 }
 0x6fe   :  { %3421 = vmatpush.msra.mxu2 %v3051_v11 }
 0x6ff   :  { %3080 = vmatpush.msrb.mxu1 %v3050_v19 }
 0x700   :  { %3422 = vmatpush.msra.mxu2 %v3050_v19 }
 0x701   :  { %3081 = vmatpush.msrb.mxu1 %v3049_v6 }
 0x702   :  { %3423 = vmatpush.msra.mxu2 %v3049_v6 }
 0x712   :  { %v2857_v57 = vpop.f32.mrf.mxu3 }
 0x713   :  { %v2858_v59 = vadd.f32 %v2857_v57, %v6410_v24 }
 0x715   :  { %v2921_v5 = vmul.f32 0.044715, %v2858_v59  ;;  %v2905_v7 = vmul.f32 0.5, %v2858_v59 }
 0x717   :  { %v2937_v44 = vmul.f32 %v2921_v5, %v2858_v59 }
 0x719   :  { %v2953_v48 = vmul.f32 %v2937_v44, %v2858_v59 }
 0x71a   :  { %v2860_v14 = vpop.f32.mrf.mxu3 }
 0x71b   :  { %v2969_v37 = vadd.f32 %v2953_v48, %v2858_v59  ;;  %v2861_v53 = vadd.f32 %v2860_v14, %v6410_v24 }
 0x71d   :  { %v2985_v2 = vmul.f32 0.7978846, %v2969_v37  ;;  %v2922_v50 = vmul.f32 0.044715, %v2861_v53  ;;  %v2906_v0 = vmul.f32 0.5, %v2861_v53 }
 0x71f   :  { %3856 = vtanh.f32 %v2985_v2  ;;  %v2938_v56 = vmul.f32 %v2922_v50, %v2861_v53 }
 0x721   :  { %v2954_v52 = vmul.f32 %v2938_v56, %v2861_v53 }
 0x722   :  { %v2863_v41 = vpop.f32.mrf.mxu3 }
 0x723   :  { %v2864_v61 = vadd.f32 %v2863_v41, %v6410_v24  ;;  %v2970_v39 = vadd.f32 %v2954_v52, %v2861_v53 }
 0x725   :  { %v3857_v47 = vpop.eup %3856  ;;  %v2923_v58 = vmul.f32 0.044715, %v2864_v61  ;;  %v2986_v15 = vmul.f32 0.7978846, %v2970_v39  ;;  %v2907_v31 = vmul.f32 0.5, %v2864_v61 }
 0x726   :  { %v3017_v29 = vadd.f32 1.0, %v3857_v47 }
 0x727   :  { %v2939_v63 = vmul.f32 %v2923_v58, %v2864_v61  ;;  %3858 = vtanh.f32 %v2986_v15 }
 0x728   :  { %v3033_v46 = vmul.f32 %v3017_v29, %v2905_v7 }
 0x729   :  { %v2955_v22 = vmul.f32 %v2939_v63, %v2864_v61 }
 0x72a   :  { %3082 = vmatmul.f32.vlgmr.msrb.gmra.mxu1 %v3033_v46 }
 0x72b   :  { %v2971_v30 = vadd.f32 %v2955_v22, %v2864_v61 }
 0x72d   :  { %v3859_v33 = vpop.eup %3858  ;;  %v2987_v28 = vmul.f32 0.7978846, %v2971_v30 }
 0x72e   :  { %v3018_v32 = vadd.f32 1.0, %v3859_v33 }
 0x72f   :  { %3860 = vtanh.f32 %v2987_v28 }
 0x730   :  { %v3034_v51 = vmul.f32 %v3018_v32, %v2906_v0 }
 0x732   :  { %3085 = vmatmul.f32.gmra.mxu1 %v3034_v51  ;;  %v2402_v35 = vpop.xlane.xlu1 %2401 }
 0x733   :  { %v2430_v20 = vmul.f32 %v2402_v35, %v6687_v8 }
 0x734   :  { %v2482_v40 = vpop.xlane.xlu2 %2481 }
 0x735   :  { %v3861_v4 = vpop.eup %3860  ;;  %v2526_v60 = vmul.f32 %v2430_v20, %v2430_v20  ;;  %v2510_v38 = vmul.f32 %v2482_v40, %v6687_v8  ;;  %v2558_v30 = vsub.f32 %v6202_v27, %v2430_v20 }
 0x736   :  { %v3019_v25 = vadd.f32 1.0, %v3861_v4 }
 0x737   :  { %v2542_v1 = vsub.f32 %v2510_v38, %v2526_v60 }
 0x738   :  { %v3035_v54 = vmul.f32 %v3019_v25, %v2907_v31 }
 0x739   :  { %v2574_v34 = vadd.f32 1e-05, %v2542_v1 }
 0x73a   :  { %3088 = vmatmul.f32.vlgmr.msra.gmra.mxu2 %v3035_v54  ;;  %v2405_v11 = vpop.xlane.xlu0 %2404 }
 0x73b   :  { %v6418_v19 = vmul.f32 %v2405_v11, %v6687_v8  ;;  %3862 = vrsqrt.f32 %v2574_v34  ;;  %vm2677_vm3 = vweird.f32 %v2574_v34 }
 0x73c   :  { %v2485_v6 = vpop.xlane.xlu1 %2484 }
 0x73d   :  { %v2527_v57 = vmul.f32 %v6418_v19, %v6418_v19  ;;  %v2511_v59 = vmul.f32 %v2485_v6, %v6687_v8 }
 0x73f   :  { %v2543_v5 = vsub.f32 %v2511_v59, %v2527_v57 }
 0x741   :  { %v2575_v44 = vadd.f32 1e-05, %v2543_v5  ;;  %v3863_v48 = vpop.eup %3862 }
 0x742   :  { %v2672_v14 = vmul.f32 %v3863_v48, %v2574_v34  ;;  %v2408_v37 = vpop.xlane.xlu2 %2407  ;;  %vm2678_vm2 = vweird.f32 %v3863_v48  ;;  %v2559_v34 = vsub.f32 %v6225_v23, %v6418_v19 }
 0x743   :  { %3864 = vrsqrt.f32 %v2575_v44  ;;  %v6424_v53 = vmul.f32 %v2408_v37, %v6687_v8  ;;  %vm2679_vm4 = vmor %vm2677_vm3, %vm2678_vm2  ;;  %vm2687_vm6 = vweird.f32 %v2575_v44 }
 0x744   :  { %v2673_v2 = vmul.f32 %v3863_v48, %v2672_v14 }
 0x745   :  { %v2488_v50 = vpop.xlane.xlu0 %2487  ;;  %v2528_v56 = vmul.f32 %v6424_v53, %v6424_v53 }
 0x746   :  { %v2512_v52 = vmul.f32 %v2488_v50, %v6687_v8  ;;  %v2674_v41 = vmul.f32 0.5, %v2673_v2 }
 0x748   :  { %v2544_v61 = vsub.f32 %v2512_v52, %v2528_v56  ;;  %v2675_v47 = vsub.f32 1.5, %v2674_v41 }
 0x749   :  { %v3865_v39 = vpop.eup %3864 }
 0x74a   :  { %v2682_v58 = vmul.f32 %v3865_v39, %v2575_v44  ;;  %v6429_v15 = vadd.f32 1e-05, %v2544_v61  ;;  %v2676_v7 = vmul.f32 %v3863_v48, %v2675_v47  ;;  %v2411_v29 = vpop.xlane.xlu1 %2410  ;;  %vm2688_vm5 = vweird.f32 %v3865_v39 }
 0x74b   :  { %v6433_v46 = vmul.f32 %v2411_v29, %v6687_v8  ;;  %v2866_v22 = vpop.f32.mrf.mxu3  ;;  %vm2689_vm7 = vmor %vm2687_vm6, %vm2688_vm5 }
 0x74c   :  { %v2683_v63 = vmul.f32 %v3865_v39, %v2682_v58  ;;  %3866 = vrsqrt.f32 %v6429_v15  ;;  %v2680_v33 = vsel %vm2679_vm4, %v3863_v48, %v2676_v7  ;;  %v6437_v28 = vadd.f32 %v2866_v22, %v6410_v24 }
 0x74d   :  { %v2491_v0 = vpop.xlane.xlu2 %2490  ;;  %v2529_v51 = vmul.f32 %v6433_v46, %v6433_v46  ;;  %v2750_v40 = vmul.f32 %v2680_v33, %v2558_v30  ;;  %vm2697_vm9 = vweird.f32 %v6429_v15 }
 0x74e   :  { %v2684_v32 = vmul.f32 0.5, %v2683_v63  ;;  %v2513_v35 = vmul.f32 %v2491_v0, %v6687_v8  ;;  %v2924_v4 = vmul.f32 0.044715, %v6437_v28 }
 0x74f   :  { %v2767_v38 = vmul.f32 %v6170_v49, %v2750_v40 }
 0x750   :  { %v2685_v31 = vsub.f32 1.5, %v2684_v32  ;;  %v2545_v60 = vsub.f32 %v2513_v35, %v2529_v51  ;;  %v2940_v20 = vmul.f32 %v2924_v4, %v6437_v28  ;;  %v2560_v35 = vsub.f32 %v6246_v43, %v6424_v53 }
 0x751   :  { %v2784_v57 = vadd.f32 %v6173_v62, %v2767_v38 }
 0x752   :  { %v3867_v25 = vpop.eup %3866  ;;  %v2686_v1 = vmul.f32 %v3865_v39, %v2685_v31  ;;  %v6445_v54 = vadd.f32 1e-05, %v2545_v60  ;;  %v2956_v59 = vmul.f32 %v2940_v20, %v6437_v28 }
 0x753   :  { %v2692_v11 = vmul.f32 %v3867_v25, %v6429_v15  ;;  %v2414_v6 = vpop.xlane.xlu0 %2413  ;;  %3401 = vmatmul.msk.f32.gmra.mxu3 %vm50_vm0, %v2784_v57  ;;  %vm2698_vm8 = vweird.f32 %v3867_v25 }
 0x754   :  { %v2690_v5 = vsel %vm2689_vm7, %v3865_v39, %v2686_v1  ;;  %3868 = vrsqrt.f32 %v6445_v54  ;;  %v6454_v48 = vmul.f32 %v2414_v6, %v6687_v8  ;;  %v2869_v44 = vpop.f32.mrf.mxu3  ;;  %v2972_v50 = vadd.f32 %v2956_v59, %v6437_v28  ;;  %vm2699_vm10 = vmor %vm2697_vm9, %vm2698_vm8 }
 0x755   :  { %v2693_v14 = vmul.f32 %v3867_v25, %v2692_v11  ;;  %v6458_v19 = vadd.f32 %v2869_v44, %v6410_v24  ;;  %v2494_v37 = vpop.xlane.xlu1 %2493  ;;  %v2751_v2 = vmul.f32 %v2690_v5, %v2559_v34  ;;  %vm2707_vm12 = vweird.f32 %v6445_v54 }
 0x756   :  { %v2530_v56 = vmul.f32 %v6454_v48, %v6454_v48  ;;  %v2514_v52 = vmul.f32 %v2494_v37, %v6687_v8  ;;  %v2988_v47 = vmul.f32 0.7978846, %v2972_v50 }
 0x757   :  { %v2694_v41 = vmul.f32 0.5, %v2693_v14  ;;  %v2925_v61 = vmul.f32 0.044715, %v6458_v19  ;;  %v2768_v39 = vmul.f32 %v6170_v49, %v2751_v2 }
 0x758   :  { %v2546_v58 = vsub.f32 %v2514_v52, %v2530_v56  ;;  %3870 = vtanh.f32 %v2988_v47 }
 0x759   :  { %v2695_v7 = vsub.f32 1.5, %v2694_v41  ;;  %v2785_v29 = vadd.f32 %v6173_v62, %v2768_v39  ;;  %v2941_v63 = vmul.f32 %v2925_v61, %v6458_v19  ;;  %v2561_v39 = vsub.f32 %v6271_v45, %v6433_v46 }
 0x75a   :  { %v3869_v22 = vpop.eup %3868  ;;  %v6468_v30 = vadd.f32 1e-05, %v2546_v58  ;;  %v2417_v32 = vpop.xlane.xlu2 %2416 }
 0x75b   :  { %v2696_v33 = vmul.f32 %v3867_v25, %v2695_v7  ;;  %v2702_v0 = vmul.f32 %v3869_v22, %v6445_v54  ;;  %v2957_v51 = vmul.f32 %v2941_v63, %v6458_v19  ;;  %v6477_v4 = vmul.f32 %v2417_v32, %v6687_v8  ;;  %3402 = vmatmul.msk.f32.gmra.mxu3 %vm50_vm0, %v2785_v29 }
 0x75c   :  { %3872 = vrsqrt.f32 %v6468_v30  ;;  %vm2708_vm11 = vweird.f32 %v3869_v22  ;;  %vm2717_vm15 = vweird.f32 %v6468_v30 }
 0x75d   :  { %v2700_v40 = vsel %vm2699_vm10, %v3867_v25, %v2696_v33  ;;  %v2703_v31 = vmul.f32 %v3869_v22, %v2702_v0  ;;  %v2497_v60 = vpop.xlane.xlu0 %2496  ;;  %v2973_v15 = vadd.f32 %v2957_v51, %v6458_v19  ;;  %v2531_v38 = vmul.f32 %v6477_v4, %v6477_v4  ;;  %vm2709_vm13 = vmor %vm2707_vm12, %vm2708_vm11 }
 0x75e   :  { %v2515_v20 = vmul.f32 %v2497_v60, %v6687_v8  ;;  %v2752_v1 = vmul.f32 %v2700_v40, %v2560_v35  ;;  %v3871_v53 = vpop.eup %3870  ;;  %v2908_v25 = vmul.f32 0.5, %v6437_v28 }
 0x75f   :  { %v2704_v34 = vmul.f32 0.5, %v2703_v31  ;;  %v2989_v11 = vmul.f32 0.7978846, %v2973_v15  ;;  %v3020_v5 = vadd.f32 1.0, %v3871_v53 }
 0x760   :  { %v2547_v6 = vsub.f32 %v2515_v20, %v2531_v38  ;;  %v2872_v57 = vpop.f32.mrf.mxu3  ;;  %v2769_v59 = vmul.f32 %v6170_v49, %v2752_v1 }
 0x761   :  { %v2705_v44 = vsub.f32 1.5, %v2704_v34  ;;  %v6487_v14 = vadd.f32 %v2872_v57, %v6410_v24  ;;  %3874 = vtanh.f32 %v2989_v11  ;;  %v3036_v52 = vmul.f32 %v3020_v5, %v2908_v25 }
 0x762   :  { %v3873_v37 = vpop.eup %3872  ;;  %v2579_v2 = vadd.f32 1e-05, %v2547_v6  ;;  %v2420_v50 = vpop.xlane.xlu1 %2419  ;;  %v2786_v56 = vadd.f32 %v6173_v62, %v2769_v59  ;;  %v2562_v6 = vsub.f32 %v6296_v16, %v6454_v48 }
 0x763   :  { %v2706_v41 = vmul.f32 %v3869_v22, %v2705_v44  ;;  %v2712_v61 = vmul.f32 %v3873_v37, %v6468_v30  ;;  %v2926_v28 = vmul.f32 0.044715, %v6487_v14  ;;  %v6496_v47 = vmul.f32 %v2420_v50, %v6687_v8  ;;  %3091 = vmatmul.f32.gmra.mxu2 %v3036_v52 }
 0x764   :  { %3876 = vrsqrt.f32 %v2579_v2  ;;  %v2500_v58 = vpop.xlane.xlu2 %2499  ;;  %3403 = vmatmul.msk.f32.gmra.mxu3 %vm50_vm0, %v2786_v56  ;;  %vm2718_vm14 = vweird.f32 %v3873_v37  ;;  %vm2727_vm3 = vweird.f32 %v2579_v2 }
 0x765   :  { %v2710_v7 = vsel %vm2709_vm13, %v3869_v22, %v2706_v41  ;;  %v2713_v29 = vmul.f32 %v3873_v37, %v2712_v61  ;;  %v2516_v54 = vmul.f32 %v2500_v58, %v6687_v8  ;;  %v2942_v63 = vmul.f32 %v2926_v28, %v6487_v14  ;;  %vm2719_vm1 = vmor %vm2717_vm15, %vm2718_vm14 }
 0x766   :  { %v2532_v33 = vmul.f32 %v6496_v47, %v6496_v47  ;;  %v2753_v0 = vmul.f32 %v2710_v7, %v2561_v39  ;;  %v2909_v22 = vmul.f32 0.5, %v6458_v19  ;;  %v2563_v28 = vsub.f32 %v6336_v17, %v6477_v4 }
 0x767   :  { %v3875_v46 = vpop.eup %3874  ;;  %v2714_v32 = vmul.f32 0.5, %v2713_v29  ;;  %v2958_v51 = vmul.f32 %v2942_v63, %v6487_v14  ;;  %v2910_v39 = vmul.f32 0.5, %v6487_v14 }
 0x768   :  { %v2548_v35 = vsub.f32 %v2516_v54, %v2532_v33  ;;  %v2770_v40 = vmul.f32 %v6170_v49, %v2753_v0  ;;  %v3021_v31 = vadd.f32 1.0, %v3875_v46 }
 0x769   :  { %v2715_v60 = vsub.f32 1.5, %v2714_v32  ;;  %v2974_v8 = vadd.f32 %v2958_v51, %v6487_v14 }
 0x76a   :  { %v3877_v15 = vpop.eup %3876  ;;  %v2580_v38 = vadd.f32 1e-05, %v2548_v35  ;;  %v2787_v20 = vadd.f32 %v6173_v62, %v2770_v40  ;;  %v3037_v1 = vmul.f32 %v3021_v31, %v2909_v22 }
 0x76b   :  { %v2716_v53 = vmul.f32 %v3873_v37, %v2715_v60  ;;  %v2722_v34 = vmul.f32 %v3877_v15, %v2579_v2  ;;  %v2990_v11 = vmul.f32 0.7978846, %v2974_v8  ;;  %vm2728_vm2 = vweird.f32 %v3877_v15 }
 0x76c   :  { %3878 = vrsqrt.f32 %v2580_v38  ;;  %3094 = vmatmul.f32.gmra.mxu2 %v3037_v1  ;;  %3404 = vmatmul.msk.f32.gmra.mxu3 %vm50_vm0, %v2787_v20  ;;  %vm2729_vm4 = vmor %vm2727_vm3, %vm2728_vm2  ;;  %vm2737_vm6 = vweird.f32 %v2580_v38  ;;  %v2564_v60 = vsub.f32 %v6350_v10, %v6496_v47 }
 0x76d   :  { %v2720_v19 = vsel %vm2719_vm1, %v3873_v37, %v2716_v53  ;;  %v2723_v57 = vmul.f32 %v3877_v15, %v2722_v34  ;;  %3880 = vtanh.f32 %v2990_v11 }
 0x76e   :  { %v2754_v59 = vmul.f32 %v2720_v19, %v2562_v6 }
 0x76f   :  { %v2724_v25 = vmul.f32 0.5, %v2723_v57 }
 0x770   :  { %v2875_v5 = vpop.f32.mrf.mxu3  ;;  %v2771_v44 = vmul.f32 %v6170_v49, %v2754_v59 }
 0x771   :  { %v2725_v50 = vsub.f32 1.5, %v2724_v25  ;;  %v2876_v30 = vadd.f32 %v2875_v5, %v6410_v24 }
 0x772   :  { %v3879_v56 = vpop.eup %3878  ;;  %v2788_v48 = vadd.f32 %v6173_v62, %v2771_v44 }
 0x773   :  { %v3881_v52 = vpop.eup %3880  ;;  %v2726_v41 = vmul.f32 %v3877_v15, %v2725_v50  ;;  %v2732_v37 = vmul.f32 %v3879_v56, %v2580_v38  ;;  %v2927_v61 = vmul.f32 0.044715, %v2876_v30  ;;  %vm2738_vm5 = vweird.f32 %v3879_v56 }
 0x774   :  { %v3022_v58 = vadd.f32 1.0, %v3881_v52  ;;  %3405 = vmatmul.msk.f32.gmra.mxu3 %vm50_vm0, %v2788_v48  ;;  %vm2739_vm7 = vmor %vm2737_vm6, %vm2738_vm5  ;;  %v2911_v47 = vmul.f32 0.5, %v2876_v30 }
 0x775   :  { %v2730_v7 = vsel %vm2729_vm4, %v3877_v15, %v2726_v41  ;;  %v2733_v29 = vmul.f32 %v3879_v56, %v2732_v37  ;;  %v2943_v54 = vmul.f32 %v2927_v61, %v2876_v30 }
 0x776   :  { %v3038_v63 = vmul.f32 %v3022_v58, %v2910_v39  ;;  %v2755_v33 = vmul.f32 %v2730_v7, %v2563_v28  ;;  %v6530_v39 = vperm.slane %v6407_v21, 5 }
 0x777   :  { %v2734_v0 = vmul.f32 0.5, %v2733_v29  ;;  %v2959_v46 = vmul.f32 %v2943_v54, %v2876_v30 }
 0x778   :  { %v2878_v32 = vpop.f32.mrf.mxu3  ;;  %3097 = vmatmul.f32.gmra.mxu2 %v3038_v63  ;;  %v2772_v2 = vmul.f32 %v6170_v49, %v2755_v33 }
 0x779   :  { %v2735_v51 = vsub.f32 1.5, %v2734_v0  ;;  %v2879_v4 = vadd.f32 %v2878_v32, %v6410_v24  ;;  %v2975_v35 = vadd.f32 %v2959_v46, %v2876_v30 }
 0x77a   :  { %v2789_v14 = vadd.f32 %v6173_v62, %v2772_v2 }
 0x77b   :  { %v2736_v40 = vmul.f32 %v3879_v56, %v2735_v51  ;;  %v2928_v22 = vmul.f32 0.044715, %v2879_v4  ;;  %v2991_v31 = vmul.f32 0.7978846, %v2975_v35  ;;  %v2912_v52 = vmul.f32 0.5, %v2879_v4 }
 0x77c   :  { %3406 = vmatmul.msk.f32.gmra.mxu3 %vm50_vm0, %v2789_v14 }
 0x77d   :  { %v2740_v8 = vsel %vm2739_vm7, %v3879_v56, %v2736_v40  ;;  %3882 = vtanh.f32 %v2991_v31  ;;  %v2944_v15 = vmul.f32 %v2928_v22, %v2879_v4 }
 0x77e   :  { %v2756_v20 = vmul.f32 %v2740_v8, %v2564_v60 }
 0x77f   :  { %v2960_v1 = vmul.f32 %v2944_v15, %v2879_v4 }
 0x780   :  { %v2881_v53 = vpop.f32.mrf.mxu3  ;;  %v2773_v34 = vmul.f32 %v6170_v49, %v2756_v20 }
 0x781   :  { %v2882_v11 = vadd.f32 %v2881_v53, %v6410_v24  ;;  %v2976_v6 = vadd.f32 %v2960_v1, %v2879_v4 }
 0x782   :  { %v2790_v38 = vadd.f32 %v6173_v62, %v2773_v34 }
 0x783   :  { %v3883_v19 = vpop.eup %3882  ;;  %v2929_v57 = vmul.f32 0.044715, %v2882_v11  ;;  %v2992_v59 = vmul.f32 0.7978846, %v2976_v6  ;;  %v2913_v61 = vmul.f32 0.5, %v2882_v11 }
 0x784   :  { %v3023_v25 = vadd.f32 1.0, %v3883_v19  ;;  %3407 = vmatmul.msk.f32.gmra.mxu3 %vm50_vm0, %v2790_v38 }
 0x785   :  { %3884 = vtanh.f32 %v2992_v59  ;;  %v2945_v5 = vmul.f32 %v2929_v57, %v2882_v11 }
 0x786   :  { %v3039_v44 = vmul.f32 %v3023_v25, %v2911_v47 }
 0x787   :  { %v2961_v50 = vmul.f32 %v2945_v5, %v2882_v11 }
 0x788   :  { %3100 = vmatmul.f32.gmra.mxu2 %v3039_v44 }
 0x789   :  { %v2977_v56 = vadd.f32 %v2961_v50, %v2882_v11 }
 0x78b   :  { %v3885_v48 = vpop.eup %3884  ;;  %v2993_v49 = vmul.f32 0.7978846, %v2977_v56 }
 0x78c   :  { %v3024_v41 = vadd.f32 1.0, %v3885_v48 }
 0x78d   :  { %3886 = vtanh.f32 %v2993_v49 }
 0x78e   :  { %v3040_v37 = vmul.f32 %v3024_v41, %v2912_v52 }
 0x790   :  { %3103 = vmatmul.f32.gmra.mxu2 %v3040_v37 }
 0x793   :  { %v3887_v62 = vpop.eup %3886 }
 0x794   :  { %v3025_v28 = vadd.f32 1.0, %v3887_v62 }
 0x796   :  { %v3041_v30 = vmul.f32 %v3025_v28, %v2913_v61 }
 0x798   :  { %3106 = vmatmul.f32.gmra.mxu2 %v3041_v30 }
 0x7a7   :  { %v3083_v58 = vpop.f32.mrf.mxu1 }
 0x7a8   :  { %v3084_v7 = vadd.f32 %v3083_v58, %v6530_v39 }
 0x7aa   :  { %v3131_v29 = vadd.f32 %v3084_v7, %v6028_v13 }
 0x7ac   :  { %3147 = vst.msk [vmem:[%s6640_s5] sm:$0xff] %vm50_vm0, %v3131_v29 }
 0x7af   :  { %v3086_v54 = vpop.f32.mrf.mxu1 }
 0x7b0   :  { %v3087_v63 = vadd.f32 %v3086_v54, %v6530_v39 }
 0x7b2   :  { %v3132_v33 = vadd.f32 %v3087_v63, %v6041_v26 }
 0x7b4   :  { %3148 = vst.msk [vmem:[%s6640_s5 + $0x8] sm:$0xff] %vm50_vm0, %v3132_v33 }
 0x7bd   :  { %v3089_v21 = vpop.f32.mrf.mxu2 }
 0x7be   :  { %v3090_v0 = vadd.f32 %v3089_v21, %v6530_v39 }
 0x7c0   :  { %v3133_v13 = vadd.f32 %v3090_v0, %v6052_v3 }
 0x7c2   :  { %3149 = vst.msk [vmem:[%s6640_s5 + $0x10] sm:$0xff] %vm50_vm0, %v3133_v13 }
 0x7d6   :  { %v2884_v46 = vpop.f32.mrf.mxu3 }
 0x7d7   :  { %v2885_v32 = vadd.f32 %v2884_v46, %v6410_v24 }
 0x7d9   :  { %v2930_v2 = vmul.f32 0.044715, %v2885_v32  ;;  %v2914_v38 = vmul.f32 0.5, %v2885_v32 }
 0x7db   :  { %v2946_v26 = vmul.f32 %v2930_v2, %v2885_v32 }
 0x7dd   :  { %v2962_v51 = vmul.f32 %v2946_v26, %v2885_v32 }
 0x7de   :  { %v2887_v4 = vpop.f32.mrf.mxu3 }
 0x7df   :  { %v2888_v35 = vadd.f32 %v2887_v4, %v6410_v24  ;;  %v2978_v14 = vadd.f32 %v2962_v51, %v2885_v32 }
 0x7e1   :  { %v2931_v40 = vmul.f32 0.044715, %v2888_v35  ;;  %v2994_v22 = vmul.f32 0.7978846, %v2978_v14  ;;  %v2915_v41 = vmul.f32 0.5, %v2888_v35 }
 0x7e3   :  { %3888 = vtanh.f32 %v2994_v22  ;;  %v2947_v31 = vmul.f32 %v2931_v40, %v2888_v35 }
 0x7e5   :  { %v2963_v60 = vmul.f32 %v2947_v31, %v2888_v35 }
 0x7e6   :  { %v3092_v3 = vpop.f32.mrf.mxu2 }
 0x7e7   :  { %v2890_v8 = vpop.f32.mrf.mxu3  ;;  %v3093_v15 = vadd.f32 %v3092_v3, %v6530_v39  ;;  %v2979_v1 = vadd.f32 %v2963_v60, %v2888_v35 }
 0x7e8   :  { %v2891_v20 = vadd.f32 %v2890_v8, %v6410_v24 }
 0x7e9   :  { %v3134_v53 = vadd.f32 %v3093_v15, %v6068_v9  ;;  %v3889_v34 = vpop.eup %3888  ;;  %v2995_v6 = vmul.f32 0.7978846, %v2979_v1 }
 0x7ea   :  { %v2932_v11 = vmul.f32 0.044715, %v2891_v20  ;;  %v3026_v19 = vadd.f32 1.0, %v3889_v34  ;;  %v2916_v21 = vmul.f32 0.5, %v2891_v20 }
 0x7eb   :  { %3150 = vst.msk [vmem:[%s6640_s5 + $0x18] sm:$0xff] %vm50_vm0, %v3134_v53  ;;  %3890 = vtanh.f32 %v2995_v6 }
 0x7ec   :  { %v2948_v57 = vmul.f32 %v2932_v11, %v2891_v20  ;;  %v3042_v59 = vmul.f32 %v3026_v19, %v2914_v38 }
 0x7ee   :  { %v2964_v25 = vmul.f32 %v2948_v57, %v2891_v20  ;;  %3109 = vmatmul.f32.gmra.mxu2 %v3042_v59 }
 0x7ef   :  { %v3095_v47 = vpop.f32.mrf.mxu2  ;;  %v2893_v5 = vpop.f32.mrf.mxu3 }
 0x7f0   :  { %v3096_v44 = vadd.f32 %v3095_v47, %v6530_v39  ;;  %v2894_v9 = vadd.f32 %v2893_v5, %v6410_v24  ;;  %v2980_v50 = vadd.f32 %v2964_v25, %v2891_v20 }
 0x7f1   :  { %v3891_v48 = vpop.eup %3890 }
 0x7f2   :  { %v3135_v56 = vadd.f32 %v3096_v44, %v6080_v36  ;;  %v2933_v49 = vmul.f32 0.044715, %v2894_v9  ;;  %v2996_v52 = vmul.f32 0.7978846, %v2980_v50  ;;  %v3027_v37 = vadd.f32 1.0, %v3891_v48 }
 0x7f3   :  { %v2917_v22 = vmul.f32 0.5, %v2894_v9 }
 0x7f4   :  { %3151 = vst.msk [vmem:[%s6640_s5 + $0x20] sm:$0xff] %vm50_vm0, %v3135_v56  ;;  %3892 = vtanh.f32 %v2996_v52  ;;  %v2949_v62 = vmul.f32 %v2933_v49, %v2894_v9  ;;  %v3043_v61 = vmul.f32 %v3027_v37, %v2915_v41 }
 0x7f6   :  { %v2965_v28 = vmul.f32 %v2949_v62, %v2894_v9  ;;  %3112 = vmatmul.f32.gmra.mxu2 %v3043_v61 }
 0x7f7   :  { %v2896_v30 = vpop.f32.mrf.mxu3 }
 0x7f8   :  { %v2897_v58 = vadd.f32 %v2896_v30, %v6410_v24  ;;  %v2981_v7 = vadd.f32 %v2965_v28, %v2894_v9 }
 0x7fa   :  { %v3893_v36 = vpop.eup %3892  ;;  %v2934_v29 = vmul.f32 0.044715, %v2897_v58  ;;  %v2997_v63 = vmul.f32 0.7978846, %v2981_v7  ;;  %v2918_v38 = vmul.f32 0.5, %v2897_v58 }
 0x7fb   :  { %v3098_v54 = vpop.f32.mrf.mxu2  ;;  %v3028_v0 = vadd.f32 1.0, %v3893_v36 }
 0x7fc   :  { %v3099_v33 = vadd.f32 %v3098_v54, %v6530_v39  ;;  %3894 = vtanh.f32 %v2997_v63  ;;  %v2950_v13 = vmul.f32 %v2934_v29, %v2897_v58 }
 0x7fd   :  { %v3044_v32 = vmul.f32 %v3028_v0, %v2916_v21 }
 0x7fe   :  { %v3136_v46 = vadd.f32 %v3099_v33, %v6095_v42  ;;  %v2966_v2 = vmul.f32 %v2950_v13, %v2897_v58 }
 0x7ff   :  { %v2899_v26 = vpop.f32.mrf.mxu3  ;;  %3115 = vmatmul.f32.gmra.mxu2 %v3044_v32 }
 0x800   :  { %3152 = vst.msk [vmem:[%s6640_s5 + $0x28] sm:$0xff] %vm50_vm0, %v3136_v46  ;;  %v2900_v51 = vadd.f32 %v2899_v26, %v6410_v24  ;;  %v2982_v4 = vadd.f32 %v2966_v2, %v2897_v58 }
 0x802   :  { %v3895_v35 = vpop.eup %3894  ;;  %v2935_v14 = vmul.f32 0.044715, %v2900_v51  ;;  %v2998_v40 = vmul.f32 0.7978846, %v2982_v4  ;;  %v2919_v56 = vmul.f32 0.5, %v2900_v51 }
 0x803   :  { %v3029_v31 = vadd.f32 1.0, %v3895_v35 }
 0x804   :  { %3896 = vtanh.f32 %v2998_v40  ;;  %v2951_v3 = vmul.f32 %v2935_v14, %v2900_v51 }
 0x805   :  { %v3045_v42 = vmul.f32 %v3029_v31, %v2917_v22 }
 0x806   :  { %v2967_v60 = vmul.f32 %v2951_v3, %v2900_v51 }
 0x807   :  { %v2902_v8 = vpop.f32.mrf.mxu3  ;;  %3118 = vmatmul.f32.gmra.mxu2 %v3045_v42 }
 0x808   :  { %v2903_v15 = vadd.f32 %v2902_v8, %v6410_v24  ;;  %v2983_v20 = vadd.f32 %v2967_v60, %v2900_v51 }
 0x80a   :  { %v3897_v1 = vpop.eup %3896  ;;  %v2936_v53 = vmul.f32 0.044715, %v2903_v15  ;;  %v2999_v11 = vmul.f32 0.7978846, %v2983_v20  ;;  %v2920_v62 = vmul.f32 0.5, %v2903_v15 }
 0x80b   :  { %v3101_v34 = vpop.f32.mrf.mxu2  ;;  %v3030_v19 = vadd.f32 1.0, %v3897_v1 }
 0x80c   :  { %v3102_v6 = vadd.f32 %v3101_v34, %v6530_v39  ;;  %3898 = vtanh.f32 %v2999_v11  ;;  %v2952_v57 = vmul.f32 %v2936_v53, %v2903_v15 }
 0x80d   :  { %v3046_v47 = vmul.f32 %v3030_v19, %v2918_v38 }
 0x80e   :  { %v3137_v59 = vadd.f32 %v3102_v6, %v6114_v18  ;;  %v2968_v25 = vmul.f32 %v2952_v57, %v2903_v15 }
 0x80f   :  { %3121 = vmatmul.f32.gmra.mxu2 %v3046_v47 }
 0x810   :  { %3153 = vst.msk [vmem:[%s6640_s5 + $0x30] sm:$0xff] %vm50_vm0, %v3137_v59  ;;  %v2984_v24 = vadd.f32 %v2968_v25, %v2903_v15 }
 0x812   :  { %v3899_v5 = vpop.eup %3898  ;;  %v3000_v9 = vmul.f32 0.7978846, %v2984_v24 }
 0x813   :  { %v3104_v44 = vpop.f32.mrf.mxu2  ;;  %v3031_v48 = vadd.f32 1.0, %v3899_v5 }
 0x814   :  { %v3105_v50 = vadd.f32 %v3104_v44, %v6530_v39  ;;  %3900 = vtanh.f32 %v3000_v9 }
 0x815   :  { %v3047_v18 = vmul.f32 %v3031_v48, %v2919_v56 }
 0x816   :  { %v3138_v49 = vadd.f32 %v3105_v50, %v6129_v12 }
 0x817   :  { %3124 = vmatmul.f32.gmra.mxu2 %v3047_v18 }
 0x818   :  { %3154 = vst.msk [vmem:[%s6640_s5 + $0x38] sm:$0xff] %vm50_vm0, %v3138_v49 }
 0x81a   :  { %v3901_v52 = vpop.eup %3900 }
 0x81b   :  { %v3107_v41 = vpop.f32.mrf.mxu2  ;;  %v3032_v61 = vadd.f32 1.0, %v3901_v52 }
 0x81c   :  { %v3108_v37 = vadd.f32 %v3107_v41, %v6530_v39 }
 0x81d   :  { %v3048_v30 = vmul.f32 %v3032_v61, %v2920_v62 }
 0x81e   :  { %v3139_v28 = vadd.f32 %v3108_v37, %v6142_v55 }
 0x81f   :  { %3127 = vmatmul.f32.gmra.mxu2 %v3048_v30 }
 0x820   :  { %3155 = vst.msk [vmem:[%s6640_s5 + $0x40] sm:$0xff] %vm50_vm0, %v3139_v28 }
 0x871   :  { %v3110_v12 = vpop.f32.mrf.mxu2 }
 0x872   :  { %v3111_v58 = vadd.f32 %v3110_v12, %v6530_v39 }
 0x874   :  { %v3140_v7 = vadd.f32 %v3111_v58, %v6202_v27 }
 0x876   :  { %3156 = vst.msk [vmem:[%s6640_s5 + $0x48] sm:$0xff] %vm50_vm0, %v3140_v7 }
 0x879   :  { %v3113_v36 = vpop.f32.mrf.mxu2 }
 0x87a   :  { %v3114_v55 = vadd.f32 %v3113_v36, %v6530_v39 }
 0x87c   :  { %v3141_v29 = vadd.f32 %v3114_v55, %v6225_v23 }
 0x87e   :  { %3157 = vst.msk [vmem:[%s6640_s5 + $0x50] sm:$0xff] %vm50_vm0, %v3141_v29 }
 0x882   :  { %v3116_v54 = vpop.f32.mrf.mxu2 }
 0x883   :  { %v3117_v63 = vadd.f32 %v3116_v54, %v6530_v39 }
 0x885   :  { %v3142_v27 = vadd.f32 %v3117_v63, %v6246_v43 }
 0x887   :  { %3158 = vst.msk [vmem:[%s6640_s5 + $0x58] sm:$0xff] %vm50_vm0, %v3142_v27 }
 0x88a   :  { %v3119_v33 = vpop.f32.mrf.mxu2 }
 0x88b   :  { %v3120_v21 = vadd.f32 %v3119_v33, %v6530_v39 }
 0x88d   :  { %v3143_v23 = vadd.f32 %v3120_v21, %v6271_v45 }
 0x88f   :  { %3159 = vst.msk [vmem:[%s6640_s5 + $0x60] sm:$0xff] %vm50_vm0, %v3143_v23 }
 0x892   :  { %v3122_v0 = vpop.f32.mrf.mxu2 }
 0x893   :  { %v3123_v13 = vadd.f32 %v3122_v0, %v6530_v39 }
 0x895   :  { %v3144_v43 = vadd.f32 %v3123_v13, %v6296_v16 }
 0x897   :  { %3160 = vst.msk [vmem:[%s6640_s5 + $0x68] sm:$0xff] %vm50_vm0, %v3144_v43 }
 0x89a   :  { %v3125_v46 = vpop.f32.mrf.mxu2 }
 0x89b   :  { %v3126_v32 = vadd.f32 %v3125_v46, %v6530_v39 }
 0x89d   :  { %v3145_v45 = vadd.f32 %v3126_v32, %v6336_v17 }
 0x89f   :  { %3161 = vst.msk [vmem:[%s6640_s5 + $0x70] sm:$0xff] %vm50_vm0, %v3145_v45 }
 0x8a2   :  { %v3128_v2 = vpop.f32.mrf.mxu2 }
 0x8a3   :  { %v3129_v26 = vadd.f32 %v3128_v2, %v6530_v39 }
 0x8a5   :  { %v3146_v16 = vadd.f32 %v3129_v26, %v6350_v10 }
 0x8a7   :  { %3162 = vst.msk [vmem:[%s6640_s5 + $0x78] sm:$0xff] %vm50_vm0, %v3146_v16 }

</bundles_post_ra>
